<compile_context>
chip_gen: v6e
topology: v6e:2x2x1
jax: 0.10.0
libtpu: 0.0.40
codegen_flags: <defaults>
</compile_context>

<pallas_src>
import jax
import jax.numpy as jnp
from jax import lax
from jax.experimental import pallas as pl
from jax.experimental.pallas import tpu as pltpu

KSZ = 5                   # conv kernel size
POOL = 2                  # pool size / stride
WIN = KSZ + POOL - 1      # 6: input window feeding one pooled output position

_VMEM_LIMIT = 32 * 1024 * 1024


# ----------------------------------------------------------------------------
# Pallas kernels
# ----------------------------------------------------------------------------
def _make_conv_pool_kernel(cout):
    """conv + bias + ReLU + 2x2 max-pool, all from one matmul on folded weights."""

    def kernel(p_ref, w_ref, b_ref, o_ref):
        # p_ref: (TM, K)       bf16 im2col patches (one row per POOLED output position)
        # w_ref: (K, 4*cout)   bf16 folded conv weight (4 pool members side by side)
        # b_ref: (1, 4*cout)   f32 bias, o_ref: (TM, cout) bf16
        y = jnp.dot(p_ref[...], w_ref[...], preferred_element_type=jnp.float32)
        y = jnp.maximum(y + b_ref[...], 0.0)                       # bias + fused ReLU
        # max over the 4 pooling members (static lane-group slices);
        # max(relu(a..d)) == relu(max(a..d)) so ordering is equivalent to PyTorch.
        m = jnp.maximum(jnp.maximum(y[:, 0:cout], y[:, cout:2 * cout]),
                        jnp.maximum(y[:, 2 * cout:3 * cout], y[:, 3 * cout:4 * cout]))
        o_ref[...] = m.astype(o_ref.dtype)

    return kernel


def _mlp_kernel(x_ref, w1_ref, b1_ref, w2_ref, b2_ref, o_ref):
    # fc1 (+ReLU) and fc2 fused: (TM,1250)@(1250,320) -> relu -> @(320,10)
    h = jnp.dot(x_ref[...], w1_ref[...],
                preferred_element_type=jnp.float32) + b1_ref[...]
    h = jnp.maximum(h, 0.0).astype(w2_ref.dtype)
    out = jnp.dot(h, w2_ref[...],
                  preferred_element_type=jnp.float32) + b2_ref[...]
    o_ref[...] = out.astype(o_ref.dtype)


# ----------------------------------------------------------------------------
# Pallas wrappers
# ----------------------------------------------------------------------------
def _row_tile(m, cap):
    """Largest row tile <= cap that equals m or is a multiple of 8 dividing m."""
    if m <= cap:
        return m
    t = cap - (cap % 8)
    while t >= 8:
        if m % t == 0:
            return t
        t -= 8
    return m   # fallback: single (large) block — still correct


def _conv_pool_block(patches, w_big, b_big, *, cout, max_rows=2048):
    """relu(conv) + 2x2 maxpool as one matmul kernel.  patches: (M, K) rows are pooled
    output positions; w_big: (K, 4*cout); returns (M, cout) bf16."""
    m, k = patches.shape
    n = w_big.shape[1]
    tm = _row_tile(m, max_rows)
    return pl.pallas_call(
        _make_conv_pool_kernel(cout),
        out_shape=jax.ShapeDtypeStruct((m, cout), jnp.bfloat16),
        grid=(m // tm,),
        in_specs=[
            pl.BlockSpec((tm, k), lambda i: (i, 0)),
            pl.BlockSpec((k, n), lambda i: (0, 0)),
            pl.BlockSpec((1, n), lambda i: (0, 0)),
        ],
        out_specs=pl.BlockSpec((tm, cout), lambda i: (i, 0)),
        compiler_params=pltpu.CompilerParams(
            dimension_semantics=("parallel",),
            vmem_limit_bytes=_VMEM_LIMIT),
    )(patches.astype(jnp.bfloat16), w_big.astype(jnp.bfloat16),
      b_big.reshape(1, n).astype(jnp.float32))


def _mlp_block(x, w1, b1, w2, b2, *, max_rows=1024):
    """Fused fc1(+ReLU)+fc2.  x: (B, 1250) -> (B, 10) f32."""
    m, k1 = x.shape
    n1 = w1.shape[1]
    n2 = w2.shape[1]
    tm = _row_tile(m, max_rows)
    return pl.pallas_call(
        _mlp_kernel,
        out_shape=jax.ShapeDtypeStruct((m, n2), jnp.float32),
        grid=(m // tm,),
        in_specs=[
            pl.BlockSpec((tm, k1), lambda i: (i, 0)),
            pl.BlockSpec((k1, n1), lambda i: (0, 0)),
            pl.BlockSpec((1, n1), lambda i: (0, 0)),
            pl.BlockSpec((n1, n2), lambda i: (0, 0)),
            pl.BlockSpec((1, n2), lambda i: (0, 0)),
        ],
        out_specs=pl.BlockSpec((tm, n2), lambda i: (i, 0)),
        compiler_params=pltpu.CompilerParams(
            dimension_semantics=("parallel",),
            vmem_limit_bytes=_VMEM_LIMIT),
    )(x.astype(jnp.bfloat16), w1.astype(jnp.bfloat16),
      b1.reshape(1, n1).astype(jnp.float32),
      w2.astype(jnp.bfloat16), b2.reshape(1, n2).astype(jnp.float32))


# ----------------------------------------------------------------------------
# XLA glue: weight folding + im2col (layout plumbing only, all tiny tensors)
# ----------------------------------------------------------------------------
def _fold_conv_pool_weight(w, b):
    """Fold a (KSZ,KSZ,Cin,Cout) conv weight + bias into a (WIN*WIN*Cin, 4*Cout) matrix
    that computes the 4 members of every 2x2 pooling window side by side in lanes."""
    kh, kw, cin, cout = w.shape
    w6 = jnp.zeros((WIN, WIN, cin, POOL, POOL, cout), w.dtype)
    for dh in range(POOL):
        for dw in range(POOL):
            w6 = w6.at[dh:dh + kh, dw:dw + kw, :, dh, dw, :].set(w)
    return (w6.reshape(WIN * WIN * cin, POOL * POOL * cout),
            jnp.tile(b, POOL * POOL))


def _extract_pool_patches(x):
    """x: (B,H,W,C) -> im2col patches (B*OPh*OPw, WIN*WIN*C) for a 5x5 valid conv
    followed by 2x2/2 max-pool; one row per POOLED output position."""
    b, h, w, c = x.shape
    oph = (h - WIN) // POOL + 1
    opw = (w - WIN) // POOL + 1
    cols = []
    for ih in range(WIN):
        for iw in range(WIN):
            cols.append(lax.slice(
                x, (0, ih, iw, 0),
                (b, ih + POOL * (oph - 1) + 1, iw + POOL * (opw - 1) + 1, c),
                (1, POOL, POOL, 1)))                               # (B, OPh, OPw, C)
    patches = jnp.concatenate(cols, axis=-1)                       # (B, OPh, OPw, 36*C)
    return patches.reshape(b * oph * opw, WIN * WIN * c), oph, opw


# ----------------------------------------------------------------------------
# Deterministic parameter construction (TT cores + STG gates -> dense weights)
# ----------------------------------------------------------------------------
def _stg_gate(mu):
    # deterministic STG forward: hard-sigmoid(mu + 0.5); sigma only affects training noise
    return jnp.clip(mu + 0.5, 0.0, 1.0)


def _tt_conv_weight(key, in_factors, out_factors, ranks, k):
    """Effective conv weight (k, k, Cin, Cout) from gated TT cores."""
    i1, i2 = in_factors
    o1, o2 = out_factors
    _, r1, r2, _ = ranks
    s = 0.5 / jnp.sqrt(jnp.float32(max(r1, 1)))
    k0, k1, k2, k3, k4 = jax.random.split(key, 5)
    S = jax.random.normal(k0, (1, k * k, r1), jnp.float32) * s        # spatial core
    A = jax.random.normal(k1, (r1, i1, o1, r2), jnp.float32) * s
    Bc = jax.random.normal(k2, (r2, i2, o2, 1), jnp.float32) * s
    g1 = _stg_gate(jax.random.normal(k3, (r1,), jnp.float32) * 0.1)
    g2 = _stg_gate(jax.random.normal(k4, (r2,), jnp.float32) * 0.1)
    S = S * g1[None, None, :]
    A = A * g2[None, None, None, :]
    w5 = jnp.einsum('zka,aijb,bpqy->kipjq', S, A, Bc)
    return w5.reshape(k, k, i1 * i2, o1 * o2)                         # (KH, KW, Cin, Cout)


def _tt_linear_weight(key, in_factors, out_factors, ranks):
    """Effective linear weight (in_features, out_features) from gated TT cores."""
    i1, i2, i3, i4 = in_factors
    o1, o2, o3, o4 = out_factors
    _, r1, r2, r3, _ = ranks
    s = 0.5 / jnp.sqrt(jnp.float32(max(r1, 1)))
    keys = jax.random.split(key, 7)
    G1 = jax.random.normal(keys[0], (1, i1, o1, r1), jnp.float32) * s
    G2 = jax.random.normal(keys[1], (r1, i2, o2, r2), jnp.float32) * s
    G3 = jax.random.normal(keys[2], (r2, i3, o3, r3), jnp.float32) * s
    G4 = jax.random.normal(keys[3], (r3, i4, o4, 1), jnp.float32) * s
    g1 = _stg_gate(jax.random.normal(keys[4], (r1,), jnp.float32) * 0.1)
    g2 = _stg_gate(jax.random.normal(keys[5], (r2,), jnp.float32) * 0.1)
    g3 = _stg_gate(jax.random.normal(keys[6], (r3,), jnp.float32) * 0.1)
    G1 = G1 * g1[None, None, None, :]
    G2 = G2 * g2[None, None, None, :]
    G3 = G3 * g3[None, None, None, :]
    w8 = jnp.einsum('aipb,bjqc,ckrd,dlse->ijklpqrs', G1, G2, G3, G4)
    return w8.reshape(i1 * i2 * i3 * i4, o1 * o2 * o3 * o4)


def init_params(key, layer_ranks=(20, 20, 20, 20)):
    r = layer_ranks
    ks = jax.random.split(key, 8)
    return {
        'w_conv1': _tt_conv_weight(ks[0], [1, 1], [4, 5], [1, r[0], r[0], 1], 5),
        'b_conv1': jax.random.normal(ks[1], (20,), jnp.float32) * 0.01,
        'w_conv2': _tt_conv_weight(ks[2], [4, 5], [5, 10], [1, r[1], r[1], 1], 5),
        'b_conv2': jax.random.normal(ks[3], (50,), jnp.float32) * 0.01,
        'w_fc1': _tt_linear_weight(ks[4], [5, 5, 5, 10], [4, 4, 4, 5],
                                   [1, r[2], r[2], r[2], 1]),
        'b_fc1': jax.random.normal(ks[5], (320,), jnp.float32) * 0.01,
        'w_fc2': _tt_linear_weight(ks[6], [4, 4, 4, 5], [1, 1, 1, 10],
                                   [1, r[3], r[3], r[3], 1]),
        'b_fc2': jax.random.normal(ks[7], (10,), jnp.float32) * 0.01,
    }


# ----------------------------------------------------------------------------
# Full forward pass
# ----------------------------------------------------------------------------
def lenet5_tt2_stg_forward(x_nchw, params):
    b = x_nchw.shape[0]
    x = jnp.transpose(x_nchw, (0, 2, 3, 1)).astype(jnp.float32)       # NCHW -> NHWC
    x = jnp.pad(x, ((0, 0), (2, 2), (2, 2), (0, 0)))                  # conv1 padding=2

    w1b, b1b = _fold_conv_pool_weight(params['w_conv1'], params['b_conv1'])
    w2b, b2b = _fold_conv_pool_weight(params['w_conv2'], params['b_conv2'])

    # ---- conv1 + ReLU + pool1 (single Pallas matmul kernel) ----
    p1_patches, ph1, pw1 = _extract_pool_patches(x)                   # (B*196, 36)
    p1 = _conv_pool_block(p1_patches, w1b, b1b, cout=20)              # (B*196, 20)
    p1 = p1.reshape(b, ph1, pw1, 20)                                  # (B,14,14,20)

    # ---- conv2 + ReLU + pool2 (single Pallas matmul kernel) ----
    p2_patches, ph2, pw2 = _extract_pool_patches(p1)                  # (B*25, 720)
    p2 = _conv_pool_block(p2_patches, w2b, b2b, cout=50)              # (B*25, 50)

    # PyTorch flattens NCHW; fold that permutation into the fc1 weight so the
    # (contiguous, free) NHWC flatten of p2 feeds the FC kernel with no transpose copy.
    feat = p2.reshape(b, ph2 * pw2 * 50)                              # (B,1250)
    wfc1 = params['w_fc1'].reshape(50, ph2, pw2, 320)
    wfc1 = jnp.transpose(wfc1, (1, 2, 0, 3)).reshape(ph2 * pw2 * 50, 320)

    # ---- fc1 + ReLU + fc2 (fused Pallas kernel) ----
    return _mlp_block(feat, wfc1, params['b_fc1'],
                      params['w_fc2'], params['b_fc2'])               # (B,10)


if __name__ == "__main__":
    key = jax.random.PRNGKey(0)
    kx, kp = jax.random.split(key)
    B = 2
    # MNIST-sized input is required by the architecture (flatten -> 1250 features)
    x = jax.random.normal(kx, (B, 1, 28, 28), jnp.float32)
    params = init_params(kp)

    fwd = jax.jit(lenet5_tt2_stg_forward)
    out = jax.block_until_ready(fwd(x, params))
    assert out.shape == (B, 10), out.shape
    assert bool(jnp.all(jnp.isfinite(out)))
    print("KERNEL_OK")
</pallas_src>

<mosaic_0001>
module attributes {stable_mosaic.version = 11 : i64} {
  func.func @kernel(%arg0: i32, %arg1: memref<392x36xbf16, #tpu.memory_space<vmem>>, %arg2: memref<36x80xbf16, #tpu.memory_space<vmem>>, %arg3: memref<1x80xf32, #tpu.memory_space<vmem>>, %arg4: memref<392x20xbf16, #tpu.memory_space<vmem>>) attributes {dimension_semantics = [#tpu.dimension_semantics<parallel>], iteration_bounds = array<i64: 1>, scalar_prefetch = 0 : i64, scratch_operands = 0 : i64, tpu.core_type = #tpu.core_type<tc>, window_params = [{transform_indices = @transform_0, window_bounds = array<i64: 392, 36>}, {pipeline_mode = #tpu.pipeline_mode<synchronous>, transform_indices = @transform_1, window_bounds = array<i64: 36, 80>}, {pipeline_mode = #tpu.pipeline_mode<synchronous>, transform_indices = @transform_2, window_bounds = array<i64: 1, 80>}, {transform_indices = @transform_3, window_bounds = array<i64: 392, 20>}]} {
    %c0 = arith.constant 0 : index
    %c0_0 = arith.constant 0 : index
    %0 = vector.load %arg1[%c0, %c0_0] : memref<392x36xbf16, #tpu.memory_space<vmem>>, vector<392x36xbf16>
    %c0_1 = arith.constant 0 : index
    %c0_2 = arith.constant 0 : index
    %1 = vector.load %arg2[%c0_1, %c0_2] : memref<36x80xbf16, #tpu.memory_space<vmem>>, vector<36x80xbf16>
    %cst = arith.constant dense<0.000000e+00> : vector<392x80xf32>
    %2 = tpu.matmul %0, %1, %cst {dimension_numbers = #tpu.dot_dimension_numbers<[1], [0], [0], [1], [0, 0, 1, 1], [], []>} : vector<392x36xbf16>, vector<36x80xbf16>, vector<392x80xf32> -> vector<392x80xf32>
    %c0_3 = arith.constant 0 : index
    %c0_4 = arith.constant 0 : index
    %3 = vector.load %arg3[%c0_3, %c0_4] : memref<1x80xf32, #tpu.memory_space<vmem>>, vector<1x80xf32>
    %4 = vector.broadcast %3 : vector<1x80xf32> to vector<392x80xf32>
    %5 = arith.addf %2, %4 : vector<392x80xf32>
    %cst_5 = arith.constant 0.000000e+00 : f32
    %6 = vector.broadcast %cst_5 : f32 to vector<392x80xf32>
    %7 = arith.maximumf %5, %6 : vector<392x80xf32>
    %8 = vector.extract_strided_slice %7 {offsets = [0, 0], sizes = [392, 20], strides = [1, 1]} : vector<392x80xf32> to vector<392x20xf32>
    %9 = vector.extract_strided_slice %7 {offsets = [0, 20], sizes = [392, 20], strides = [1, 1]} : vector<392x80xf32> to vector<392x20xf32>
    %10 = arith.maximumf %8, %9 : vector<392x20xf32>
    %11 = vector.extract_strided_slice %7 {offsets = [0, 40], sizes = [392, 20], strides = [1, 1]} : vector<392x80xf32> to vector<392x20xf32>
    %12 = vector.extract_strided_slice %7 {offsets = [0, 60], sizes = [392, 20], strides = [1, 1]} : vector<392x80xf32> to vector<392x20xf32>
    %13 = arith.maximumf %11, %12 : vector<392x20xf32>
    %14 = arith.maximumf %10, %13 : vector<392x20xf32>
    %15 = arith.truncf %14 : vector<392x20xf32> to vector<392x20xbf16>
    %c0_6 = arith.constant 0 : index
    %c0_7 = arith.constant 0 : index
    %16 = vector.load %arg4[%c0_6, %c0_7] : memref<392x20xbf16, #tpu.memory_space<vmem>>, vector<392x20xbf16>
    tpu.vector_store %arg4[%c0_6, %c0_7], %15 {strides = array<i32>} : memref<392x20xbf16, #tpu.memory_space<vmem>>, vector<392x20xbf16>,
    return
  }
  func.func @transform_0(%arg0: i32) -> (i32, i32) {
    %c0_i32 = arith.constant 0 : i32
    %c0_i32_0 = arith.constant 0 : i32
    return %arg0, %c0_i32 : i32, i32
  }
  func.func @transform_1(%arg0: i32) -> (i32, i32) {
    %c0_i32 = arith.constant 0 : i32
    %c0_i32_0 = arith.constant 0 : i32
    %c0_i32_1 = arith.constant 0 : i32
    return %c0_i32, %c0_i32_0 : i32, i32
  }
  func.func @transform_2(%arg0: i32) -> (i32, i32) {
    %c0_i32 = arith.constant 0 : i32
    %c0_i32_0 = arith.constant 0 : i32
    %c0_i32_1 = arith.constant 0 : i32
    return %c0_i32, %c0_i32_0 : i32, i32
  }
  func.func @transform_3(%arg0: i32) -> (i32, i32) {
    %c0_i32 = arith.constant 0 : i32
    %c0_i32_0 = arith.constant 0 : i32
    return %arg0, %c0_i32 : i32, i32
  }
}

module attributes {stable_mosaic.version = 11 : i64} {
  func.func @kernel(%arg0: i32, %arg1: memref<50x720xbf16, #tpu.memory_space<vmem>>, %arg2: memref<720x200xbf16, #tpu.memory_space<vmem>>, %arg3: memref<1x200xf32, #tpu.memory_space<vmem>>, %arg4: memref<50x50xbf16, #tpu.memory_space<vmem>>) attributes {dimension_semantics = [#tpu.dimension_semantics<parallel>], iteration_bounds = array<i64: 1>, scalar_prefetch = 0 : i64, scratch_operands = 0 : i64, tpu.core_type = #tpu.core_type<tc>, window_params = [{transform_indices = @transform_0, window_bounds = array<i64: 50, 720>}, {pipeline_mode = #tpu.pipeline_mode<synchronous>, transform_indices = @transform_1, window_bounds = array<i64: 720, 200>}, {pipeline_mode = #tpu.pipeline_mode<synchronous>, transform_indices = @transform_2, window_bounds = array<i64: 1, 200>}, {transform_indices = @transform_3, window_bounds = array<i64: 50, 50>}]} {
    %c0 = arith.constant 0 : index
    %c0_0 = arith.constant 0 : index
    %0 = vector.load %arg1[%c0, %c0_0] : memref<50x720xbf16, #tpu.memory_space<vmem>>, vector<50x720xbf16>
    %c0_1 = arith.constant 0 : index
    %c0_2 = arith.constant 0 : index
    %1 = vector.load %arg2[%c0_1, %c0_2] : memref<720x200xbf16, #tpu.memory_space<vmem>>, vector<720x200xbf16>
    %cst = arith.constant dense<0.000000e+00> : vector<50x200xf32>
    %2 = tpu.matmul %0, %1, %cst {dimension_numbers = #tpu.dot_dimension_numbers<[1], [0], [0], [1], [0, 0, 1, 1], [], []>} : vector<50x720xbf16>, vector<720x200xbf16>, vector<50x200xf32> -> vector<50x200xf32>
    %c0_3 = arith.constant 0 : index
    %c0_4 = arith.constant 0 : index
    %3 = vector.load %arg3[%c0_3, %c0_4] : memref<1x200xf32, #tpu.memory_space<vmem>>, vector<1x200xf32>
    %4 = vector.broadcast %3 : vector<1x200xf32> to vector<50x200xf32>
    %5 = arith.addf %2, %4 : vector<50x200xf32>
    %cst_5 = arith.constant 0.000000e+00 : f32
    %6 = vector.broadcast %cst_5 : f32 to vector<50x200xf32>
    %7 = arith.maximumf %5, %6 : vector<50x200xf32>
    %8 = vector.extract_strided_slice %7 {offsets = [0, 0], sizes = [50, 50], strides = [1, 1]} : vector<50x200xf32> to vector<50x50xf32>
    %9 = vector.extract_strided_slice %7 {offsets = [0, 50], sizes = [50, 50], strides = [1, 1]} : vector<50x200xf32> to vector<50x50xf32>
    %10 = arith.maximumf %8, %9 : vector<50x50xf32>
    %11 = vector.extract_strided_slice %7 {offsets = [0, 100], sizes = [50, 50], strides = [1, 1]} : vector<50x200xf32> to vector<50x50xf32>
    %12 = vector.extract_strided_slice %7 {offsets = [0, 150], sizes = [50, 50], strides = [1, 1]} : vector<50x200xf32> to vector<50x50xf32>
    %13 = arith.maximumf %11, %12 : vector<50x50xf32>
    %14 = arith.maximumf %10, %13 : vector<50x50xf32>
    %15 = arith.truncf %14 : vector<50x50xf32> to vector<50x50xbf16>
    %c0_6 = arith.constant 0 : index
    %c0_7 = arith.constant 0 : index
    %16 = vector.load %arg4[%c0_6, %c0_7] : memref<50x50xbf16, #tpu.memory_space<vmem>>, vector<50x50xbf16>
    tpu.vector_store %arg4[%c0_6, %c0_7], %15 {strides = array<i32>} : memref<50x50xbf16, #tpu.memory_space<vmem>>, vector<50x50xbf16>,
    return
  }
  func.func @transform_0(%arg0: i32) -> (i32, i32) {
    %c0_i32 = arith.constant 0 : i32
    %c0_i32_0 = arith.constant 0 : i32
    return %arg0, %c0_i32 : i32, i32
  }
  func.func @transform_1(%arg0: i32) -> (i32, i32) {
    %c0_i32 = arith.constant 0 : i32
    %c0_i32_0 = arith.constant 0 : i32
    %c0_i32_1 = arith.constant 0 : i32
    return %c0_i32, %c0_i32_0 : i32, i32
  }
  func.func @transform_2(%arg0: i32) -> (i32, i32) {
    %c0_i32 = arith.constant 0 : i32
    %c0_i32_0 = arith.constant 0 : i32
    %c0_i32_1 = arith.constant 0 : i32
    return %c0_i32, %c0_i32_0 : i32, i32
  }
  func.func @transform_3(%arg0: i32) -> (i32, i32) {
    %c0_i32 = arith.constant 0 : i32
    %c0_i32_0 = arith.constant 0 : i32
    return %arg0, %c0_i32 : i32, i32
  }
}

module attributes {stable_mosaic.version = 11 : i64} {
  func.func @_mlp_kernel(%arg0: i32, %arg1: memref<2x1250xbf16, #tpu.memory_space<vmem>>, %arg2: memref<1250x320xbf16, #tpu.memory_space<vmem>>, %arg3: memref<1x320xf32, #tpu.memory_space<vmem>>, %arg4: memref<320x10xbf16, #tpu.memory_space<vmem>>, %arg5: memref<1x10xf32, #tpu.memory_space<vmem>>, %arg6: memref<2x10xf32, #tpu.memory_space<vmem>>) attributes {dimension_semantics = [#tpu.dimension_semantics<parallel>], iteration_bounds = array<i64: 1>, scalar_prefetch = 0 : i64, scratch_operands = 0 : i64, tpu.core_type = #tpu.core_type<tc>, window_params = [{transform_indices = @transform_0, window_bounds = array<i64: 2, 1250>}, {pipeline_mode = #tpu.pipeline_mode<synchronous>, transform_indices = @transform_1, window_bounds = array<i64: 1250, 320>}, {pipeline_mode = #tpu.pipeline_mode<synchronous>, transform_indices = @transform_2, window_bounds = array<i64: 1, 320>}, {pipeline_mode = #tpu.pipeline_mode<synchronous>, transform_indices = @transform_3, window_bounds = array<i64: 320, 10>}, {pipeline_mode = #tpu.pipeline_mode<synchronous>, transform_indices = @transform_4, window_bounds = array<i64: 1, 10>}, {transform_indices = @transform_5, window_bounds = array<i64: 2, 10>}]} {
    %c0 = arith.constant 0 : index
    %c0_0 = arith.constant 0 : index
    %0 = vector.load %arg1[%c0, %c0_0] : memref<2x1250xbf16, #tpu.memory_space<vmem>>, vector<2x1250xbf16>
    %c0_1 = arith.constant 0 : index
    %c0_2 = arith.constant 0 : index
    %1 = vector.load %arg2[%c0_1, %c0_2] : memref<1250x320xbf16, #tpu.memory_space<vmem>>, vector<1250x320xbf16>
    %cst = arith.constant dense<0.000000e+00> : vector<2x320xf32>
    %2 = tpu.matmul %0, %1, %cst {dimension_numbers = #tpu.dot_dimension_numbers<[1], [0], [0], [1], [0, 0, 1, 1], [], []>} : vector<2x1250xbf16>, vector<1250x320xbf16>, vector<2x320xf32> -> vector<2x320xf32>
    %c0_3 = arith.constant 0 : index
    %c0_4 = arith.constant 0 : index
    %3 = vector.load %arg3[%c0_3, %c0_4] : memref<1x320xf32, #tpu.memory_space<vmem>>, vector<1x320xf32>
    %4 = vector.broadcast %3 : vector<1x320xf32> to vector<2x320xf32>
    %5 = arith.addf %2, %4 : vector<2x320xf32>
    %cst_5 = arith.constant 0.000000e+00 : f32
    %6 = vector.broadcast %cst_5 : f32 to vector<2x320xf32>
    %7 = arith.maximumf %5, %6 : vector<2x320xf32>
    %8 = arith.truncf %7 : vector<2x320xf32> to vector<2x320xbf16>
    %c0_6 = arith.constant 0 : index
    %c0_7 = arith.constant 0 : index
    %9 = vector.load %arg4[%c0_6, %c0_7] : memref<320x10xbf16, #tpu.memory_space<vmem>>, vector<320x10xbf16>
    %cst_8 = arith.constant dense<0.000000e+00> : vector<2x10xf32>
    %10 = tpu.matmul %8, %9, %cst_8 {dimension_numbers = #tpu.dot_dimension_numbers<[1], [0], [0], [1], [0, 0, 1, 1], [], []>} : vector<2x320xbf16>, vector<320x10xbf16>, vector<2x10xf32> -> vector<2x10xf32>
    %c0_9 = arith.constant 0 : index
    %c0_10 = arith.constant 0 : index
    %11 = vector.load %arg5[%c0_9, %c0_10] : memref<1x10xf32, #tpu.memory_space<vmem>>, vector<1x10xf32>
    %12 = vector.broadcast %11 : vector<1x10xf32> to vector<2x10xf32>
    %13 = arith.addf %10, %12 : vector<2x10xf32>
    %c0_11 = arith.constant 0 : index
    %c0_12 = arith.constant 0 : index
    %14 = vector.load %arg6[%c0_11, %c0_12] : memref<2x10xf32, #tpu.memory_space<vmem>>, vector<2x10xf32>
    tpu.vector_store %arg6[%c0_11, %c0_12], %13 {strides = array<i32>} : memref<2x10xf32, #tpu.memory_space<vmem>>, vector<2x10xf32>,
    return
  }
  func.func @transform_0(%arg0: i32) -> (i32, i32) {
    %c0_i32 = arith.constant 0 : i32
    %c0_i32_0 = arith.constant 0 : i32
    return %arg0, %c0_i32 : i32, i32
  }
  func.func @transform_1(%arg0: i32) -> (i32, i32) {
    %c0_i32 = arith.constant 0 : i32
    %c0_i32_0 = arith.constant 0 : i32
    %c0_i32_1 = arith.constant 0 : i32
    return %c0_i32, %c0_i32_0 : i32, i32
  }
  func.func @transform_2(%arg0: i32) -> (i32, i32) {
    %c0_i32 = arith.constant 0 : i32
    %c0_i32_0 = arith.constant 0 : i32
    %c0_i32_1 = arith.constant 0 : i32
    return %c0_i32, %c0_i32_0 : i32, i32
  }
  func.func @transform_3(%arg0: i32) -> (i32, i32) {
    %c0_i32 = arith.constant 0 : i32
    %c0_i32_0 = arith.constant 0 : i32
    %c0_i32_1 = arith.constant 0 : i32
    return %c0_i32, %c0_i32_0 : i32, i32
  }
  func.func @transform_4(%arg0: i32) -> (i32, i32) {
    %c0_i32 = arith.constant 0 : i32
    %c0_i32_0 = arith.constant 0 : i32
    %c0_i32_1 = arith.constant 0 : i32
    return %c0_i32, %c0_i32_0 : i32, i32
  }
  func.func @transform_5(%arg0: i32) -> (i32, i32) {
    %c0_i32 = arith.constant 0 : i32
    %c0_i32_0 = arith.constant 0 : i32
    return %arg0, %c0_i32 : i32, i32
  }
}

</mosaic_0001>

<bundles_post_ra>
// kernel: tile.13
= control target key start
LH: loop header
LB: loop body
LE: loop exit
PB: predicated region body
PF: predicated region fallthrough
CT: control target
= control target key end

     0   :  { %s22_s0 = inlined_call_operand.vmem [shape: f32[20], index: 0, kind: input, shape index: {}]   ;;  %s23_s1 = inlined_call_operand.vmem [shape: f32[4,20], index: 1, kind: output, shape index: {}]  }
   0x1   :  { %v4_v0 = vld [vmem:[%s22_s0] ss:$0 sm:$0xff] }
   0x2   :  { %5 = vst [vmem:[%s23_s1] sm:$0xf] %v4_v0 }

// kernel: tile.18
= control target key start
LH: loop header
LB: loop body
LE: loop exit
PB: predicated region body
PF: predicated region fallthrough
CT: control target
= control target key end

     0   :  { %vm8_vm0 = vcmask 162816   ;;  %s40_s8 = smov 20   ;;  %s41_s9 = smov 40   ;;  %vm14_vm1 = vcmask 654816   ;;  %vm20_vm2 = vcmask 490816   ;;  %vm26_vm3 = vcmask 326816   ;;  %s58_s0 = inlined_call_operand.vmem [shape: f32[4,20], index: 0, kind: input, shape index: {}]   ;;  %s59_s1 = inlined_call_operand.vmem [shape: f32[1,80], index: 1, kind: output, shape index: {}]  }
   0x1   :  { %v5_v0 = vld [vmem:[%s58_s0] sm:$0xf]  ;;  %s39_s0 = smov 60  }
   0x2   :  { %6 = vst [vmem:[#allocation1] sm:$0xf] %v5_v0 }
   0x9   :  { %v11_v1 = vld [vmem:[#allocation1 + $0x3] sm:$0x1]   ;;  %v23_v2 = vld [vmem:[#allocation1 + $0x1] sm:$0x1]   ;;  %v7_v3 = vld [vmem:[#allocation1] sm:$0x1]  }
   0xa   :  { %12 = vrot.lane.b32.xlu0 %v11_v1, %s39_s0  ;;  %24 = vrot.lane.b32.xlu1 %v23_v2, %s40_s8  ;;  %v17_v4 = vld [vmem:[#allocation1 + $0x2] sm:$0x1]   ;;  %9 = vst.msk [vmem:[#allocation0] sm:$0x1] %vm8_vm0, %v7_v3  }
   0xe   :  { %18 = vrot.lane.b32.xlu0 %v17_v4, %s41_s9 }
  0x7c   :  { %v13_v5 = vpop.permute.xlu0 %12   ;;  %v25_v6 = vpop.permute.xlu1 %24  }
  0x7d   :  { %15 = vst.msk [vmem:[#allocation0] sm:$0x1] %vm14_vm1, %v13_v5  }
  0x80   :  { %v19_v7 = vpop.permute.xlu0 %18  }
  0x81   :  { %21 = vst.msk [vmem:[#allocation0] sm:$0x1] %vm20_vm2, %v19_v7  }
  0x82   :  { %27 = vst.msk [vmem:[#allocation0] sm:$0x1] %vm26_vm3, %v25_v6  }
  0x89   :  { %v32_v8 = vld [vmem:[#allocation0] sm:$0x1] }
  0x8a   :  { %35 = vst [vmem:[%s59_s1] sm:$0x1] %v32_v8 }

// kernel: lenet5_tt2_stg_forward.3
= control target key start
LH: loop header
LB: loop body
LE: loop exit
PB: predicated region body
PF: predicated region fallthrough
CT: control target
= control target key end

     0   :  { %vm290_vm0 = vcmask 1041408   ;;  %v1880_v0 = vmov 0.0   ;;  %vm1881_vm1 = vmmov 0   ;;  %vm214_vm2 = vcmask 293888   ;;  %s2908_s1 = inlined_call_operand.vmem [shape: bf16[36,80], index: 1, kind: input, shape index: {}]   ;;  %s2909_s0 = inlined_call_operand.vmem [shape: bf16[392,36], index: 0, kind: input, shape index: {}]   ;;  %s2910_s2 = inlined_call_operand.vmem [shape: f32[1,80], index: 2, kind: input, shape index: {}]   ;;  %s2911_s3 = inlined_call_operand.vmem [shape: bf16[392,20], index: 3, kind: output, shape index: {}]  }
   0x1   :  { %1496 = vmatprep.subr.bf16.mxu0 %v1880_v0  ;;  %1602 = vmatprep.subr.bf16.mxu1 %v1880_v0  ;;  %v1852_v1 = vld [vmem:[%s2908_s1 + $0x10] ss:$0 sps:$4 sm:$0x33]   ;;  %v1853_v3 = vld [vmem:[%s2908_s1 + $0x8] sm:$0xff]   ;;  %v1854_v4 = vld [vmem:[%s2908_s1] sm:$0xff]   ;;  %vm1262_vm3 = vcmask 158720  }
   0x2   :  { %1502 = vmatprep.mubr.msk.bf16.mxu0 %vm1881_vm1, %v1880_v0  ;;  %1554 = vmatprep.mubr.msk.bf16.mxu1 %vm1881_vm1, %v1880_v0  ;;  %v292_v2 = vsel %vm290_vm0, %v1852_v1, 0  ;;  %v1855_v5 = vld [vmem:[%s2909_s0] sm:$0xff]   ;;  %v1856_v6 = vld [vmem:[%s2909_s0 + $0x68] sm:$0xff]   ;;  %v1858_v8 = vld [vmem:[%s2909_s0 + $0x70] sm:$0xff]  }
   0x3   :  { %1497 = vmatpush3.bf16.msra.mxu0 %v292_v2  ;;  %1605 = vmatpush3.bf16.msra.mxu1 %v292_v2  ;;  %v1857_v7 = vld [vmem:[%s2909_s0 + $0x8] sm:$0xff]   ;;  %v1859_v9 = vld [vmem:[%s2909_s0 + $0x10] sm:$0xff]   ;;  %v1860_v10 = vld [vmem:[%s2909_s0 + $0x78] sm:$0xff]  }
   0x4   :  { %1498 = vmatprep.subr.bf16.mxu0 %v1880_v0  ;;  %1603 = vmatprep.subr.bf16.mxu1 %v1880_v0  ;;  %v1861_v11 = vld [vmem:[%s2909_s0 + $0x18] sm:$0xff]   ;;  %v1862_v12 = vld [vmem:[%s2909_s0 + $0x80] sm:$0xff]   ;;  %v1864_v14 = vld [vmem:[%s2909_s0 + $0x88] sm:$0xff]  }
   0x5   :  { %v1863_v13 = vld [vmem:[%s2909_s0 + $0x20] sm:$0xff]   ;;  %v1865_v15 = vld [vmem:[%s2909_s0 + $0x28] sm:$0xff]   ;;  %v1866_v16 = vld [vmem:[%s2909_s0 + $0x90] sm:$0xff]  }
   0x6   :  { %v1867_v17 = vld [vmem:[%s2909_s0 + $0x30] sm:$0xff]   ;;  %v1868_v18 = vld [vmem:[%s2909_s0 + $0x98] sm:$0xff]   ;;  %v1870_v20 = vld [vmem:[%s2909_s0 + $0xa0] sm:$0xff]  }
   0x7   :  { %1499 = vmatpush3.bf16.msra.mxu0 %v1853_v3  ;;  %1606 = vmatpush3.bf16.msra.mxu1 %v1853_v3  ;;  %v1869_v19 = vld [vmem:[%s2909_s0 + $0x38] sm:$0xff]   ;;  %v1871_v21 = vld [vmem:[%s2909_s0 + $0x40] sm:$0xff]   ;;  %v1872_v22 = vld [vmem:[%s2909_s0 + $0xa8] sm:$0xff]  }
   0x8   :  { %1500 = vmatprep.subr.bf16.mxu0 %v1880_v0  ;;  %1604 = vmatprep.subr.bf16.mxu1 %v1880_v0  ;;  %v1873_v23 = vld [vmem:[%s2909_s0 + $0x48] sm:$0xff]   ;;  %v1874_v24 = vld [vmem:[%s2909_s0 + $0xb0] sm:$0xff]   ;;  %v1877_v26 = vld [vmem:[%s2909_s0 + $0xb8] sm:$0xff]  }
   0x9   :  { %v1875_v25 = vld [vmem:[%s2909_s0 + $0x50] sm:$0xff]   ;;  %v1876_v27 = vld [vmem:[%s2909_s0 + $0x58] sm:$0xff]   ;;  %v1879_v28 = vld [vmem:[%s2909_s0 + $0xc0] ss:$0 sps:$4 sm:$0xff]  }
   0xa   :  { %v1878_v29 = vld [vmem:[%s2909_s0 + $0x60] sm:$0xff]   ;;  %s1882_s0 = smov 108  }
   0xb   :  { %1501 = vmatpush3.bf16.msra.mxu0 %v1854_v4  ;;  %1607 = vmatpush3.bf16.msra.mxu1 %v1854_v4  ;;  %v2072_v30 = vld [vmem:[%s2910_s2] ss:$0 sm:$0xff]  ;;  %s1883_s2 = smov 88  }
   0xe   :  { %1503 = vmatmul.mubr.msk.bf16.vlgmr.msra.gmra.mxu0 %vm214_vm2, %v1855_v5  ;;  %1555 = vmatmul.mubr.msk.bf16.vlgmr.msra.gmra.mxu1 %vm214_vm2, %v1856_v6 }
   0xf   :  { %1506 = vmatprep.mubr.msk.bf16.mxu0 %vm1881_vm1, %v1880_v0  ;;  %1558 = vmatprep.mubr.msk.bf16.mxu1 %vm1881_vm1, %v1880_v0 }
  0x16   :  { %1507 = vmatmul.mubr.msk.bf16.gmra.mxu0 %vm214_vm2, %v1857_v7  ;;  %1559 = vmatmul.mubr.msk.bf16.gmra.mxu1 %vm214_vm2, %v1858_v8 }
  0x17   :  { %1510 = vmatprep.mubr.msk.bf16.mxu0 %vm1881_vm1, %v1880_v0  ;;  %1562 = vmatprep.mubr.msk.bf16.mxu1 %vm1881_vm1, %v1880_v0 }
  0x1e   :  { %1511 = vmatmul.mubr.msk.bf16.gmra.mxu0 %vm214_vm2, %v1859_v9  ;;  %1563 = vmatmul.mubr.msk.bf16.gmra.mxu1 %vm214_vm2, %v1860_v10 }
  0x1f   :  { %1514 = vmatprep.mubr.msk.bf16.mxu0 %vm1881_vm1, %v1880_v0  ;;  %1566 = vmatprep.mubr.msk.bf16.mxu1 %vm1881_vm1, %v1880_v0 }
  0x26   :  { %1515 = vmatmul.mubr.msk.bf16.gmra.mxu0 %vm214_vm2, %v1861_v11  ;;  %1567 = vmatmul.mubr.msk.bf16.gmra.mxu1 %vm214_vm2, %v1862_v12 }
  0x27   :  { %1518 = vmatprep.mubr.msk.bf16.mxu0 %vm1881_vm1, %v1880_v0  ;;  %1570 = vmatprep.mubr.msk.bf16.mxu1 %vm1881_vm1, %v1880_v0 }
  0x2e   :  { %1519 = vmatmul.mubr.msk.bf16.gmra.mxu0 %vm214_vm2, %v1863_v13  ;;  %1571 = vmatmul.mubr.msk.bf16.gmra.mxu1 %vm214_vm2, %v1864_v14 }
  0x2f   :  { %1522 = vmatprep.mubr.msk.bf16.mxu0 %vm1881_vm1, %v1880_v0  ;;  %1574 = vmatprep.mubr.msk.bf16.mxu1 %vm1881_vm1, %v1880_v0 }
  0x36   :  { %1523 = vmatmul.mubr.msk.bf16.gmra.mxu0 %vm214_vm2, %v1865_v15  ;;  %1575 = vmatmul.mubr.msk.bf16.gmra.mxu1 %vm214_vm2, %v1866_v16 }
  0x37   :  { %1526 = vmatprep.mubr.msk.bf16.mxu0 %vm1881_vm1, %v1880_v0  ;;  %1578 = vmatprep.mubr.msk.bf16.mxu1 %vm1881_vm1, %v1880_v0 }
  0x3e   :  { %1527 = vmatmul.mubr.msk.bf16.gmra.mxu0 %vm214_vm2, %v1867_v17  ;;  %1579 = vmatmul.mubr.msk.bf16.gmra.mxu1 %vm214_vm2, %v1868_v18 }
  0x3f   :  { %1530 = vmatprep.mubr.msk.bf16.mxu0 %vm1881_vm1, %v1880_v0  ;;  %1582 = vmatprep.mubr.msk.bf16.mxu1 %vm1881_vm1, %v1880_v0 }
  0x46   :  { %1531 = vmatmul.mubr.msk.bf16.gmra.mxu0 %vm214_vm2, %v1869_v19  ;;  %1583 = vmatmul.mubr.msk.bf16.gmra.mxu1 %vm214_vm2, %v1870_v20 }
  0x47   :  { %1534 = vmatprep.mubr.msk.bf16.mxu0 %vm1881_vm1, %v1880_v0  ;;  %1586 = vmatprep.mubr.msk.bf16.mxu1 %vm1881_vm1, %v1880_v0 }
  0x4e   :  { %1535 = vmatmul.mubr.msk.bf16.gmra.mxu0 %vm214_vm2, %v1871_v21  ;;  %1587 = vmatmul.mubr.msk.bf16.gmra.mxu1 %vm214_vm2, %v1872_v22 }
  0x4f   :  { %1538 = vmatprep.mubr.msk.bf16.mxu0 %vm1881_vm1, %v1880_v0  ;;  %1590 = vmatprep.mubr.msk.bf16.mxu1 %vm1881_vm1, %v1880_v0 }
  0x56   :  { %1539 = vmatmul.mubr.msk.bf16.gmra.mxu0 %vm214_vm2, %v1873_v23  ;;  %1591 = vmatmul.mubr.msk.bf16.gmra.mxu1 %vm214_vm2, %v1874_v24 }
  0x57   :  { %1542 = vmatprep.mubr.msk.bf16.mxu0 %vm1881_vm1, %v1880_v0  ;;  %1594 = vmatprep.mubr.msk.bf16.mxu1 %vm1881_vm1, %v1880_v0 }
  0x5e   :  { %1543 = vmatmul.mubr.msk.bf16.gmra.mxu0 %vm214_vm2, %v1875_v25  ;;  %1595 = vmatmul.mubr.msk.bf16.gmra.mxu1 %vm214_vm2, %v1877_v26 }
  0x5f   :  { %1546 = vmatprep.mubr.msk.bf16.mxu0 %vm1881_vm1, %v1880_v0  ;;  %1598 = vmatprep.mubr.msk.bf16.mxu1 %vm1881_vm1, %v1880_v0 }
  0x66   :  { %1547 = vmatmul.mubr.msk.bf16.gmra.mxu0 %vm214_vm2, %v1876_v27  ;;  %1599 = vmatmul.mubr.msk.bf16.gmra.mxu1 %vm214_vm2, %v1879_v28 }
  0x67   :  { %1550 = vmatprep.mubr.msk.bf16.mxu0 %vm1881_vm1, %v1880_v0 }
  0x6e   :  { %1551 = vmatmul.mubr.msk.bf16.gmra.mxu0 %vm214_vm2, %v1878_v29 }
  0xce   :  { %v328_v31 = vpop.f32.mrf.mxu0  ;;  %v432_v32 = vpop.f32.mrf.mxu1 }
  0xcf   :  { %v2075_v33 = vadd.f32 %v2072_v30, %v432_v32  ;;  %v2078_v36 = vadd.f32 %v2072_v30, %v328_v31 }
  0xd0   :  { %v1504_v34 = vpop.f32.mrf.mxu0  ;;  %v1556_v35 = vpop.f32.mrf.mxu1 }
  0xd1   :  { %v552_v39 = vmax.f32 %v2075_v33, 0.0  ;;  %v2950_v44 = vmax.f32 %v2078_v36, 0.0 }
  0xd2   :  { %v331_v37 = vpop.f32.mrf.mxu0  ;;  %v435_v38 = vpop.f32.mrf.mxu1 }
  0xd3   :  { %v2082_v40 = vadd.f32 %v2072_v30, %v331_v37  ;;  %v2085_v41 = vadd.f32 %v2072_v30, %v435_v38 }
  0xd4   :  { %v1505_v42 = vpop.f32.mrf.mxu0  ;;  %v1557_v43 = vpop.f32.mrf.mxu1 }
  0xd5   :  { %v527_v45 = vmax.f32 %v2082_v40, 0.0  ;;  %v553_v46 = vmax.f32 %v2085_v41, 0.0 }
  0xd6   :  { %v336_v47 = vpop.f32.mrf.mxu0  ;;  %v440_v48 = vpop.f32.mrf.mxu1 }
  0xd7   :  { %v1617_v49 = vpack.i.bf16 %v553_v46, %v552_v39  ;;  %v1612_v50 = vpack.i.bf16 %v527_v45, %v2950_v44  ;;  %v2099_v53 = vadd.f32 %v2072_v30, %v336_v47  ;;  %v2102_v54 = vadd.f32 %v2072_v30, %v440_v48 }
  0xd8   :  { %v1508_v51 = vpop.f32.mrf.mxu0  ;;  %v1560_v52 = vpop.f32.mrf.mxu1 }
  0xd9   :  { %1618 = vrot.lane.b32.xlu1 %v1617_v49, %s1882_s0  ;;  %1613 = vrot.lane.b32.xlu0 %v1612_v50, %s1882_s0  ;;  %v2946_v61 = vmax.f32 %v2099_v53, 0.0  ;;  %v2944_v62 = vmax.f32 %v2102_v54, 0.0 }
  0xda   :  { %v339_v55 = vpop.f32.mrf.mxu0  ;;  %v443_v56 = vpop.f32.mrf.mxu1 }
  0xdb   :  { %v2107_v57 = vadd.f32 %v2072_v30, %v339_v55  ;;  %v2110_v58 = vadd.f32 %v2072_v30, %v443_v56 }
  0xdc   :  { %v1509_v59 = vpop.f32.mrf.mxu0  ;;  %v1561_v60 = vpop.f32.mrf.mxu1 }
  0xdd   :  { %v2949_v63 = vmax.f32 %v2107_v57, 0.0  ;;  %v2945_v0 = vmax.f32 %v2110_v58, 0.0 }
  0xde   :  { %v344_v1 = vpop.f32.mrf.mxu0  ;;  %v448_v2 = vpop.f32.mrf.mxu1 }
  0xdf   :  { %v1622_v3 = vpack.i.bf16 %v2949_v63, %v2946_v61  ;;  %v1627_v6 = vpack.i.bf16 %v2945_v0, %v2944_v62  ;;  %v2125_v7 = vadd.f32 %v2072_v30, %v344_v1  ;;  %v2128_v8 = vadd.f32 %v2072_v30, %v448_v2 }
  0xe0   :  { %v1512_v4 = vpop.f32.mrf.mxu0  ;;  %v1564_v5 = vpop.f32.mrf.mxu1 }
  0xe1   :  { %1623 = vrot.lane.b32.xlu0 %v1622_v3, %s1882_s0  ;;  %v2938_v15 = vmax.f32 %v2125_v7, 0.0  ;;  %v2936_v16 = vmax.f32 %v2128_v8, 0.0 }
  0xe2   :  { %v347_v9 = vpop.f32.mrf.mxu0  ;;  %v451_v10 = vpop.f32.mrf.mxu1 }
  0xe3   :  { %v2132_v11 = vadd.f32 %v2072_v30, %v347_v9  ;;  %v2135_v12 = vadd.f32 %v2072_v30, %v451_v10 }
  0xe4   :  { %v1513_v13 = vpop.f32.mrf.mxu0  ;;  %v1565_v14 = vpop.f32.mrf.mxu1 }
  0xe5   :  { %v2941_v17 = vmax.f32 %v2132_v11, 0.0  ;;  %v2937_v18 = vmax.f32 %v2135_v12, 0.0  ;;  %1628 = vrot.lane.b32.xlu0 %v1627_v6, %s1882_s0 }
  0xe6   :  { %v352_v19 = vpop.f32.mrf.mxu0  ;;  %v456_v20 = vpop.f32.mrf.mxu1 }
  0xe7   :  { %v1632_v21 = vpack.i.bf16 %v2941_v17, %v2938_v15  ;;  %v2147_v22 = vadd.f32 %v2072_v30, %v456_v20  ;;  %v1637_v25 = vpack.i.bf16 %v2937_v18, %v2936_v16  ;;  %v2154_v26 = vadd.f32 %v2072_v30, %v352_v19 }
  0xe8   :  { %v1516_v23 = vpop.f32.mrf.mxu0  ;;  %v1568_v24 = vpop.f32.mrf.mxu1 }
  0xe9   :  { %1633 = vrot.lane.b32.xlu1 %v1632_v21, %s1882_s0  ;;  %v2930_v29 = vmax.f32 %v2147_v22, 0.0  ;;  %v2928_v37 = vmax.f32 %v2154_v26, 0.0 }
  0xea   :  { %v355_v27 = vpop.f32.mrf.mxu0  ;;  %v459_v28 = vpop.f32.mrf.mxu1 }
  0xeb   :  { %v2159_v31 = vadd.f32 %v2072_v30, %v355_v27  ;;  %v2162_v32 = vadd.f32 %v2072_v30, %v459_v28 }
  0xec   :  { %v1517_v34 = vpop.f32.mrf.mxu0  ;;  %v1569_v35 = vpop.f32.mrf.mxu1 }
  0xed   :  { %v2929_v38 = vmax.f32 %v2159_v31, 0.0  ;;  %v2935_v42 = vmax.f32 %v2162_v32, 0.0  ;;  %1638 = vrot.lane.b32.xlu1 %v1637_v25, %s1882_s0 }
  0xee   :  { %v360_v43 = vpop.f32.mrf.mxu0  ;;  %v464_v47 = vpop.f32.mrf.mxu1 }
  0xef   :  { %v1642_v48 = vpack.i.bf16 %v2929_v38, %v2928_v37  ;;  %v1647_v49 = vpack.i.bf16 %v2935_v42, %v2930_v29  ;;  %v2177_v50 = vadd.f32 %v2072_v30, %v464_v47  ;;  %v2180_v55 = vadd.f32 %v2072_v30, %v360_v43 }
  0xf0   :  { %v1520_v51 = vpop.f32.mrf.mxu0  ;;  %v1572_v52 = vpop.f32.mrf.mxu1 }
  0xf1   :  { %1648 = vrot.lane.b32.xlu0 %v1647_v49, %s1882_s0  ;;  %1643 = vrot.lane.b32.xlu1 %v1642_v48, %s1882_s0  ;;  %v2922_v60 = vmax.f32 %v2177_v50, 0.0  ;;  %v2920_v5 = vmax.f32 %v2180_v55, 0.0 }
  0xf2   :  { %v363_v56 = vpop.f32.mrf.mxu0  ;;  %v467_v59 = vpop.f32.mrf.mxu1 }
  0xf3   :  { %v2186_v1 = vadd.f32 %v2072_v30, %v363_v56  ;;  %v2189_v2 = vadd.f32 %v2072_v30, %v467_v59 }
  0xf4   :  { %v1521_v3 = vpop.f32.mrf.mxu0  ;;  %v1573_v4 = vpop.f32.mrf.mxu1 }
  0xf5   :  { %v2921_v6 = vmax.f32 %v2186_v1, 0.0  ;;  %v2927_v9 = vmax.f32 %v2189_v2, 0.0 }
  0xf6   :  { %v368_v10 = vpop.f32.mrf.mxu0  ;;  %v472_v13 = vpop.f32.mrf.mxu1 }
  0xf7   :  { %v1652_v14 = vpack.i.bf16 %v2921_v6, %v2920_v5  ;;  %v1657_v19 = vpack.i.bf16 %v2927_v9, %v2922_v60  ;;  %v2203_v20 = vadd.f32 %v2072_v30, %v472_v13  ;;  %v2206_v24 = vadd.f32 %v2072_v30, %v368_v10 }
  0xf8   :  { %v1524_v21 = vpop.f32.mrf.mxu0  ;;  %v1576_v23 = vpop.f32.mrf.mxu1 }
  0xf9   :  { %1658 = vrot.lane.b32.xlu1 %v1657_v19, %s1882_s0  ;;  %1653 = vrot.lane.b32.xlu0 %v1652_v14, %s1882_s0  ;;  %v2914_v28 = vmax.f32 %v2203_v20, 0.0  ;;  %v2912_v48 = vmax.f32 %v2206_v24, 0.0 }
  0xfa   :  { %v371_v25 = vpop.f32.mrf.mxu0  ;;  %v475_v27 = vpop.f32.mrf.mxu1 }
  0xfb   :  { %v2212_v34 = vadd.f32 %v2072_v30, %v371_v25  ;;  %v2215_v35 = vadd.f32 %v2072_v30, %v475_v27 }
  0xfc   :  { %v1525_v43 = vpop.f32.mrf.mxu0  ;;  %v1577_v47 = vpop.f32.mrf.mxu1 }
  0xfd   :  { %v2913_v49 = vmax.f32 %v2212_v34, 0.0  ;;  %v2919_v51 = vmax.f32 %v2215_v35, 0.0 }
  0xfe   :  { %v376_v52 = vpop.f32.mrf.mxu0  ;;  %v480_v56 = vpop.f32.mrf.mxu1 }
  0xff   :  { %v1662_v59 = vpack.i.bf16 %v2913_v49, %v2912_v48  ;;  %v1667_v3 = vpack.i.bf16 %v2919_v51, %v2914_v28  ;;  %v2229_v4 = vadd.f32 %v2072_v30, %v480_v56  ;;  %v2232_v14 = vadd.f32 %v2072_v30, %v376_v52 }
 0x100   :  { %v1528_v10 = vpop.f32.mrf.mxu0  ;;  %v1580_v13 = vpop.f32.mrf.mxu1 }
 0x101   :  { %1668 = vrot.lane.b32.xlu0 %v1667_v3, %s1882_s0  ;;  %1663 = vrot.lane.b32.xlu1 %v1662_v59, %s1882_s0  ;;  %v2917_v23 = vmax.f32 %v2229_v4, 0.0  ;;  %v2915_v56 = vmax.f32 %v2232_v14, 0.0 }
 0x102   :  { %v379_v19 = vpop.f32.mrf.mxu0  ;;  %v483_v21 = vpop.f32.mrf.mxu1 }
 0x103   :  { %v2238_v25 = vadd.f32 %v2072_v30, %v379_v19  ;;  %v2241_v27 = vadd.f32 %v2072_v30, %v483_v21 }
 0x104   :  { %v1529_v43 = vpop.f32.mrf.mxu0  ;;  %v1581_v47 = vpop.f32.mrf.mxu1 }
 0x105   :  { %v2916_v52 = vmax.f32 %v2238_v25, 0.0  ;;  %v2918_v3 = vmax.f32 %v2241_v27, 0.0 }
 0x106   :  { %v384_v10 = vpop.f32.mrf.mxu0  ;;  %v488_v59 = vpop.f32.mrf.mxu1 }
 0x107   :  { %v1672_v13 = vpack.i.bf16 %v2916_v52, %v2915_v56  ;;  %v1677_v19 = vpack.i.bf16 %v2918_v3, %v2917_v23  ;;  %v2255_v21 = vadd.f32 %v2072_v30, %v488_v59  ;;  %v2258_v48 = vadd.f32 %v2072_v30, %v384_v10 }
 0x108   :  { %v1532_v43 = vpop.f32.mrf.mxu0  ;;  %v1584_v47 = vpop.f32.mrf.mxu1 }
 0x109   :  { %1678 = vrot.lane.b32.xlu1 %v1677_v19, %s1882_s0  ;;  %1673 = vrot.lane.b32.xlu0 %v1672_v13, %s1882_s0  ;;  %v2925_v56 = vmax.f32 %v2255_v21, 0.0  ;;  %v2923_v47 = vmax.f32 %v2258_v48, 0.0 }
 0x10a   :  { %v387_v49 = vpop.f32.mrf.mxu0  ;;  %v491_v28 = vpop.f32.mrf.mxu1 }
 0x10b   :  { %v2264_v52 = vadd.f32 %v2072_v30, %v387_v49  ;;  %v2267_v23 = vadd.f32 %v2072_v30, %v491_v28 }
 0x10c   :  { %v1533_v59 = vpop.f32.mrf.mxu0  ;;  %v1585_v43 = vpop.f32.mrf.mxu1 }
 0x10d   :  { %v2924_v10 = vmax.f32 %v2264_v52, 0.0  ;;  %v2926_v19 = vmax.f32 %v2267_v23, 0.0 }
 0x10e   :  { %v392_v3 = vpop.f32.mrf.mxu0  ;;  %v496_v13 = vpop.f32.mrf.mxu1 }
 0x10f   :  { %v1682_v51 = vpack.i.bf16 %v2924_v10, %v2923_v47  ;;  %v1687_v28 = vpack.i.bf16 %v2926_v19, %v2925_v56  ;;  %v2281_v49 = vadd.f32 %v2072_v30, %v496_v13  ;;  %v2284_v5 = vadd.f32 %v2072_v30, %v392_v3 }
 0x110   :  { %v1536_v59 = vpop.f32.mrf.mxu0  ;;  %v1588_v43 = vpop.f32.mrf.mxu1 }
 0x111   :  { %1688 = vrot.lane.b32.xlu0 %v1687_v28, %s1882_s0  ;;  %1683 = vrot.lane.b32.xlu1 %v1682_v51, %s1882_s0  ;;  %v2933_v47 = vmax.f32 %v2281_v49, 0.0  ;;  %v2931_v43 = vmax.f32 %v2284_v5, 0.0 }
 0x112   :  { %v395_v6 = vpop.f32.mrf.mxu0  ;;  %v499_v60 = vpop.f32.mrf.mxu1 }
 0x113   :  { %v2290_v10 = vadd.f32 %v2072_v30, %v395_v6  ;;  %v2293_v56 = vadd.f32 %v2072_v30, %v499_v60 }
 0x114   :  { %v1537_v13 = vpop.f32.mrf.mxu0  ;;  %v1589_v59 = vpop.f32.mrf.mxu1 }
 0x115   :  { %v2932_v3 = vmax.f32 %v2290_v10, 0.0  ;;  %v2934_v28 = vmax.f32 %v2293_v56, 0.0 }
 0x116   :  { %v400_v19 = vpop.f32.mrf.mxu0  ;;  %v504_v51 = vpop.f32.mrf.mxu1 }
 0x117   :  { %v1692_v9 = vpack.i.bf16 %v2932_v3, %v2931_v43  ;;  %v1697_v60 = vpack.i.bf16 %v2934_v28, %v2933_v47  ;;  %v2307_v6 = vadd.f32 %v2072_v30, %v504_v51  ;;  %v2310_v37 = vadd.f32 %v2072_v30, %v400_v19 }
 0x118   :  { %v1540_v13 = vpop.f32.mrf.mxu0  ;;  %v1592_v59 = vpop.f32.mrf.mxu1 }
 0x119   :  { %1698 = vrot.lane.b32.xlu1 %v1697_v60, %s1882_s0  ;;  %1693 = vrot.lane.b32.xlu0 %v1692_v9, %s1882_s0  ;;  %v2942_v43 = vmax.f32 %v2307_v6, 0.0  ;;  %v2939_v59 = vmax.f32 %v2310_v37, 0.0 }
 0x11a   :  { %v403_v38 = vpop.f32.mrf.mxu0  ;;  %v507_v29 = vpop.f32.mrf.mxu1 }
 0x11b   :  { %v2316_v3 = vadd.f32 %v2072_v30, %v403_v38  ;;  %v2319_v47 = vadd.f32 %v2072_v30, %v507_v29 }
 0x11c   :  { %v1541_v51 = vpop.f32.mrf.mxu0  ;;  %v1593_v13 = vpop.f32.mrf.mxu1 }
 0x11d   :  { %v2940_v19 = vmax.f32 %v2316_v3, 0.0  ;;  %v2943_v60 = vmax.f32 %v2319_v47, 0.0 }
 0x11e   :  { %v408_v28 = vpop.f32.mrf.mxu0  ;;  %v512_v9 = vpop.f32.mrf.mxu1 }
 0x11f   :  { %v1702_v42 = vpack.i.bf16 %v2940_v19, %v2939_v59  ;;  %v1707_v29 = vpack.i.bf16 %v2943_v60, %v2942_v43  ;;  %v2333_v13 = vadd.f32 %v2072_v30, %v408_v28 }
 0x120   :  { %v1544_v38 = vpop.f32.mrf.mxu0  ;;  %v1596_v51 = vpop.f32.mrf.mxu1 }
 0x121   :  { %1708 = vrot.lane.b32.xlu0 %v1707_v29, %s1882_s0  ;;  %1703 = vrot.lane.b32.xlu1 %v1702_v42, %s1882_s0  ;;  %v2947_v17 = vmax.f32 %v2333_v13, 0.0 }
 0x122   :  { %v411_v16 = vpop.f32.mrf.mxu0  ;;  %v515_v18 = vpop.f32.mrf.mxu1 }
 0x123   :  { %v2338_v15 = vadd.f32 %v2072_v30, %v411_v16  ;;  %v2351_v16 = vadd.f32 %v2072_v30, %v512_v9 }
 0x124   :  { %v1545_v59 = vpop.f32.mrf.mxu0  ;;  %v1597_v19 = vpop.f32.mrf.mxu1 }
 0x125   :  { %v2948_v43 = vmax.f32 %v2338_v15, 0.0  ;;  %v2354_v59 = vadd.f32 %v2072_v30, %v515_v18 }
 0x126   :  { %v416_v38 = vpop.f32.mrf.mxu0  ;;  %v520_v51 = vpop.f32.mrf.mxu1 }
 0x127   :  { %v1712_v28 = vpack.i.bf16 %v2948_v43, %v2947_v17  ;;  %v2347_v60 = vadd.f32 %v2072_v30, %v416_v38 }
 0x128   :  { %v1548_v29 = vpop.f32.mrf.mxu0  ;;  %v1600_v42 = vpop.f32.mrf.mxu1 }
 0x129   :  { %1713 = vrot.lane.b32.xlu0 %v1712_v28, %s1882_s0  ;;  %v2951_v29 = vmax.f32 %v2347_v60, 0.0  ;;  %v2952_v42 = vmax.f32 %v2351_v16, 0.0  ;;  %v2953_v28 = vmax.f32 %v2354_v59, 0.0 }
 0x12a   :  { %v419_v19 = vpop.f32.mrf.mxu0  ;;  %v523_v62 = vpop.f32.mrf.mxu1 }
 0x12b   :  { %v2357_v0 = vadd.f32 %v2072_v30, %v419_v19 }
 0x12c   :  { %v1549_v61 = vpop.f32.mrf.mxu0  ;;  %v1601_v17 = vpop.f32.mrf.mxu1 }
 0x12d   :  { %v2957_v38 = vmax.f32 %v2357_v0, 0.0  ;;  %v1722_v61 = vpack.i.bf16 %v2953_v28, %v2952_v42 }
 0x12e   :  { %v424_v9 = vpop.f32.mrf.mxu0 }
 0x12f   :  { %v1717_v18 = vpack.i.bf16 %v2957_v38, %v2951_v29  ;;  %v2368_v19 = vadd.f32 %v2072_v30, %v424_v9  ;;  %v2382_v9 = vadd.f32 %v2072_v30, %v520_v51  ;;  %v2967_v38 = vmax.f32 %v2162_v32, 0.0 }
 0x130   :  { %v1552_v62 = vpop.f32.mrf.mxu0 }
 0x131   :  { %1718 = vrot.lane.b32.xlu1 %v1717_v18, %s1882_s0  ;;  %v2954_v44 = vmax.f32 %v2368_v19, 0.0  ;;  %v2955_v18 = vmax.f32 %v2382_v9, 0.0 }
 0x132   :  { %v427_v17 = vpop.f32.mrf.mxu0 }
 0x133   :  { %v2376_v43 = vadd.f32 %v2072_v30, %v427_v17 }
 0x134   :  { %v1553_v63 = vpop.f32.mrf.mxu0 }
 0x135   :  { %v2956_v29 = vmax.f32 %v2376_v43, 0.0  ;;  %1723 = vrot.lane.b32.xlu1 %v1722_v61, %s1882_s0 }
 0x137   :  { %v1727_v62 = vpack.i.bf16 %v2956_v29, %v2954_v44 }
 0x139   :  { %1728 = vrot.lane.b32.xlu0 %v1727_v62, %s1882_s0 }
 0x13d   :  { %720 = vrot.lane.b32.xlu0 %v2955_v18, %s1882_s0  ;;  %v2958_v18 = vmax.f32 %v2078_v36, 0.0  ;;  %v2960_v36 = vmax.f32 %v2099_v53, 0.0 }
 0x14b   :  { %v1619_v63 = vpop.permute.xlu1 %1618  ;;  %v1614_v17 = vpop.permute.xlu0 %1613 }
 0x14c   :  { %v1621_v42 = vunpack.i.h.bf16 %v1619_v63  ;;  %v1620_v61 = vunpack.i.l.bf16 %v1619_v63  ;;  %v1616_v28 = vunpack.i.h.bf16 %v1614_v17  ;;  %v1615_v30 = vunpack.i.l.bf16 %v1614_v17 }
 0x14e   :  { %v2395_v51 = vmax.f32 %v553_v46, %v1621_v42  ;;  %v2399_v44 = vmax.f32 %v552_v39, %v1620_v61  ;;  %v2403_v62 = vmax.f32 %v527_v45, %v1616_v28  ;;  %v2407_v29 = vmax.f32 %v2958_v18, %v1615_v30 }
 0x14f   :  { %v2959_v45 = vmax.f32 %v2107_v57, 0.0  ;;  %v2961_v30 = vmax.f32 %v2110_v58, 0.0  ;;  %v2964_v58 = vmax.f32 %v2125_v7, 0.0 }
 0x150   :  { %v1732_v63 = vpack.i.bf16 %v2403_v62, %v2407_v29  ;;  %v1737_v41 = vpack.i.bf16 %v2395_v51, %v2399_v44 }
 0x152   :  { %1733 = vrot.lane.b32.xlu1 %v1732_v63, %s1883_s2  ;;  %1738 = vrot.lane.b32.xlu0 %v1737_v41, %s1883_s2  ;;  %v2962_v41 = vmax.f32 %v2102_v54, 0.0 }
 0x153   :  { %v1624_v33 = vpop.permute.xlu0 %1623 }
 0x154   :  { %v1626_v39 = vunpack.i.h.bf16 %v1624_v33  ;;  %v1625_v40 = vunpack.i.l.bf16 %v1624_v33 }
 0x156   :  { %v2417_v46 = vmax.f32 %v2959_v45, %v1626_v39  ;;  %v2421_v42 = vmax.f32 %v2960_v36, %v1625_v40  ;;  %v2963_v45 = vmax.f32 %v2132_v11, 0.0  ;;  %v2966_v11 = vmax.f32 %v2128_v8, 0.0 }
 0x157   :  { %v1629_v28 = vpop.permute.xlu0 %1628 }
 0x158   :  { %v1631_v18 = vunpack.i.h.bf16 %v1629_v28  ;;  %v1630_v17 = vunpack.i.l.bf16 %v1629_v28  ;;  %v1742_v61 = vpack.i.bf16 %v2417_v46, %v2421_v42 }
 0x15a   :  { %v2427_v63 = vmax.f32 %v2961_v30, %v1631_v18  ;;  %v2431_v33 = vmax.f32 %v2962_v41, %v1630_v17  ;;  %1743 = vrot.lane.b32.xlu0 %v1742_v61, %s1883_s2  ;;  %v2965_v30 = vmax.f32 %v2135_v12, 0.0 }
 0x15b   :  { %v1634_v57 = vpop.permute.xlu1 %1633 }
 0x15c   :  { %v1636_v53 = vunpack.i.h.bf16 %v1634_v57  ;;  %v1635_v39 = vunpack.i.l.bf16 %v1634_v57  ;;  %v1747_v40 = vpack.i.bf16 %v2427_v63, %v2431_v33 }
 0x15e   :  { %v2438_v36 = vmax.f32 %v2963_v45, %v1636_v53  ;;  %v2442_v28 = vmax.f32 %v2964_v58, %v1635_v39  ;;  %1748 = vrot.lane.b32.xlu1 %v1747_v40, %s1883_s2 }
 0x15f   :  { %v1639_v54 = vpop.permute.xlu1 %1638 }
 0x160   :  { %v1641_v18 = vunpack.i.h.bf16 %v1639_v54  ;;  %v1640_v17 = vunpack.i.l.bf16 %v1639_v54  ;;  %v1752_v61 = vpack.i.bf16 %v2438_v36, %v2442_v28 }
 0x162   :  { %v2449_v41 = vmax.f32 %v2965_v30, %v1641_v18  ;;  %v2453_v57 = vmax.f32 %v2966_v11, %v1640_v17  ;;  %1753 = vrot.lane.b32.xlu1 %v1752_v61, %s1883_s2  ;;  %v2968_v18 = vmax.f32 %v2147_v22, 0.0  ;;  %v2969_v17 = vmax.f32 %v2159_v31, 0.0 }
 0x163   :  { %v1649_v7 = vpop.permute.xlu0 %1648  ;;  %v1644_v53 = vpop.permute.xlu1 %1643  ;;  %v2970_v30 = vmax.f32 %v2154_v26, 0.0 }
 0x164   :  { %v1651_v39 = vunpack.i.h.bf16 %v1649_v7  ;;  %v1650_v40 = vunpack.i.l.bf16 %v1649_v7  ;;  %v1646_v45 = vunpack.i.h.bf16 %v1644_v53  ;;  %v1645_v58 = vunpack.i.l.bf16 %v1644_v53 }
 0x165   :  { %v1757_v54 = vpack.i.bf16 %v2449_v41, %v2453_v57 }
 0x166   :  { %v2460_v12 = vmax.f32 %v2967_v38, %v1651_v39  ;;  %v2464_v8 = vmax.f32 %v2968_v18, %v1650_v40  ;;  %v2468_v61 = vmax.f32 %v2969_v17, %v1646_v45  ;;  %v2472_v11 = vmax.f32 %v2970_v30, %v1645_v58 }
 0x167   :  { %1758 = vrot.lane.b32.xlu0 %v1757_v54, %s1883_s2  ;;  %v2971_v40 = vmax.f32 %v2189_v2, 0.0  ;;  %v2972_v58 = vmax.f32 %v2177_v50, 0.0  ;;  %v2973_v18 = vmax.f32 %v2186_v1, 0.0  ;;  %v2974_v30 = vmax.f32 %v2180_v55, 0.0 }
 0x168   :  { %v1767_v7 = vpack.i.bf16 %v2460_v12, %v2464_v8  ;;  %v1762_v32 = vpack.i.bf16 %v2468_v61, %v2472_v11  ;;  %v2975_v55 = vmax.f32 %v2215_v35, 0.0 }
 0x16a   :  { %1768 = vrot.lane.b32.xlu1 %v1767_v7, %s1883_s2 }
 0x16b   :  { %1763 = vrot.lane.b32.xlu0 %v1762_v32, %s1883_s2  ;;  %v1659_v22 = vpop.permute.xlu1 %1658  ;;  %v1654_v31 = vpop.permute.xlu0 %1653 }
 0x16c   :  { %v1661_v38 = vunpack.i.h.bf16 %v1659_v22  ;;  %v1660_v53 = vunpack.i.l.bf16 %v1659_v22  ;;  %v1656_v39 = vunpack.i.h.bf16 %v1654_v31  ;;  %v1655_v26 = vunpack.i.l.bf16 %v1654_v31 }
 0x16e   :  { %v2483_v45 = vmax.f32 %v2971_v40, %v1661_v38  ;;  %v2487_v54 = vmax.f32 %v2972_v58, %v1660_v53  ;;  %v2491_v17 = vmax.f32 %v2973_v18, %v1656_v39  ;;  %v2495_v7 = vmax.f32 %v2974_v30, %v1655_v26 }
 0x16f   :  { %v2976_v26 = vmax.f32 %v2203_v20, 0.0  ;;  %v2977_v58 = vmax.f32 %v2212_v34, 0.0  ;;  %v2978_v30 = vmax.f32 %v2206_v24, 0.0  ;;  %v2979_v24 = vmax.f32 %v2241_v27, 0.0 }
 0x170   :  { %v1772_v32 = vpack.i.bf16 %v2491_v17, %v2495_v7  ;;  %v1777_v2 = vpack.i.bf16 %v2483_v45, %v2487_v54 }
 0x172   :  { %1773 = vrot.lane.b32.xlu1 %v1772_v32, %s1883_s2  ;;  %1778 = vrot.lane.b32.xlu0 %v1777_v2, %s1883_s2 }
 0x173   :  { %v1669_v50 = vpop.permute.xlu0 %1668  ;;  %v1664_v22 = vpop.permute.xlu1 %1663 }
 0x174   :  { %v1671_v31 = vunpack.i.h.bf16 %v1669_v50  ;;  %v1670_v1 = vunpack.i.l.bf16 %v1669_v50  ;;  %v1666_v38 = vunpack.i.h.bf16 %v1664_v22  ;;  %v1665_v53 = vunpack.i.l.bf16 %v1664_v22 }
 0x176   :  { %v2505_v39 = vmax.f32 %v2975_v55, %v1671_v31  ;;  %v2509_v40 = vmax.f32 %v2976_v26, %v1670_v1  ;;  %v2513_v18 = vmax.f32 %v2977_v58, %v1666_v38  ;;  %v2517_v32 = vmax.f32 %v2978_v30, %v1665_v53 }
 0x177   :  { %v2980_v53 = vmax.f32 %v2229_v4, 0.0  ;;  %v2981_v26 = vmax.f32 %v2238_v25, 0.0  ;;  %v2982_v30 = vmax.f32 %v2232_v14, 0.0  ;;  %v2983_v14 = vmax.f32 %v2267_v23, 0.0 }
 0x178   :  { %v1787_v2 = vpack.i.bf16 %v2505_v39, %v2509_v40  ;;  %v1782_v35 = vpack.i.bf16 %v2513_v18, %v2517_v32 }
 0x17a   :  { %1788 = vrot.lane.b32.xlu1 %v1787_v2, %s1883_s2  ;;  %1783 = vrot.lane.b32.xlu0 %v1782_v35, %s1883_s2 }
 0x17b   :  { %v1679_v20 = vpop.permute.xlu1 %1678  ;;  %v1674_v50 = vpop.permute.xlu0 %1673 }
 0x17c   :  { %v1681_v22 = vunpack.i.h.bf16 %v1679_v20  ;;  %v1680_v34 = vunpack.i.l.bf16 %v1679_v20  ;;  %v1676_v31 = vunpack.i.h.bf16 %v1674_v50  ;;  %v1675_v1 = vunpack.i.l.bf16 %v1674_v50 }
 0x17e   :  { %v2527_v38 = vmax.f32 %v2979_v24, %v1681_v22  ;;  %v2531_v55 = vmax.f32 %v2980_v53, %v1680_v34  ;;  %v2535_v58 = vmax.f32 %v2981_v26, %v1676_v31  ;;  %v2539_v2 = vmax.f32 %v2982_v30, %v1675_v1 }
 0x17f   :  { %v2984_v1 = vmax.f32 %v2255_v21, 0.0  ;;  %v2985_v53 = vmax.f32 %v2264_v52, 0.0  ;;  %v2986_v30 = vmax.f32 %v2258_v48, 0.0  ;;  %v2987_v48 = vmax.f32 %v2293_v56, 0.0 }
 0x180   :  { %v1792_v35 = vpack.i.bf16 %v2535_v58, %v2539_v2  ;;  %v1797_v27 = vpack.i.bf16 %v2527_v38, %v2531_v55 }
 0x182   :  { %1793 = vrot.lane.b32.xlu1 %v1792_v35, %s1883_s2  ;;  %1798 = vrot.lane.b32.xlu0 %v1797_v27, %s1883_s2 }
 0x183   :  { %v1689_v4 = vpop.permute.xlu0 %1688  ;;  %v1684_v20 = vpop.permute.xlu1 %1683 }
 0x184   :  { %v1691_v50 = vunpack.i.h.bf16 %v1689_v4  ;;  %v1690_v25 = vunpack.i.l.bf16 %v1689_v4  ;;  %v1686_v22 = vunpack.i.h.bf16 %v1684_v20  ;;  %v1685_v34 = vunpack.i.l.bf16 %v1684_v20 }
 0x186   :  { %v2549_v31 = vmax.f32 %v2983_v14, %v1691_v50  ;;  %v2553_v24 = vmax.f32 %v2984_v1, %v1690_v25  ;;  %v2557_v26 = vmax.f32 %v2985_v53, %v1686_v22  ;;  %v2561_v35 = vmax.f32 %v2986_v30, %v1685_v34 }
 0x187   :  { %v2988_v34 = vmax.f32 %v2281_v49, 0.0  ;;  %v2989_v1 = vmax.f32 %v2290_v10, 0.0  ;;  %v2990_v30 = vmax.f32 %v2284_v5, 0.0  ;;  %v2991_v5 = vmax.f32 %v2319_v47, 0.0 }
 0x188   :  { %v1807_v27 = vpack.i.bf16 %v2549_v31, %v2553_v24  ;;  %v1802_v23 = vpack.i.bf16 %v2557_v26, %v2561_v35 }
 0x18a   :  { %1808 = vrot.lane.b32.xlu1 %v1807_v27, %s1883_s2  ;;  %1803 = vrot.lane.b32.xlu0 %v1802_v23, %s1883_s2 }
 0x18b   :  { %v1699_v21 = vpop.permute.xlu1 %1698  ;;  %v1694_v4 = vpop.permute.xlu0 %1693 }
 0x18c   :  { %v1701_v20 = vunpack.i.h.bf16 %v1699_v21  ;;  %v1700_v52 = vunpack.i.l.bf16 %v1699_v21  ;;  %v1696_v50 = vunpack.i.h.bf16 %v1694_v4  ;;  %v1695_v25 = vunpack.i.l.bf16 %v1694_v4 }
 0x18e   :  { %v2571_v22 = vmax.f32 %v2987_v48, %v1701_v20  ;;  %v2575_v14 = vmax.f32 %v2988_v34, %v1700_v52  ;;  %v2579_v53 = vmax.f32 %v2989_v1, %v1696_v50  ;;  %v2583_v27 = vmax.f32 %v2990_v30, %v1695_v25 }
 0x18f   :  { %v2992_v25 = vmax.f32 %v2307_v6, 0.0  ;;  %v2993_v34 = vmax.f32 %v2316_v3, 0.0  ;;  %v2994_v30 = vmax.f32 %v2310_v37, 0.0  ;;  %v2995_v3 = vmax.f32 %v2338_v15, 0.0 }
 0x190   :  { %v1812_v23 = vpack.i.bf16 %v2579_v53, %v2583_v27  ;;  %v1817_v56 = vpack.i.bf16 %v2571_v22, %v2575_v14  ;;  %v2996_v37 = vmax.f32 %v2333_v13, 0.0  ;;  %v2998_v15 = vmax.f32 %v2347_v60, 0.0 }
 0x192   :  { %1813 = vrot.lane.b32.xlu1 %v1812_v23, %s1883_s2  ;;  %1818 = vrot.lane.b32.xlu0 %v1817_v56, %s1883_s2 }
 0x193   :  { %v1709_v49 = vpop.permute.xlu0 %1708  ;;  %v1704_v21 = vpop.permute.xlu1 %1703 }
 0x194   :  { %v1711_v4 = vunpack.i.h.bf16 %v1709_v49  ;;  %v1710_v10 = vunpack.i.l.bf16 %v1709_v49  ;;  %v1706_v20 = vunpack.i.h.bf16 %v1704_v21  ;;  %v1705_v52 = vunpack.i.l.bf16 %v1704_v21 }
 0x196   :  { %v2593_v50 = vmax.f32 %v2991_v5, %v1711_v4  ;;  %v2597_v48 = vmax.f32 %v2992_v25, %v1710_v10  ;;  %v2601_v1 = vmax.f32 %v2993_v34, %v1706_v20  ;;  %v2605_v23 = vmax.f32 %v2994_v30, %v1705_v52 }
 0x197   :  { %v2997_v34 = vmax.f32 %v2357_v0, 0.0 }
 0x198   :  { %v1827_v56 = vpack.i.bf16 %v2593_v50, %v2597_v48  ;;  %v1822_v47 = vpack.i.bf16 %v2601_v1, %v2605_v23 }
 0x19a   :  { %1828 = vrot.lane.b32.xlu1 %v1827_v56, %s1883_s2  ;;  %1823 = vrot.lane.b32.xlu0 %v1822_v47, %s1883_s2 }
 0x19b   :  { %v1714_v6 = vpop.permute.xlu0 %1713 }
 0x19c   :  { %v1716_v49 = vunpack.i.h.bf16 %v1714_v6  ;;  %v1715_v21 = vunpack.i.l.bf16 %v1714_v6 }
 0x19e   :  { %v2615_v4 = vmax.f32 %v2995_v3, %v1716_v49  ;;  %v2619_v10 = vmax.f32 %v2996_v37, %v1715_v21  ;;  %v2999_v21 = vmax.f32 %v2354_v59, 0.0  ;;  %v3000_v37 = vmax.f32 %v2351_v16, 0.0 }
 0x19f   :  { %v3002_v59 = vmax.f32 %v2368_v19, 0.0 }
 0x1a0   :  { %v1832_v20 = vpack.i.bf16 %v2615_v4, %v2619_v10 }
 0x1a2   :  { %1833 = vrot.lane.b32.xlu1 %v1832_v20, %s1883_s2 }
 0x1a3   :  { %v1719_v52 = vpop.permute.xlu1 %1718 }
 0x1a4   :  { %v1721_v5 = vunpack.i.h.bf16 %v1719_v52  ;;  %v1720_v25 = vunpack.i.l.bf16 %v1719_v52 }
 0x1a6   :  { %v2626_v30 = vmax.f32 %v2997_v34, %v1721_v5  ;;  %v2630_v56 = vmax.f32 %v2998_v15, %v1720_v25  ;;  %v3001_v25 = vmax.f32 %v2376_v43, 0.0 }
 0x1a7   :  { %v1724_v47 = vpop.permute.xlu1 %1723 }
 0x1a8   :  { %v1726_v13 = vunpack.i.h.bf16 %v1724_v47  ;;  %v1725_v6 = vunpack.i.l.bf16 %v1724_v47  ;;  %v1837_v49 = vpack.i.bf16 %v2626_v30, %v2630_v56 }
 0x1aa   :  { %v2636_v3 = vmax.f32 %v2999_v21, %v1726_v13  ;;  %v2640_v20 = vmax.f32 %v3000_v37, %v1725_v6  ;;  %1838 = vrot.lane.b32.xlu0 %v1837_v49, %s1883_s2  ;;  %v3003_v13 = vmax.f32 %v2382_v9, 0.0 }
 0x1ab   :  { %v1729_v0 = vpop.permute.xlu0 %1728 }
 0x1ac   :  { %v1731_v60 = vunpack.i.h.bf16 %v1729_v0  ;;  %v1730_v52 = vunpack.i.l.bf16 %v1729_v0  ;;  %v1847_v5 = vpack.i.bf16 %v2636_v3, %v2640_v20 }
 0x1ae   :  { %v2647_v34 = vmax.f32 %v3001_v25, %v1731_v60  ;;  %v2651_v15 = vmax.f32 %v3002_v59, %v1730_v52  ;;  %1848 = vrot.lane.b32.xlu0 %v1847_v5, %s1883_s2 }
 0x1af   :  { %v721_v47 = vpop.permute.xlu0 %720 }
 0x1b0   :  { %v1842_v16 = vpack.i.bf16 %v2647_v34, %v2651_v15  ;;  %v2659_v6 = vmax.f32 %v3003_v13, %v721_v47 }
 0x1b2   :  { %1843 = vrot.lane.b32.xlu1 %v1842_v16, %s1883_s2 }
 0x1b6   :  { %965 = vrot.lane.b32.xlu1 %v2659_v6, %s1883_s2 }
 0x1c4   :  { %v1734_v43 = vpop.permute.xlu1 %1733  ;;  %v1739_v49 = vpop.permute.xlu0 %1738 }
 0x1c5   :  { %v1736_v19 = vunpack.i.h.bf16 %v1734_v43  ;;  %v1735_v21 = vunpack.i.l.bf16 %v1734_v43  ;;  %v1741_v37 = vunpack.i.h.bf16 %v1739_v49  ;;  %v1740_v0 = vunpack.i.l.bf16 %v1739_v49 }
 0x1c7   :  { %v1017_v60 = vmax.f32 %v2403_v62, %v1736_v19  ;;  %v1016_v52 = vmax.f32 %v2407_v29, %v1735_v21  ;;  %v1043_v5 = vmax.f32 %v2395_v51, %v1741_v37  ;;  %v1042_v25 = vmax.f32 %v2399_v44, %v1740_v0 }
 0x1c9   :  { %v1420_v9 = vpack.c.bf16 %v1017_v60, %v1017_v60  ;;  %v1419_v59 = vpack.c.bf16 %v1016_v52, %v1016_v52  ;;  %v1446_v16 = vpack.c.bf16 %v1043_v5, %v1043_v5  ;;  %v1445_v47 = vpack.c.bf16 %v1042_v25, %v1042_v25 }
 0x1cb   :  { %1264 = vst.msk [vmem:[%s2911_s3 + $0x4] sm:$0xf] %vm1262_vm3, %v1420_v9  ;;  %1263 = vst.msk [vmem:[%s2911_s3] sm:$0xf] %vm1262_vm3, %v1419_v59 }
 0x1cc   :  { %1290 = vst.msk [vmem:[%s2911_s3 + $0x6c] sm:$0xf] %vm1262_vm3, %v1446_v16  ;;  %1289 = vst.msk [vmem:[%s2911_s3 + $0x68] sm:$0xf] %vm1262_vm3, %v1445_v47  ;;  %v1744_v44 = vpop.permute.xlu0 %1743 }
 0x1cd   :  { %v1746_v29 = vunpack.i.h.bf16 %v1744_v44  ;;  %v1745_v51 = vunpack.i.l.bf16 %v1744_v44 }
 0x1cf   :  { %v1019_v62 = vmax.f32 %v2417_v46, %v1746_v29  ;;  %v1018_v13 = vmax.f32 %v2421_v42, %v1745_v51 }
 0x1d0   :  { %v1749_v43 = vpop.permute.xlu1 %1748 }
 0x1d1   :  { %v1422_v49 = vpack.c.bf16 %v1019_v62, %v1019_v62  ;;  %v1421_v19 = vpack.c.bf16 %v1018_v13, %v1018_v13  ;;  %v1751_v21 = vunpack.i.h.bf16 %v1749_v43  ;;  %v1750_v37 = vunpack.i.l.bf16 %v1749_v43 }
 0x1d3   :  { %1266 = vst.msk [vmem:[%s2911_s3 + $0xc] sm:$0xf] %vm1262_vm3, %v1422_v49  ;;  %1265 = vst.msk [vmem:[%s2911_s3 + $0x8] sm:$0xf] %vm1262_vm3, %v1421_v19  ;;  %v1045_v0 = vmax.f32 %v2427_v63, %v1751_v21  ;;  %v1044_v46 = vmax.f32 %v2431_v33, %v1750_v37 }
 0x1d4   :  { %v1754_v42 = vpop.permute.xlu1 %1753 }
 0x1d5   :  { %v1448_v60 = vpack.c.bf16 %v1045_v0, %v1045_v0  ;;  %v1447_v52 = vpack.c.bf16 %v1044_v46, %v1044_v46  ;;  %v1756_v5 = vunpack.i.h.bf16 %v1754_v42  ;;  %v1755_v25 = vunpack.i.l.bf16 %v1754_v42 }
 0x1d7   :  { %1292 = vst.msk [vmem:[%s2911_s3 + $0x74] sm:$0xf] %vm1262_vm3, %v1448_v60  ;;  %1291 = vst.msk [vmem:[%s2911_s3 + $0x70] sm:$0xf] %vm1262_vm3, %v1447_v52  ;;  %v1021_v9 = vmax.f32 %v2438_v36, %v1756_v5  ;;  %v1020_v63 = vmax.f32 %v2442_v28, %v1755_v25 }
 0x1d9   :  { %v1424_v33 = vpack.c.bf16 %v1021_v9, %v1021_v9  ;;  %v1423_v59 = vpack.c.bf16 %v1020_v63, %v1020_v63  ;;  %v1759_v16 = vpop.permute.xlu0 %1758 }
 0x1da   :  { %v1761_v47 = vunpack.i.h.bf16 %v1759_v16  ;;  %v1760_v44 = vunpack.i.l.bf16 %v1759_v16 }
 0x1db   :  { %1268 = vst.msk [vmem:[%s2911_s3 + $0x14] sm:$0xf] %vm1262_vm3, %v1424_v33  ;;  %1267 = vst.msk [vmem:[%s2911_s3 + $0x10] sm:$0xf] %vm1262_vm3, %v1423_v59 }
 0x1dc   :  { %v1047_v29 = vmax.f32 %v2449_v41, %v1761_v47  ;;  %v1046_v36 = vmax.f32 %v2453_v57, %v1760_v44  ;;  %v1769_v28 = vpop.permute.xlu1 %1768 }
 0x1dd   :  { %v1771_v51 = vunpack.i.h.bf16 %v1769_v28  ;;  %v1770_v62 = vunpack.i.l.bf16 %v1769_v28  ;;  %v1764_v13 = vpop.permute.xlu0 %1763 }
 0x1de   :  { %v1450_v43 = vpack.c.bf16 %v1047_v29, %v1047_v29  ;;  %v1449_v49 = vpack.c.bf16 %v1046_v36, %v1046_v36  ;;  %v1766_v19 = vunpack.i.h.bf16 %v1764_v13  ;;  %v1765_v21 = vunpack.i.l.bf16 %v1764_v13 }
 0x1df   :  { %v1049_v37 = vmax.f32 %v2460_v12, %v1771_v51  ;;  %v1048_v0 = vmax.f32 %v2464_v8, %v1770_v62 }
 0x1e0   :  { %1294 = vst.msk [vmem:[%s2911_s3 + $0x7c] sm:$0xf] %vm1262_vm3, %v1450_v43  ;;  %1293 = vst.msk [vmem:[%s2911_s3 + $0x78] sm:$0xf] %vm1262_vm3, %v1449_v49  ;;  %v1023_v41 = vmax.f32 %v2468_v61, %v1766_v19  ;;  %v1022_v57 = vmax.f32 %v2472_v11, %v1765_v21 }
 0x1e1   :  { %v1452_v46 = vpack.c.bf16 %v1049_v37, %v1049_v37  ;;  %v1451_v42 = vpack.c.bf16 %v1048_v0, %v1048_v0 }
 0x1e2   :  { %v1426_v60 = vpack.c.bf16 %v1023_v41, %v1023_v41  ;;  %v1425_v12 = vpack.c.bf16 %v1022_v57, %v1022_v57 }
 0x1e3   :  { %1296 = vst.msk [vmem:[%s2911_s3 + $0x84] sm:$0xf] %vm1262_vm3, %v1452_v46  ;;  %1295 = vst.msk [vmem:[%s2911_s3 + $0x80] sm:$0xf] %vm1262_vm3, %v1451_v42 }
 0x1e4   :  { %1270 = vst.msk [vmem:[%s2911_s3 + $0x1c] sm:$0xf] %vm1262_vm3, %v1426_v60  ;;  %1269 = vst.msk [vmem:[%s2911_s3 + $0x18] sm:$0xf] %vm1262_vm3, %v1425_v12  ;;  %v1774_v8 = vpop.permute.xlu1 %1773  ;;  %v1779_v61 = vpop.permute.xlu0 %1778 }
 0x1e5   :  { %v1776_v11 = vunpack.i.h.bf16 %v1774_v8  ;;  %v1775_v52 = vunpack.i.l.bf16 %v1774_v8  ;;  %v1781_v5 = vunpack.i.h.bf16 %v1779_v61  ;;  %v1780_v25 = vunpack.i.l.bf16 %v1779_v61 }
 0x1e7   :  { %v1025_v9 = vmax.f32 %v2491_v17, %v1776_v11  ;;  %v1024_v63 = vmax.f32 %v2495_v7, %v1775_v52  ;;  %v1051_v33 = vmax.f32 %v2483_v45, %v1781_v5  ;;  %v1050_v59 = vmax.f32 %v2487_v54, %v1780_v25 }
 0x1e9   :  { %v1428_v16 = vpack.c.bf16 %v1025_v9, %v1025_v9  ;;  %v1427_v47 = vpack.c.bf16 %v1024_v63, %v1024_v63  ;;  %v1454_v44 = vpack.c.bf16 %v1051_v33, %v1051_v33  ;;  %v1453_v29 = vpack.c.bf16 %v1050_v59, %v1050_v59 }
 0x1eb   :  { %1272 = vst.msk [vmem:[%s2911_s3 + $0x24] sm:$0xf] %vm1262_vm3, %v1428_v16  ;;  %1271 = vst.msk [vmem:[%s2911_s3 + $0x20] sm:$0xf] %vm1262_vm3, %v1427_v47 }
 0x1ec   :  { %1298 = vst.msk [vmem:[%s2911_s3 + $0x8c] sm:$0xf] %vm1262_vm3, %v1454_v44  ;;  %1297 = vst.msk [vmem:[%s2911_s3 + $0x88] sm:$0xf] %vm1262_vm3, %v1453_v29  ;;  %v1789_v45 = vpop.permute.xlu1 %1788  ;;  %v1784_v54 = vpop.permute.xlu0 %1783 }
 0x1ed   :  { %v1791_v17 = vunpack.i.h.bf16 %v1789_v45  ;;  %v1790_v7 = vunpack.i.l.bf16 %v1789_v45  ;;  %v1786_v36 = vunpack.i.h.bf16 %v1784_v54  ;;  %v1785_v28 = vunpack.i.l.bf16 %v1784_v54 }
 0x1ef   :  { %v1053_v51 = vmax.f32 %v2505_v39, %v1791_v17  ;;  %v1052_v62 = vmax.f32 %v2509_v40, %v1790_v7  ;;  %v1027_v13 = vmax.f32 %v2513_v18, %v1786_v36  ;;  %v1026_v43 = vmax.f32 %v2517_v32, %v1785_v28 }
 0x1f1   :  { %v1456_v49 = vpack.c.bf16 %v1053_v51, %v1053_v51  ;;  %v1455_v19 = vpack.c.bf16 %v1052_v62, %v1052_v62  ;;  %v1430_v21 = vpack.c.bf16 %v1027_v13, %v1027_v13  ;;  %v1429_v37 = vpack.c.bf16 %v1026_v43, %v1026_v43 }
 0x1f3   :  { %1300 = vst.msk [vmem:[%s2911_s3 + $0x94] sm:$0xf] %vm1262_vm3, %v1456_v49  ;;  %1299 = vst.msk [vmem:[%s2911_s3 + $0x90] sm:$0xf] %vm1262_vm3, %v1455_v19 }
 0x1f4   :  { %1274 = vst.msk [vmem:[%s2911_s3 + $0x2c] sm:$0xf] %vm1262_vm3, %v1430_v21  ;;  %1273 = vst.msk [vmem:[%s2911_s3 + $0x28] sm:$0xf] %vm1262_vm3, %v1429_v37  ;;  %v1794_v39 = vpop.permute.xlu1 %1793  ;;  %v1799_v40 = vpop.permute.xlu0 %1798 }
 0x1f5   :  { %v1796_v18 = vunpack.i.h.bf16 %v1794_v39  ;;  %v1795_v32 = vunpack.i.l.bf16 %v1794_v39  ;;  %v1801_v0 = vunpack.i.h.bf16 %v1799_v40  ;;  %v1800_v41 = vunpack.i.l.bf16 %v1799_v40 }
 0x1f7   :  { %v1029_v57 = vmax.f32 %v2535_v58, %v1796_v18  ;;  %v1028_v46 = vmax.f32 %v2539_v2, %v1795_v32  ;;  %v1055_v42 = vmax.f32 %v2527_v38, %v1801_v0  ;;  %v1054_v60 = vmax.f32 %v2531_v55, %v1800_v41 }
 0x1f9   :  { %v1432_v12 = vpack.c.bf16 %v1029_v57, %v1029_v57  ;;  %v1431_v8 = vpack.c.bf16 %v1028_v46, %v1028_v46  ;;  %v1458_v61 = vpack.c.bf16 %v1055_v42, %v1055_v42  ;;  %v1457_v11 = vpack.c.bf16 %v1054_v60, %v1054_v60 }
 0x1fb   :  { %1276 = vst.msk [vmem:[%s2911_s3 + $0x34] sm:$0xf] %vm1262_vm3, %v1432_v12  ;;  %1275 = vst.msk [vmem:[%s2911_s3 + $0x30] sm:$0xf] %vm1262_vm3, %v1431_v8 }
 0x1fc   :  { %1302 = vst.msk [vmem:[%s2911_s3 + $0x9c] sm:$0xf] %vm1262_vm3, %v1458_v61  ;;  %1301 = vst.msk [vmem:[%s2911_s3 + $0x98] sm:$0xf] %vm1262_vm3, %v1457_v11  ;;  %v1809_v38 = vpop.permute.xlu1 %1808  ;;  %v1804_v55 = vpop.permute.xlu0 %1803 }
 0x1fd   :  { %v1811_v58 = vunpack.i.h.bf16 %v1809_v38  ;;  %v1810_v2 = vunpack.i.l.bf16 %v1809_v38  ;;  %v1806_v52 = vunpack.i.h.bf16 %v1804_v55  ;;  %v1805_v5 = vunpack.i.l.bf16 %v1804_v55 }
 0x1ff   :  { %v1057_v25 = vmax.f32 %v2549_v31, %v1811_v58  ;;  %v1056_v9 = vmax.f32 %v2553_v24, %v1810_v2  ;;  %v1031_v63 = vmax.f32 %v2557_v26, %v1806_v52  ;;  %v1030_v33 = vmax.f32 %v2561_v35, %v1805_v5 }
 0x201   :  { %v1460_v59 = vpack.c.bf16 %v1057_v25, %v1057_v25  ;;  %v1459_v16 = vpack.c.bf16 %v1056_v9, %v1056_v9  ;;  %v1434_v47 = vpack.c.bf16 %v1031_v63, %v1031_v63  ;;  %v1433_v44 = vpack.c.bf16 %v1030_v33, %v1030_v33 }
 0x203   :  { %1304 = vst.msk [vmem:[%s2911_s3 + $0xa4] sm:$0xf] %vm1262_vm3, %v1460_v59  ;;  %1303 = vst.msk [vmem:[%s2911_s3 + $0xa0] sm:$0xf] %vm1262_vm3, %v1459_v16 }
 0x204   :  { %1278 = vst.msk [vmem:[%s2911_s3 + $0x3c] sm:$0xf] %vm1262_vm3, %v1434_v47  ;;  %1277 = vst.msk [vmem:[%s2911_s3 + $0x38] sm:$0xf] %vm1262_vm3, %v1433_v44  ;;  %v1814_v31 = vpop.permute.xlu1 %1813  ;;  %v1819_v24 = vpop.permute.xlu0 %1818 }
 0x205   :  { %v1816_v26 = vunpack.i.h.bf16 %v1814_v31  ;;  %v1815_v35 = vunpack.i.l.bf16 %v1814_v31  ;;  %v1821_v29 = vunpack.i.h.bf16 %v1819_v24  ;;  %v1820_v45 = vunpack.i.l.bf16 %v1819_v24 }
 0x207   :  { %v1033_v54 = vmax.f32 %v2579_v53, %v1816_v26  ;;  %v1032_v17 = vmax.f32 %v2583_v27, %v1815_v35  ;;  %v1059_v7 = vmax.f32 %v2571_v22, %v1821_v29  ;;  %v1058_v36 = vmax.f32 %v2575_v14, %v1820_v45 }
 0x209   :  { %v1436_v28 = vpack.c.bf16 %v1033_v54, %v1033_v54  ;;  %v1435_v51 = vpack.c.bf16 %v1032_v17, %v1032_v17  ;;  %v1462_v62 = vpack.c.bf16 %v1059_v7, %v1059_v7  ;;  %v1461_v13 = vpack.c.bf16 %v1058_v36, %v1058_v36 }
 0x20b   :  { %1280 = vst.msk [vmem:[%s2911_s3 + $0x44] sm:$0xf] %vm1262_vm3, %v1436_v28  ;;  %1279 = vst.msk [vmem:[%s2911_s3 + $0x40] sm:$0xf] %vm1262_vm3, %v1435_v51 }
 0x20c   :  { %1306 = vst.msk [vmem:[%s2911_s3 + $0xac] sm:$0xf] %vm1262_vm3, %v1462_v62  ;;  %1305 = vst.msk [vmem:[%s2911_s3 + $0xa8] sm:$0xf] %vm1262_vm3, %v1461_v13  ;;  %v1829_v22 = vpop.permute.xlu1 %1828  ;;  %v1824_v14 = vpop.permute.xlu0 %1823 }
 0x20d   :  { %v1831_v53 = vunpack.i.h.bf16 %v1829_v22  ;;  %v1830_v27 = vunpack.i.l.bf16 %v1829_v22  ;;  %v1826_v43 = vunpack.i.h.bf16 %v1824_v14  ;;  %v1825_v49 = vunpack.i.l.bf16 %v1824_v14 }
 0x20f   :  { %v1061_v19 = vmax.f32 %v2593_v50, %v1831_v53  ;;  %v1060_v21 = vmax.f32 %v2597_v48, %v1830_v27  ;;  %v1035_v37 = vmax.f32 %v2601_v1, %v1826_v43  ;;  %v1034_v39 = vmax.f32 %v2605_v23, %v1825_v49 }
 0x211   :  { %v1464_v40 = vpack.c.bf16 %v1061_v19, %v1061_v19  ;;  %v1463_v18 = vpack.c.bf16 %v1060_v21, %v1060_v21  ;;  %v1438_v32 = vpack.c.bf16 %v1035_v37, %v1035_v37  ;;  %v1437_v0 = vpack.c.bf16 %v1034_v39, %v1034_v39 }
 0x213   :  { %1308 = vst.msk [vmem:[%s2911_s3 + $0xb4] sm:$0xf] %vm1262_vm3, %v1464_v40  ;;  %1307 = vst.msk [vmem:[%s2911_s3 + $0xb0] sm:$0xf] %vm1262_vm3, %v1463_v18 }
 0x214   :  { %1282 = vst.msk [vmem:[%s2911_s3 + $0x4c] sm:$0xf] %vm1262_vm3, %v1438_v32  ;;  %1281 = vst.msk [vmem:[%s2911_s3 + $0x48] sm:$0xf] %vm1262_vm3, %v1437_v0  ;;  %v1834_v50 = vpop.permute.xlu1 %1833 }
 0x215   :  { %v1836_v48 = vunpack.i.h.bf16 %v1834_v50  ;;  %v1835_v1 = vunpack.i.l.bf16 %v1834_v50 }
 0x217   :  { %v1037_v23 = vmax.f32 %v2615_v4, %v1836_v48  ;;  %v1036_v41 = vmax.f32 %v2619_v10, %v1835_v1 }
 0x219   :  { %v1440_v57 = vpack.c.bf16 %v1037_v23, %v1037_v23  ;;  %v1439_v46 = vpack.c.bf16 %v1036_v41, %v1036_v41 }
 0x21b   :  { %1284 = vst.msk [vmem:[%s2911_s3 + $0x54] sm:$0xf] %vm1262_vm3, %v1440_v57  ;;  %1283 = vst.msk [vmem:[%s2911_s3 + $0x50] sm:$0xf] %vm1262_vm3, %v1439_v46 }
 0x21c   :  { %v1839_v42 = vpop.permute.xlu0 %1838 }
 0x21d   :  { %v1841_v60 = vunpack.i.h.bf16 %v1839_v42  ;;  %v1840_v12 = vunpack.i.l.bf16 %v1839_v42 }
 0x21f   :  { %v1039_v8 = vmax.f32 %v2626_v30, %v1841_v60  ;;  %v1038_v4 = vmax.f32 %v2630_v56, %v1840_v12 }
 0x220   :  { %v1849_v10 = vpop.permute.xlu0 %1848 }
 0x221   :  { %v1442_v61 = vpack.c.bf16 %v1039_v8, %v1039_v8  ;;  %v1441_v11 = vpack.c.bf16 %v1038_v4, %v1038_v4  ;;  %v1851_v38 = vunpack.i.h.bf16 %v1849_v10  ;;  %v1850_v55 = vunpack.i.l.bf16 %v1849_v10 }
 0x223   :  { %1286 = vst.msk [vmem:[%s2911_s3 + $0x5c] sm:$0xf] %vm1262_vm3, %v1442_v61  ;;  %1285 = vst.msk [vmem:[%s2911_s3 + $0x58] sm:$0xf] %vm1262_vm3, %v1441_v11  ;;  %v1063_v58 = vmax.f32 %v2636_v3, %v1851_v38  ;;  %v1062_v30 = vmax.f32 %v2640_v20, %v1850_v55 }
 0x224   :  { %v1844_v56 = vpop.permute.xlu1 %1843 }
 0x225   :  { %v1466_v2 = vpack.c.bf16 %v1063_v58, %v1063_v58  ;;  %v1465_v52 = vpack.c.bf16 %v1062_v30, %v1062_v30  ;;  %v1846_v5 = vunpack.i.h.bf16 %v1844_v56  ;;  %v1845_v25 = vunpack.i.l.bf16 %v1844_v56 }
 0x227   :  { %1310 = vst.msk [vmem:[%s2911_s3 + $0xbc] sm:$0xf] %vm1262_vm3, %v1466_v2  ;;  %1309 = vst.msk [vmem:[%s2911_s3 + $0xb8] sm:$0xf] %vm1262_vm3, %v1465_v52  ;;  %v1041_v9 = vmax.f32 %v2647_v34, %v1846_v5  ;;  %v1040_v3 = vmax.f32 %v2651_v15, %v1845_v25 }
 0x228   :  { %v966_v20 = vpop.permute.xlu1 %965 }
 0x229   :  { %v1444_v63 = vpack.c.bf16 %v1041_v9, %v1041_v9  ;;  %v1443_v33 = vpack.c.bf16 %v1040_v3, %v1040_v3  ;;  %v1064_v59 = vmax.f32 %v2659_v6, %v966_v20 }
 0x22b   :  { %1288 = vst.msk [vmem:[%s2911_s3 + $0x64] sm:$0xf] %vm1262_vm3, %v1444_v63  ;;  %1287 = vst.msk [vmem:[%s2911_s3 + $0x60] sm:$0xf] %vm1262_vm3, %v1443_v33  ;;  %v1467_v16 = vpack.c.bf16 %v1064_v59, %v1064_v59 }
 0x22d   :  { %1311 = vst.msk [vmem:[%s2911_s3 + $0xc0] sm:$0xf] %vm1262_vm3, %v1467_v16 }

// kernel: tile.17
= control target key start
LH: loop header
LB: loop body
LE: loop exit
PB: predicated region body
PF: predicated region fallthrough
CT: control target
= control target key end

     0   :  { %s22_s0 = inlined_call_operand.vmem [shape: f32[50], index: 0, kind: input, shape index: {}]   ;;  %s23_s1 = inlined_call_operand.vmem [shape: f32[4,50], index: 1, kind: output, shape index: {}]  }
   0x1   :  { %v4_v0 = vld [vmem:[%s22_s0] ss:$0 sm:$0xff] }
   0x2   :  { %5 = vst [vmem:[%s23_s1] sm:$0xf] %v4_v0 }

// kernel: tile.19
= control target key start
LH: loop header
LB: loop body
LE: loop exit
PB: predicated region body
PF: predicated region fallthrough
CT: control target
= control target key end

     0   :  { %vm14_vm0 = vcmask 228352   ;;  %vm8_vm1 = vcmask 408576   ;;  %s55_s8 = smov 100   ;;  %s56_s9 = smov 50   ;;  %vm18_vm2 = vcmask 179200   ;;  %vm21_vm3 = vcmask 1048352   ;;  %s76_s0 = inlined_call_operand.vmem [shape: f32[4,50], index: 0, kind: input, shape index: {}]   ;;  %s77_s1 = inlined_call_operand.vmem [shape: f32[1,200], index: 1, kind: output, shape index: {}]  }
   0x1   :  { %v5_v0 = vld [vmem:[%s76_s0] sm:$0xf]  ;;  %s54_s0 = smov 22   ;;  %vm33_vm4 = vcmask 588976   ;;  %vm27_vm5 = vcmask 818576  }
   0x2   :  { %6 = vst [vmem:[#allocation1] sm:$0xf] %v5_v0 }
   0x9   :  { %v11_v1 = vld [vmem:[#allocation1 + $0x2] sm:$0x1]   ;;  %v30_v3 = vld [vmem:[#allocation1 + $0x3] sm:$0x1]   ;;  %v7_v5 = vld [vmem:[#allocation1] sm:$0x1]  }
   0xa   :  { %v13_v2 = vld [vmem:[#allocation1 + $0x2] sm:$0x1]   ;;  %31 = vrot.lane.b32.xlu1 %v30_v3, %s54_s0  ;;  %9 = vst.msk [vmem:[#allocation0] sm:$0x1] %vm8_vm1, %v7_v5   ;;  %v24_v6 = vld [vmem:[#allocation1 + $0x1] sm:$0x1]  }
   0xb   :  { %v15_v4 = vsel %vm14_vm0, %v13_v2, %v11_v1 }
   0xc   :  { %16 = vrot.lane.b32.xlu0 %v15_v4, %s55_s8 }
  0x10   :  { %25 = vrot.lane.b32.xlu0 %v24_v6, %s56_s9 }
  0x7c   :  { %v32_v7 = vpop.permute.xlu1 %31  }
  0x7e   :  { %v17_v8 = vpop.permute.xlu0 %16  }
  0x7f   :  { %20 = vst.msk [vmem:[#allocation0 + $0x8] sm:$0x1] %vm18_vm2, %v17_v8  }
  0x80   :  { %22 = vst.msk [vmem:[#allocation0] sm:$0x1] %vm21_vm3, %v17_v8  }
  0x81   :  { %35 = vst.msk [vmem:[#allocation0 + $0x8] sm:$0x1] %vm33_vm4, %v32_v7  }
  0x82   :  { %v26_v9 = vpop.permute.xlu0 %25  }
  0x83   :  { %28 = vst.msk [vmem:[#allocation0] sm:$0x1] %vm27_vm5, %v26_v9  }
  0x88   :  { %v45_v10 = vld [vmem:[#allocation0 + $0x8] sm:$0x1] }
  0x89   :  { %50 = vst [vmem:[%s77_s1 + $0x1] sm:$0x1] %v45_v10 }
  0x8a   :  { %v40_v11 = vld [vmem:[#allocation0] sm:$0x1] }
  0x8b   :  { %43 = vst [vmem:[%s77_s1] sm:$0x1] %v40_v11 }

// kernel: lenet5_tt2_stg_forward.4
= control target key start
LH: loop header
LB: loop body
LE: loop exit
PB: predicated region body
PF: predicated region fallthrough
CT: control target
= control target key end

     0   :  { %vm695_vm0 = vcmask 654336   ;;  %vm1054_vm1 = vcmask 228352   ;;  %vm1105_vm2 = vcmask 404480   ;;  %vm1112_vm3 = vcmask 401408   ;;  %s2019_s1 = inlined_call_operand.vmem [shape: bf16[720,200], index: 1, kind: input, shape index: {}]   ;;  %s2020_s0 = inlined_call_operand.vmem [shape: bf16[50,720], index: 0, kind: input, shape index: {}]   ;;  %s2021_s2 = inlined_call_operand.vmem [shape: f32[1,200], index: 2, kind: input, shape index: {}]   ;;  %s2022_s3 = inlined_call_operand.vmem [shape: bf16[50,50], index: 3, kind: output, shape index: {}]  }
   0x1   :  { %v1343_v0 = vld [vmem:[%s2019_s1 + $0x74] ss:$8 sps:$4 sm:$0xff]   ;;  %v1347_v2 = vld [vmem:[%s2019_s1 + $0x70] ss:$8 sps:$4 sm:$0xff]   ;;  %v1349_v4 = vld [vmem:[%s2019_s1 + $0x64] ss:$8 sps:$4 sm:$0xff]  }
   0x2   :  { %v1345_v1 = vld [vmem:[%s2019_s1 + $0x174] ss:$8 sps:$4 sm:$0xff]   ;;  %708 = vmatprep.subr.bf16.mxu0 %v1343_v0  ;;  %v1348_v3 = vld [vmem:[%s2019_s1 + $0x170] ss:$8 sps:$4 sm:$0xff]   ;;  %v1351_v5 = vld [vmem:[%s2019_s1 + $0x164] ss:$8 sps:$4 sm:$0xff]  }
   0x3   :  { %779 = vmatprep.subr.bf16.mxu1 %v1345_v1  ;;  %709 = vmatpush1.bf16.msra.mxu0 %v1347_v2  ;;  %v1353_v6 = vld [vmem:[%s2019_s1 + $0x60] ss:$8 sps:$4 sm:$0xff]   ;;  %v1355_v8 = vld [vmem:[%s2019_s1 + $0x54] ss:$8 sps:$4 sm:$0xff]   ;;  %v1359_v10 = vld [vmem:[%s2019_s1 + $0x50] ss:$8 sps:$4 sm:$0xff]  }
   0x4   :  { %780 = vmatpush1.bf16.msra.mxu1 %v1348_v3  ;;  %710 = vmatprep.subr.bf16.mxu0 %v1349_v4  ;;  %v1354_v7 = vld [vmem:[%s2019_s1 + $0x160] ss:$8 sps:$4 sm:$0xff]   ;;  %v1357_v9 = vld [vmem:[%s2019_s1 + $0x154] ss:$8 sps:$4 sm:$0xff]   ;;  %v1360_v11 = vld [vmem:[%s2019_s1 + $0x150] ss:$8 sps:$4 sm:$0xff]  }
   0x5   :  { %781 = vmatprep.subr.bf16.mxu1 %v1351_v5  ;;  %v1361_v12 = vld [vmem:[%s2019_s1 + $0x44] ss:$8 sps:$4 sm:$0xff]   ;;  %v1365_v14 = vld [vmem:[%s2019_s1 + $0x40] ss:$8 sps:$4 sm:$0xff]   ;;  %v1367_v16 = vld [vmem:[%s2019_s1 + $0x34] ss:$8 sps:$4 sm:$0xff]  }
   0x6   :  { %v1363_v13 = vld [vmem:[%s2019_s1 + $0x144] ss:$8 sps:$4 sm:$0xff]   ;;  %v1366_v15 = vld [vmem:[%s2019_s1 + $0x140] ss:$8 sps:$4 sm:$0xff]   ;;  %v1369_v17 = vld [vmem:[%s2019_s1 + $0x134] ss:$8 sps:$4 sm:$0xff]  }
   0x7   :  { %711 = vmatpush1.bf16.msra.mxu0 %v1353_v6  ;;  %v1371_v18 = vld [vmem:[%s2019_s1 + $0x30] ss:$8 sps:$4 sm:$0xff]   ;;  %v1373_v20 = vld [vmem:[%s2019_s1 + $0x24] ss:$8 sps:$4 sm:$0xff]   ;;  %v1377_v22 = vld [vmem:[%s2019_s1 + $0x20] ss:$8 sps:$4 sm:$0xff]  }
   0x8   :  { %782 = vmatpush1.bf16.msra.mxu1 %v1354_v7  ;;  %712 = vmatprep.subr.bf16.mxu0 %v1355_v8  ;;  %v1372_v19 = vld [vmem:[%s2019_s1 + $0x130] ss:$8 sps:$4 sm:$0xff]   ;;  %v1375_v21 = vld [vmem:[%s2019_s1 + $0x124] ss:$8 sps:$4 sm:$0xff]   ;;  %v1378_v23 = vld [vmem:[%s2019_s1 + $0x120] ss:$8 sps:$4 sm:$0xff]  }
   0x9   :  { %783 = vmatprep.subr.bf16.mxu1 %v1357_v9  ;;  %v1379_v24 = vld [vmem:[%s2019_s1 + $0x14] ss:$8 sps:$4 sm:$0xff]   ;;  %v1383_v26 = vld [vmem:[%s2019_s1 + $0x10] ss:$8 sps:$4 sm:$0xff]   ;;  %v1385_v28 = vld [vmem:[%s2019_s1 + $0x4] ss:$8 sps:$4 sm:$0xff]  }
   0xa   :  { %v1381_v25 = vld [vmem:[%s2019_s1 + $0x114] ss:$8 sps:$4 sm:$0xff]   ;;  %v1384_v27 = vld [vmem:[%s2019_s1 + $0x110] ss:$8 sps:$4 sm:$0xff]   ;;  %v1387_v29 = vld [vmem:[%s2019_s1 + $0x104] ss:$8 sps:$4 sm:$0xff]  }
   0xb   :  { %713 = vmatpush1.bf16.msra.mxu0 %v1359_v10  ;;  %v1389_v30 = vld [vmem:[%s2019_s1] ss:$8 sps:$4 sm:$0xff]   ;;  %v1391_v32 = vld [vmem:[%s2019_s1 + $0xf4] ss:$8 sps:$4 sm:$0xff]   ;;  %v1395_v34 = vld [vmem:[%s2019_s1 + $0xf0] ss:$8 sps:$4 sm:$0xff]  }
   0xc   :  { %784 = vmatpush1.bf16.msra.mxu1 %v1360_v11  ;;  %714 = vmatprep.subr.bf16.mxu0 %v1361_v12  ;;  %v1390_v31 = vld [vmem:[%s2019_s1 + $0x100] ss:$8 sps:$4 sm:$0xff]   ;;  %v1393_v33 = vld [vmem:[%s2019_s1 + $0x1f4] ss:$8 sps:$4 sm:$0xff]   ;;  %v1396_v35 = vld [vmem:[%s2019_s1 + $0x1f0] ss:$8 sps:$4 sm:$0xff]  }
   0xd   :  { %785 = vmatprep.subr.bf16.mxu1 %v1363_v13  ;;  %v1397_v36 = vld [vmem:[%s2019_s1 + $0xe4] ss:$8 sps:$4 sm:$0xff]   ;;  %v1401_v38 = vld [vmem:[%s2019_s1 + $0xe0] ss:$8 sps:$4 sm:$0xff]   ;;  %v1403_v40 = vld [vmem:[%s2019_s1 + $0xd4] ss:$8 sps:$4 sm:$0xff]  }
   0xe   :  { %v1399_v37 = vld [vmem:[%s2019_s1 + $0x1e4] ss:$8 sps:$4 sm:$0xff]   ;;  %v1402_v39 = vld [vmem:[%s2019_s1 + $0x1e0] ss:$8 sps:$4 sm:$0xff]   ;;  %v1405_v41 = vld [vmem:[%s2019_s1 + $0x1d4] ss:$8 sps:$4 sm:$0xff]  }
   0xf   :  { %715 = vmatpush1.bf16.msra.mxu0 %v1365_v14  ;;  %v1407_v42 = vld [vmem:[%s2019_s1 + $0xd0] ss:$8 sps:$4 sm:$0xff]   ;;  %v1409_v44 = vld [vmem:[%s2019_s1 + $0xc4] ss:$8 sps:$4 sm:$0xff]   ;;  %v1413_v46 = vld [vmem:[%s2019_s1 + $0xc0] ss:$8 sps:$4 sm:$0xff]  }
  0x10   :  { %786 = vmatpush1.bf16.msra.mxu1 %v1366_v15  ;;  %716 = vmatprep.subr.bf16.mxu0 %v1367_v16  ;;  %v1408_v43 = vld [vmem:[%s2019_s1 + $0x1d0] ss:$8 sps:$4 sm:$0xff]   ;;  %v1411_v45 = vld [vmem:[%s2019_s1 + $0x1c4] ss:$8 sps:$4 sm:$0xff]   ;;  %v1414_v47 = vld [vmem:[%s2019_s1 + $0x1c0] ss:$8 sps:$4 sm:$0xff]  }
  0x11   :  { %787 = vmatprep.subr.bf16.mxu1 %v1369_v17  ;;  %v1415_v48 = vld [vmem:[%s2019_s1 + $0xb4] ss:$8 sps:$4 sm:$0xff]   ;;  %v1444_v51 = vld [vmem:[%s2020_s0 + $0xc] ss:$24 sps:$4 sm:$0xff]   ;;  %v1419_v52 = vld [vmem:[%s2019_s1 + $0xb0] ss:$8 sps:$4 sm:$0xff]  }
  0x12   :  { %v1441_v49 = vld [vmem:[%s2020_s0 + $0x4] ss:$24 sps:$4 sm:$0xff]   ;;  %v1420_v53 = vld [vmem:[%s2019_s1 + $0x1b0] ss:$8 sps:$4 sm:$0xff]   ;;  %811 = vmatprep.mubr.bf16.mxu1 %v1444_v51  ;;  %v1425_v56 = vld [vmem:[%s2019_s1 + $0xa0] ss:$8 sps:$4 sm:$0xff]  }
  0x13   :  { %717 = vmatpush1.bf16.msra.mxu0 %v1371_v18  ;;  %v1417_v50 = vld [vmem:[%s2019_s1 + $0x1b4] ss:$8 sps:$4 sm:$0xff]   ;;  %740 = vmatprep.mubr.bf16.mxu0 %v1441_v49  ;;  %v1421_v54 = vld [vmem:[%s2019_s1 + $0xa4] ss:$8 sps:$4 sm:$0xff]   ;;  %v1426_v57 = vld [vmem:[%s2019_s1 + $0x1a0] ss:$8 sps:$4 sm:$0xff]  }
  0x14   :  { %788 = vmatpush1.bf16.msra.mxu1 %v1372_v19  ;;  %718 = vmatprep.subr.bf16.mxu0 %v1373_v20  ;;  %v1423_v55 = vld [vmem:[%s2019_s1 + $0x1a4] ss:$8 sps:$4 sm:$0xff]   ;;  %v1427_v58 = vld [vmem:[%s2019_s1 + $0x94] ss:$8 sps:$4 sm:$0xff]   ;;  %v1431_v60 = vld [vmem:[%s2019_s1 + $0x90] ss:$8 sps:$4 sm:$0xff]  }
  0x15   :  { %789 = vmatprep.subr.bf16.mxu1 %v1375_v21  ;;  %v1429_v59 = vld [vmem:[%s2019_s1 + $0x194] ss:$8 sps:$4 sm:$0xff]   ;;  %v1432_v61 = vld [vmem:[%s2019_s1 + $0x190] ss:$8 sps:$4 sm:$0xff]   ;;  %v1433_v62 = vld [vmem:[%s2019_s1 + $0x84] ss:$8 sps:$4 sm:$0xff]  }
  0x16   :  { %v1435_v63 = vld [vmem:[%s2019_s1 + $0x184] ss:$8 sps:$4 sm:$0xff]   ;;  %v1437_v0 = vld [vmem:[%s2019_s1 + $0x80] ss:$8 sps:$4 sm:$0xff]   ;;  %v1447_v2 = vld [vmem:[%s2019_s1 + $0x274] ss:$8 sps:$4 sm:$0xff]  }
  0x17   :  { %719 = vmatpush1.bf16.msra.mxu0 %v1377_v22  ;;  %v1438_v1 = vld [vmem:[%s2019_s1 + $0x180] ss:$8 sps:$4 sm:$0xff]   ;;  %v1445_v5 = vld [vmem:[%s2019_s1 + $0x270] ss:$8 sps:$4 sm:$0xff]   ;;  %v1450_v6 = vld [vmem:[%s2019_s1 + $0x264] ss:$8 sps:$4 sm:$0xff]  }
  0x18   :  { %790 = vmatpush1.bf16.msra.mxu1 %v1378_v23  ;;  %720 = vmatprep.subr.bf16.mxu0 %v1379_v24  ;;  %v1439_v3 = vld [vmem:[%s2020_s0] ss:$24 sps:$4 sm:$0xff]   ;;  %v1463_v7 = vld [vmem:[%s2020_s0 + $0x34] ss:$24 sps:$4 sm:$0xff]   ;;  %v1465_v11 = vld [vmem:[%s2020_s0 + $0x30] ss:$24 sps:$4 sm:$0xff]  }
  0x19   :  { %791 = vmatprep.subr.bf16.mxu1 %v1381_v25  ;;  %v1442_v4 = vld [vmem:[%s2020_s0 + $0x8] ss:$24 sps:$4 sm:$0xff]   ;;  %v1466_v8 = vld [vmem:[%s2020_s0 + $0x3c] ss:$24 sps:$4 sm:$0xff]   ;;  %v1468_v12 = vld [vmem:[%s2020_s0 + $0x38] ss:$24 sps:$4 sm:$0xff]  }
  0x1a   :  { %v1448_v9 = vld [vmem:[%s2019_s1 + $0x260] ss:$8 sps:$4 sm:$0xff]   ;;  %v1453_v10 = vld [vmem:[%s2019_s1 + $0x254] ss:$8 sps:$4 sm:$0xff]   ;;  %v1451_v13 = vld [vmem:[%s2019_s1 + $0x250] ss:$8 sps:$4 sm:$0xff]  }
  0x1b   :  { %721 = vmatpush1.bf16.msra.mxu0 %v1383_v26  ;;  %v1456_v14 = vld [vmem:[%s2019_s1 + $0x244] ss:$8 sps:$4 sm:$0xff]   ;;  %v1454_v17 = vld [vmem:[%s2019_s1 + $0x240] ss:$8 sps:$4 sm:$0xff]   ;;  %v1459_v18 = vld [vmem:[%s2019_s1 + $0x234] ss:$8 sps:$4 sm:$0xff]  }
  0x1c   :  { %792 = vmatpush1.bf16.msra.mxu1 %v1384_v27  ;;  %722 = vmatprep.subr.bf16.mxu0 %v1385_v28  ;;  %v1475_v15 = vld [vmem:[%s2020_s0 + $0x64] ss:$24 sps:$4 sm:$0xff]   ;;  %v1477_v19 = vld [vmem:[%s2020_s0 + $0x60] ss:$24 sps:$4 sm:$0xff]   ;;  %v33_v21 = vld [vmem:[%s2020_s0 + $0x90] sm:$0x11] }
  0x1d   :  { %793 = vmatprep.subr.bf16.mxu1 %v1387_v29  ;;  %v1478_v16 = vld [vmem:[%s2020_s0 + $0x6c] ss:$24 sps:$4 sm:$0xff]   ;;  %v1480_v20 = vld [vmem:[%s2020_s0 + $0x68] ss:$24 sps:$4 sm:$0xff]   ;;  %v34_v22 = vld [vmem:[%s2020_s0 + $0x98] sm:$0x11]  ;;  %v1137_v25 = vcombine.high %v33_v21, %v33_v21  ;;  %v1136_v29 = vcombine.low %v33_v21, %v33_v21 }
  0x1e   :  { %v1457_v23 = vld [vmem:[%s2019_s1 + $0x230] ss:$8 sps:$4 sm:$0xff]   ;;  %v1462_v24 = vld [vmem:[%s2019_s1 + $0x224] ss:$8 sps:$4 sm:$0xff]   ;;  %v1139_v26 = vcombine.high %v34_v22, %v34_v22  ;;  %v1460_v27 = vld [vmem:[%s2019_s1 + $0x220] ss:$8 sps:$4 sm:$0xff]  }
  0x1f   :  { %723 = vmatpush1.bf16.msra.mxu0 %v1389_v30  ;;  %v1471_v28 = vld [vmem:[%s2019_s1 + $0x214] ss:$8 sps:$4 sm:$0xff]   ;;  %v1138_v30 = vcombine.low %v34_v22, %v34_v22  ;;  %v1509_v51 = vld [vmem:[%s2020_s0 + $0x40] ss:$24 sps:$4 sm:$0xff]  }
  0x20   :  { %794 = vmatpush1.bf16.msra.mxu1 %v1390_v31  ;;  %724 = vmatprep.subr.bf16.mxu0 %v1391_v32  ;;  %v1469_v31 = vld [vmem:[%s2019_s1 + $0x210] ss:$8 sps:$4 sm:$0xff]   ;;  %v1474_v32 = vld [vmem:[%s2019_s1 + $0x204] ss:$8 sps:$4 sm:$0xff]  }
  0x21   :  { %795 = vmatprep.subr.bf16.mxu1 %v1393_v33  ;;  %v1502_v33 = vld [vmem:[%s2020_s0 + $0x14] ss:$24 sps:$4 sm:$0xff]   ;;  %v1506_v49 = vld [vmem:[%s2020_s0 + $0x44] ss:$24 sps:$4 sm:$0xff]  }
  0x23   :  { %725 = vmatpush2.bf16.msra.mxu0 %v1395_v34  ;;  %v1505_v34 = vld [vmem:[%s2020_s0 + $0x74] ss:$24 sps:$4 sm:$0xff]  }
  0x24   :  { %796 = vmatpush2.bf16.msra.mxu1 %v1396_v35  ;;  %726 = vmatprep.subr.bf16.mxu0 %v1397_v36  ;;  %v1472_v35 = vld [vmem:[%s2019_s1 + $0x200] ss:$8 sps:$4 sm:$0xff]   ;;  %v1483_v36 = vld [vmem:[%s2019_s1 + $0x2c4] ss:$8 sps:$4 sm:$0xff]  }
  0x25   :  { %797 = vmatprep.subr.bf16.mxu1 %v1399_v37  ;;  %v1481_v37 = vld [vmem:[%s2019_s1 + $0x2c0] ss:$8 sps:$4 sm:$0xff]  }
  0x27   :  { %727 = vmatpush2.bf16.msra.mxu0 %v1401_v38  ;;  %v1486_v38 = vld [vmem:[%s2019_s1 + $0x2b4] ss:$8 sps:$4 sm:$0xff]  }
  0x28   :  { %798 = vmatpush2.bf16.msra.mxu1 %v1402_v39  ;;  %728 = vmatprep.subr.bf16.mxu0 %v1403_v40  ;;  %v1484_v39 = vld [vmem:[%s2019_s1 + $0x2b0] ss:$8 sps:$4 sm:$0xff]   ;;  %v1491_v40 = vld [vmem:[%s2019_s1 + $0x2a4] ss:$8 sps:$4 sm:$0xff]  }
  0x29   :  { %799 = vmatprep.subr.bf16.mxu1 %v1405_v41  ;;  %v1489_v41 = vld [vmem:[%s2019_s1 + $0x2a0] ss:$8 sps:$4 sm:$0xff]  }
  0x2b   :  { %729 = vmatpush2.bf16.msra.mxu0 %v1407_v42  ;;  %v1496_v42 = vld [vmem:[%s2019_s1 + $0x294] ss:$8 sps:$4 sm:$0xff]  }
  0x2c   :  { %800 = vmatpush2.bf16.msra.mxu1 %v1408_v43  ;;  %730 = vmatprep.subr.bf16.mxu0 %v1409_v44  ;;  %v1494_v43 = vld [vmem:[%s2019_s1 + $0x290] ss:$8 sps:$4 sm:$0xff]   ;;  %v1499_v44 = vld [vmem:[%s2019_s1 + $0x284] ss:$8 sps:$4 sm:$0xff]  }
  0x2d   :  { %801 = vmatprep.subr.bf16.mxu1 %v1411_v45  ;;  %v1497_v45 = vld [vmem:[%s2019_s1 + $0x280] ss:$8 sps:$4 sm:$0xff]  }
  0x2f   :  { %731 = vmatpush2.bf16.msra.mxu0 %v1413_v46  ;;  %v35_v46 = vld [vmem:[%s2020_s0 + $0xa0] sm:$0x11] }
  0x30   :  { %802 = vmatpush2.bf16.msra.mxu1 %v1414_v47  ;;  %732 = vmatprep.subr.bf16.mxu0 %v1415_v48  ;;  %v1500_v47 = vld [vmem:[%s2020_s0 + $0x10] ss:$24 sps:$4 sm:$0xff]  }
  0x31   :  { %803 = vmatprep.subr.bf16.mxu1 %v1417_v50  ;;  %v1503_v48 = vld [vmem:[%s2020_s0 + $0x70] ss:$24 sps:$4 sm:$0xff]   ;;  %v1141_v50 = vcombine.high %v35_v46, %v35_v46  ;;  %s1511_s0 = smov 78  }
  0x33   :  { %733 = vmatpush2.bf16.msra.mxu0 %v1419_v52  ;;  %v1140_v52 = vcombine.low %v35_v46, %v35_v46 }
  0x34   :  { %804 = vmatpush2.bf16.msra.mxu1 %v1420_v53  ;;  %734 = vmatprep.subr.bf16.mxu0 %v1421_v54  ;;  %v128_v53 = vlaneseq }
  0x35   :  { %805 = vmatprep.subr.bf16.mxu1 %v1423_v55 }
  0x36   :  { %v129_v54 = vshrl.u32 %v128_v53, 7 }
  0x37   :  { %735 = vmatpush2.bf16.msra.mxu0 %v1425_v56  ;;  %v126_v56 = vld [vmem:[%s2021_s2] sm:$0x3]  ;;  %s1512_s2 = smov 28  }
  0x38   :  { %806 = vmatpush2.bf16.msra.mxu1 %v1426_v57  ;;  %736 = vmatprep.subr.bf16.mxu0 %v1427_v58  ;;  %v130_v55 = vsub.s32 0, %v129_v54 }
  0x39   :  { %807 = vmatprep.subr.bf16.mxu1 %v1429_v59 }
  0x3a   :  { %v1873_v57 = vrot.slane %v126_v56, %v130_v55 }
  0x3b   :  { %737 = vmatpush2.bf16.msra.mxu0 %v1431_v60 }
  0x3c   :  { %808 = vmatpush2.bf16.msra.mxu1 %v1432_v61  ;;  %738 = vmatprep.subr.bf16.mxu0 %v1433_v62 }
  0x3d   :  { %809 = vmatprep.subr.bf16.mxu1 %v1435_v63 }
  0x3f   :  { %739 = vmatpush2.bf16.msra.mxu0 %v1437_v0 }
  0x40   :  { %810 = vmatpush2.bf16.msra.mxu1 %v1438_v1  ;;  %850 = vmatprep.subr.bf16.mxu0 %v1447_v2 }
  0x41   :  { %1250 = vmatprep.subr.bf16.mxu1 %v1447_v2 }
  0x42   :  { %741 = vmatmul.mubr.bf16.vlgmr.msra.gmra.mxu0 %v1439_v3 }
  0x43   :  { %812 = vmatmul.mubr.bf16.vlgmr.msra.gmra.mxu1 %v1442_v4  ;;  %851 = vmatpush1.bf16.msra.mxu0 %v1445_v5 }
  0x44   :  { %1263 = vmatpush1.bf16.msra.mxu1 %v1445_v5  ;;  %852 = vmatprep.subr.bf16.mxu0 %v1450_v6 }
  0x45   :  { %1251 = vmatprep.subr.bf16.mxu1 %v1450_v6  ;;  %750 = vmatprep.mubr.bf16.mxu0 %v1463_v7 }
  0x46   :  { %821 = vmatprep.mubr.bf16.mxu1 %v1466_v8 }
  0x47   :  { %853 = vmatpush1.bf16.msra.mxu0 %v1448_v9 }
  0x48   :  { %1264 = vmatpush1.bf16.msra.mxu1 %v1448_v9  ;;  %854 = vmatprep.subr.bf16.mxu0 %v1453_v10 }
  0x49   :  { %1252 = vmatprep.subr.bf16.mxu1 %v1453_v10 }
  0x4a   :  { %751 = vmatmul.mubr.bf16.gmra.mxu0 %v1465_v11 }
  0x4b   :  { %822 = vmatmul.mubr.bf16.gmra.mxu1 %v1468_v12  ;;  %855 = vmatpush1.bf16.msra.mxu0 %v1451_v13 }
  0x4c   :  { %1265 = vmatpush1.bf16.msra.mxu1 %v1451_v13  ;;  %856 = vmatprep.subr.bf16.mxu0 %v1456_v14 }
  0x4d   :  { %1253 = vmatprep.subr.bf16.mxu1 %v1456_v14  ;;  %760 = vmatprep.mubr.bf16.mxu0 %v1475_v15 }
  0x4e   :  { %831 = vmatprep.mubr.bf16.mxu1 %v1478_v16 }
  0x4f   :  { %857 = vmatpush1.bf16.msra.mxu0 %v1454_v17 }
  0x50   :  { %1266 = vmatpush1.bf16.msra.mxu1 %v1454_v17  ;;  %858 = vmatprep.subr.bf16.mxu0 %v1459_v18 }
  0x51   :  { %1254 = vmatprep.subr.bf16.mxu1 %v1459_v18 }
  0x52   :  { %761 = vmatmul.mubr.bf16.gmra.mxu0 %v1477_v19 }
  0x53   :  { %832 = vmatmul.mubr.bf16.gmra.mxu1 %v1480_v20  ;;  %859 = vmatpush1.bf16.msra.mxu0 %v1457_v23 }
  0x54   :  { %1267 = vmatpush1.bf16.msra.mxu1 %v1457_v23  ;;  %860 = vmatprep.subr.bf16.mxu0 %v1462_v24 }
  0x55   :  { %1255 = vmatprep.subr.bf16.mxu1 %v1462_v24  ;;  %770 = vmatprep.mubr.bf16.mxu0 %v1137_v25 }
  0x56   :  { %841 = vmatprep.mubr.bf16.mxu1 %v1139_v26 }
  0x57   :  { %861 = vmatpush1.bf16.msra.mxu0 %v1460_v27 }
  0x58   :  { %1268 = vmatpush1.bf16.msra.mxu1 %v1460_v27  ;;  %862 = vmatprep.subr.bf16.mxu0 %v1471_v28 }
  0x59   :  { %1256 = vmatprep.subr.bf16.mxu1 %v1471_v28  ;;  %v134_v28 = vsub.s32 1, %v129_v54 }
  0x5a   :  { %771 = vmatmul.mubr.bf16.gmra.mxu0 %v1136_v29 }
  0x5b   :  { %842 = vmatmul.mubr.bf16.gmra.mxu1 %v1138_v30  ;;  %863 = vmatpush1.bf16.msra.mxu0 %v1469_v31  ;;  %v135_v29 = vrot.slane %v126_v56, %v134_v28 }
  0x5c   :  { %1269 = vmatpush1.bf16.msra.mxu1 %v1469_v31  ;;  %864 = vmatprep.subr.bf16.mxu0 %v1474_v32 }
  0x5d   :  { %1257 = vmatprep.subr.bf16.mxu1 %v1474_v32  ;;  %1232 = vmatprep.mubr.msk.bf16.mxu0 %vm695_vm0, %v1502_v33 }
  0x5e   :  { %1234 = vmatprep.mubr.msk.bf16.mxu1 %vm695_vm0, %v1505_v34 }
  0x5f   :  { %865 = vmatpush1.bf16.msra.mxu0 %v1472_v35 }
  0x60   :  { %1270 = vmatpush1.bf16.msra.mxu1 %v1472_v35  ;;  %872 = vmatprep.subr.bf16.mxu0 %v1483_v36 }
  0x61   :  { %1258 = vmatprep.subr.bf16.mxu1 %v1483_v36 }
  0x63   :  { %873 = vmatpush2.bf16.msra.mxu0 %v1481_v37 }
  0x64   :  { %1271 = vmatpush2.bf16.msra.mxu1 %v1481_v37  ;;  %874 = vmatprep.subr.bf16.mxu0 %v1486_v38 }
  0x65   :  { %1259 = vmatprep.subr.bf16.mxu1 %v1486_v38 }
  0x67   :  { %875 = vmatpush2.bf16.msra.mxu0 %v1484_v39 }
  0x68   :  { %1272 = vmatpush2.bf16.msra.mxu1 %v1484_v39  ;;  %876 = vmatprep.subr.bf16.mxu0 %v1491_v40 }
  0x69   :  { %1260 = vmatprep.subr.bf16.mxu1 %v1491_v40 }
  0x6b   :  { %877 = vmatpush2.bf16.msra.mxu0 %v1489_v41 }
  0x6c   :  { %1273 = vmatpush2.bf16.msra.mxu1 %v1489_v41  ;;  %878 = vmatprep.subr.bf16.mxu0 %v1496_v42 }
  0x6d   :  { %1261 = vmatprep.subr.bf16.mxu1 %v1496_v42 }
  0x6f   :  { %879 = vmatpush2.bf16.msra.mxu0 %v1494_v43 }
  0x70   :  { %1274 = vmatpush2.bf16.msra.mxu1 %v1494_v43  ;;  %880 = vmatprep.subr.bf16.mxu0 %v1499_v44 }
  0x71   :  { %1262 = vmatprep.subr.bf16.mxu1 %v1499_v44 }
  0x73   :  { %881 = vmatpush2.bf16.msra.mxu0 %v1497_v45 }
  0x74   :  { %1275 = vmatpush2.bf16.msra.mxu1 %v1497_v45 }
  0x76   :  { %883 = vmatmul.mubr.bf16.vlgmr.msra.gmra.mxu0 %v1500_v47 }
  0x77   :  { %903 = vmatmul.mubr.bf16.vlgmr.msra.gmra.mxu1 %v1503_v48  ;;  %1233 = vmatprep.mubr.msk.bf16.mxu0 %vm695_vm0, %v1506_v49 }
  0x78   :  { %1235 = vmatprep.mubr.msk.bf16.mxu1 %vm695_vm0, %v1141_v50 }
  0x7e   :  { %893 = vmatmul.mubr.bf16.gmra.mxu0 %v1509_v51 }
  0x7f   :  { %913 = vmatmul.mubr.bf16.gmra.mxu1 %v1140_v52 }
 0x102   :  { %v742_v58 = vpop.f32.mrf.mxu0 }
 0x103   :  { %v813_v59 = vpop.f32.mrf.mxu1  ;;  %v743_v60 = vadd.f32 %v742_v58, %v1873_v57 }
 0x104   :  { %v744_v61 = vpop.f32.mrf.mxu0 }
 0x105   :  { %v815_v62 = vpop.f32.mrf.mxu1  ;;  %v1876_v63 = vadd.f32 %v813_v59, %v743_v60  ;;  %v745_v30 = vadd.f32 %v744_v61, %v135_v29 }
 0x106   :  { %v746_v0 = vpop.f32.mrf.mxu0 }
 0x107   :  { %v1878_v1 = vpop.f32.mrf.mxu1  ;;  %v816_v38 = vadd.f32 %v815_v62, %v745_v30  ;;  %v747_v44 = vadd.f32 %v746_v0, %v1873_v57 }
 0x108   :  { %v748_v2 = vpop.f32.mrf.mxu0 }
 0x109   :  { %v819_v3 = vpop.f32.mrf.mxu1  ;;  %v749_v34 = vadd.f32 %v748_v2, %v135_v29 }
 0x10a   :  { %v752_v4 = vpop.f32.mrf.mxu0 }
 0x10b   :  { %v1880_v5 = vpop.f32.mrf.mxu1  ;;  %v820_v42 = vadd.f32 %v819_v3, %v749_v34  ;;  %v753_v54 = vadd.f32 %v752_v4, %v1873_v57 }
 0x10c   :  { %v754_v6 = vpop.f32.mrf.mxu0 }
 0x10d   :  { %v825_v7 = vpop.f32.mrf.mxu1  ;;  %v755_v50 = vadd.f32 %v754_v6, %v135_v29  ;;  %v818_v6 = vadd.f32 %v1878_v1, %v747_v44  ;;  %v824_v4 = vadd.f32 %v1880_v5, %v753_v54 }
 0x10e   :  { %v756_v8 = vpop.f32.mrf.mxu0 }
 0x10f   :  { %v827_v9 = vpop.f32.mrf.mxu1  ;;  %v757_v51 = vadd.f32 %v756_v8, %v1873_v57  ;;  %v826_v8 = vadd.f32 %v825_v7, %v755_v50 }
 0x110   :  { %v758_v10 = vpop.f32.mrf.mxu0 }
 0x111   :  { %v1882_v11 = vpop.f32.mrf.mxu1  ;;  %v759_v58 = vadd.f32 %v758_v10, %v135_v29 }
 0x112   :  { %v1884_v12 = vpop.f32.mrf.mxu0 }
 0x113   :  { %v1886_v13 = vpop.f32.mrf.mxu1 }
 0x114   :  { %v764_v14 = vpop.f32.mrf.mxu0 }
 0x115   :  { %v835_v15 = vpop.f32.mrf.mxu1  ;;  %v765_v31 = vadd.f32 %v764_v14, %v135_v29  ;;  %v828_v14 = vadd.f32 %v827_v9, %v757_v51 }
 0x116   :  { %v766_v16 = vpop.f32.mrf.mxu0 }
 0x117   :  { %v1888_v17 = vpop.f32.mrf.mxu1  ;;  %v836_v39 = vadd.f32 %v835_v15, %v765_v31  ;;  %v767_v1 = vadd.f32 %v766_v16, %v1873_v57 }
 0x118   :  { %v768_v18 = vpop.f32.mrf.mxu0 }
 0x119   :  { %v839_v19 = vpop.f32.mrf.mxu1  ;;  %v769_v35 = vadd.f32 %v768_v18, %v135_v29  ;;  %v838_v30 = vadd.f32 %v1888_v17, %v767_v1 }
 0x11a   :  { %v772_v20 = vpop.f32.mrf.mxu0 }
 0x11b   :  { %v1890_v21 = vpop.f32.mrf.mxu1  ;;  %v840_v43 = vadd.f32 %v839_v19, %v769_v35  ;;  %v773_v5 = vadd.f32 %v772_v20, %v1873_v57 }
 0x11c   :  { %v774_v22 = vpop.f32.mrf.mxu0 }
 0x11d   :  { %v845_v23 = vpop.f32.mrf.mxu1  ;;  %v775_v45 = vadd.f32 %v774_v22, %v135_v29  ;;  %v844_v35 = vadd.f32 %v1890_v21, %v773_v5 }
 0x11e   :  { %v776_v24 = vpop.f32.mrf.mxu0 }
 0x11f   :  { %v847_v25 = vpop.f32.mrf.mxu1  ;;  %v846_v61 = vadd.f32 %v845_v23, %v775_v45  ;;  %v830_v23 = vadd.f32 %v1882_v11, %v759_v58 }
 0x120   :  { %v777_v26 = vpop.f32.mrf.mxu0 }
 0x121   :  { %v848_v27 = vpop.f32.mrf.mxu1 }
 0x122   :  { %v763_v27 = vadd.f32 %v1884_v12, %v1873_v57 }
 0x124   :  { %v834_v57 = vadd.f32 %v1886_v13, %v763_v27 }
 0x136   :  { %v884_v32 = vpop.f32.mrf.mxu0 }
 0x137   :  { %v1892_v33 = vpop.f32.mrf.mxu1  ;;  %v885_v20 = vadd.f32 %v884_v32, %v1876_v63 }
 0x138   :  { %v886_v36 = vpop.f32.mrf.mxu0  ;;  %v905_v32 = vadd.f32 %v1892_v33, %v834_v57 }
 0x139   :  { %v906_v37 = vpop.f32.mrf.mxu1  ;;  %v1895_v46 = vadd.f32 %v886_v36, %v816_v38  ;;  %v1943_v63 = vmax.f32 %v885_v20, 0.0 }
 0x13a   :  { %v888_v40 = vpop.f32.mrf.mxu0  ;;  %v1897_v47 = vadd.f32 %v906_v37, %v836_v39 }
 0x13b   :  { %v908_v41 = vpop.f32.mrf.mxu1  ;;  %v922_v62 = vmax.f32 %v1895_v46, 0.0  ;;  %v889_v28 = vadd.f32 %v888_v40, %v818_v6 }
 0x13c   :  { %v890_v48 = vpop.f32.mrf.mxu0  ;;  %v930_v0 = vmax.f32 %v1897_v47, 0.0  ;;  %v909_v37 = vadd.f32 %v908_v41, %v838_v30  ;;  %v1954_v41 = vmax.f32 %v905_v32, 0.0 }
 0x13d   :  { %v910_v49 = vpop.f32.mrf.mxu1  ;;  %v1900_v52 = vadd.f32 %v890_v48, %v820_v42  ;;  %v1939_v12 = vmax.f32 %v889_v28, 0.0 }
 0x13e   :  { %v1902_v53 = vadd.f32 %v910_v49, %v840_v43  ;;  %v894_v55 = vpop.f32.mrf.mxu0  ;;  %v1948_v21 = vmax.f32 %v909_v37, 0.0 }
 0x13f   :  { %v914_v56 = vpop.f32.mrf.mxu1  ;;  %v924_v59 = vmax.f32 %v1900_v52, 0.0  ;;  %v895_v24 = vadd.f32 %v894_v55, %v824_v4  ;;  %v1293_v13 = vpack.i.bf16 %v1939_v12, %v1943_v63 }
 0x140   :  { %v932_v60 = vmax.f32 %v1902_v53, 0.0  ;;  %v896_v2 = vpop.f32.mrf.mxu0  ;;  %v915_v39 = vadd.f32 %v914_v56, %v844_v35  ;;  %v1303_v33 = vpack.i.bf16 %v1948_v21, %v1954_v41 }
 0x141   :  { %v916_v3 = vpop.f32.mrf.mxu1  ;;  %v1278_v19 = vpack.i.bf16 %v924_v59, %v922_v62  ;;  %v1921_v7 = vadd.f32 %v896_v2, %v826_v8  ;;  %v1935_v36 = vmax.f32 %v895_v24, 0.0 }
 0x142   :  { %v1911_v15 = vadd.f32 %v916_v3, %v846_v61  ;;  %v898_v10 = vpop.f32.mrf.mxu0  ;;  %v1288_v18 = vpack.i.bf16 %v932_v60, %v930_v0  ;;  %v1952_v40 = vmax.f32 %v915_v39, 0.0 }
 0x143   :  { %v918_v22 = vpop.f32.mrf.mxu1  ;;  %v899_v9 = vadd.f32 %v898_v10, %v828_v14  ;;  %1279 = vrot.lane.b32.xlu0 %v1278_v19, %s1511_s0  ;;  %v926_v31 = vmax.f32 %v1921_v7, 0.0 }
 0x144   :  { %1289 = vrot.lane.b32.xlu1 %v1288_v18, %s1511_s0  ;;  %v900_v25 = vpop.f32.mrf.mxu0  ;;  %v934_v16 = vmax.f32 %v1911_v15, 0.0 }
 0x145   :  { %v919_v26 = vpop.f32.mrf.mxu1  ;;  %v901_v11 = vadd.f32 %v900_v25, %v830_v23  ;;  %v1929_v29 = vmax.f32 %v899_v9, 0.0 }
 0x147   :  { %v928_v34 = vmax.f32 %v901_v11, 0.0  ;;  %v1298_v17 = vpack.i.bf16 %v1929_v29, %v1935_v36 }
 0x148   :  { %989 = vrot.lane.b32.xlu1 %v934_v16, %s1511_s0 }
 0x149   :  { %v1283_v38 = vpack.i.bf16 %v928_v34, %v926_v31 }
 0x14b   :  { %1284 = vrot.lane.b32.xlu0 %v1283_v38, %s1511_s0 }
 0x14c   :  { %1299 = vrot.lane.b32.xlu1 %v1298_v17, %s1511_s0 }
 0x14f   :  { %1294 = vrot.lane.b32.xlu0 %v1293_v13, %s1511_s0 }
 0x150   :  { %954 = vrot.lane.b32.xlu1 %v1952_v40, %s1511_s0 }
 0x153   :  { %1304 = vrot.lane.b32.xlu0 %v1303_v33, %s1511_s0 }
 0x1b5   :  { %v1280_v43 = vpop.permute.xlu0 %1279 }
 0x1b6   :  { %v1290_v42 = vpop.permute.xlu1 %1289  ;;  %v1282_v45 = vunpack.i.h.bf16 %v1280_v43  ;;  %v1281_v46 = vunpack.i.l.bf16 %v1280_v43 }
 0x1b7   :  { %v1291_v44 = vunpack.i.l.bf16 %v1290_v42  ;;  %v1292_v2 = vunpack.i.h.bf16 %v1290_v42 }
 0x1b8   :  { %v1000_v48 = vmax.f32 %v1939_v12, %v1282_v45  ;;  %v1001_v49 = vmax.f32 %v924_v59, %v1282_v45  ;;  %v998_v50 = vmax.f32 %v1943_v63, %v1281_v46  ;;  %v999_v51 = vmax.f32 %v922_v62, %v1281_v46 }
 0x1b9   :  { %v1006_v54 = vmax.f32 %v1954_v41, %v1291_v44  ;;  %v1007_v55 = vmax.f32 %v930_v0, %v1291_v44  ;;  %v1008_v47 = vmax.f32 %v1948_v21, %v1292_v2  ;;  %v1009_v0 = vmax.f32 %v932_v60, %v1292_v2 }
 0x1ba   :  { %v1318_v56 = vpack.i.bf16 %v1001_v49, %v1000_v48  ;;  %v1308_v58 = vpack.i.bf16 %v999_v51, %v998_v50  ;;  %v990_v4 = vpop.permute.xlu1 %989 }
 0x1bb   :  { %v1313_v8 = vpack.i.bf16 %v1007_v55, %v1006_v54  ;;  %v1010_v18 = vmax.f32 %v1952_v40, %v990_v4  ;;  %v1011_v19 = vmax.f32 %v934_v16, %v990_v4  ;;  %v1333_v22 = vpack.i.bf16 %v1009_v0, %v1008_v47 }
 0x1bc   :  { %1319 = vrot.lane.b32.xlu1 %v1318_v56, %s1512_s2  ;;  %1309 = vrot.lane.b32.xlu0 %v1308_v58, %s1512_s2 }
 0x1bd   :  { %v1285_v61 = vpop.permute.xlu0 %1284  ;;  %v1338_v23 = vpack.i.bf16 %v1011_v19, %v1010_v18 }
 0x1be   :  { %v1287_v3 = vunpack.i.h.bf16 %v1285_v61  ;;  %v1286_v6 = vunpack.i.l.bf16 %v1285_v61  ;;  %v1300_v1 = vpop.permute.xlu1 %1299 }
 0x1bf   :  { %v1302_v35 = vunpack.i.h.bf16 %v1300_v1  ;;  %v1301_v32 = vunpack.i.l.bf16 %v1300_v1 }
 0x1c0   :  { %v1004_v52 = vmax.f32 %v1929_v29, %v1287_v3  ;;  %v1005_v59 = vmax.f32 %v928_v34, %v1287_v3  ;;  %v1002_v62 = vmax.f32 %v1935_v36, %v1286_v6  ;;  %v1003_v14 = vmax.f32 %v926_v31, %v1286_v6  ;;  %1314 = vrot.lane.b32.xlu0 %v1313_v8, %s1512_s2 }
 0x1c1   :  { %v1295_v7 = vpop.permute.xlu0 %1294  ;;  %v966_v45 = vmax.f32 %v1929_v29, %v1302_v35  ;;  %v965_v54 = vmax.f32 %v1935_v36, %v1301_v32 }
 0x1c2   :  { %v1328_v15 = vpack.i.bf16 %v1005_v59, %v1004_v52  ;;  %v1323_v10 = vpack.i.bf16 %v1003_v14, %v1002_v62  ;;  %v1975_v9 = vpop.permute.xlu1 %954  ;;  %v1297_v24 = vunpack.i.h.bf16 %v1295_v7  ;;  %v1296_v53 = vunpack.i.l.bf16 %v1295_v7 }
 0x1c3   :  { %v969_v14 = vmax.f32 %v1952_v40, %v1975_v9 }
 0x1c4   :  { %1329 = vrot.lane.b32.xlu1 %v1328_v15, %s1512_s2  ;;  %1324 = vrot.lane.b32.xlu0 %v1323_v10, %s1512_s2  ;;  %v964_v16 = vmax.f32 %v1939_v12, %v1297_v24  ;;  %v963_v30 = vmax.f32 %v1943_v63, %v1296_v53 }
 0x1c5   :  { %v1305_v5 = vpop.permute.xlu0 %1304 }
 0x1c6   :  { %v1306_v20 = vunpack.i.l.bf16 %v1305_v5  ;;  %v1307_v46 = vunpack.i.h.bf16 %v1305_v5 }
 0x1c8   :  { %1334 = vrot.lane.b32.xlu1 %v1333_v22, %s1512_s2  ;;  %1339 = vrot.lane.b32.xlu0 %v1338_v23, %s1512_s2  ;;  %v967_v13 = vmax.f32 %v1954_v41, %v1306_v20  ;;  %v968_v3 = vmax.f32 %v1948_v21, %v1307_v46 }
 0x22e   :  { %v1320_v60 = vpop.permute.xlu1 %1319  ;;  %v1310_v25 = vpop.permute.xlu0 %1309 }
 0x22f   :  { %v1322_v26 = vunpack.i.h.bf16 %v1320_v60  ;;  %v1321_v27 = vunpack.i.l.bf16 %v1320_v60  ;;  %v1312_v28 = vunpack.i.h.bf16 %v1310_v25  ;;  %v1311_v11 = vunpack.i.l.bf16 %v1310_v25 }
 0x231   :  { %v1056_v31 = vsel %vm1054_vm1, %v1321_v27, %v1322_v26  ;;  %v1055_v34 = vsel %vm1054_vm1, %v1311_v11, %v1312_v28 }
 0x232   :  { %v1070_v57 = vmax.f32 %v964_v16, %v1056_v31  ;;  %v1069_v37 = vmax.f32 %v963_v30, %v1055_v34  ;;  %v1315_v38 = vpop.permute.xlu0 %1314 }
 0x233   :  { %v1317_v39 = vunpack.i.h.bf16 %v1315_v38  ;;  %v1316_v17 = vunpack.i.l.bf16 %v1315_v38 }
 0x234   :  { %v1244_v33 = vpack.c.bf16 %v1070_v57, %v1070_v57  ;;  %v1243_v42 = vpack.c.bf16 %v1069_v37, %v1069_v37 }
 0x235   :  { %v1059_v63 = vsel %vm1054_vm1, %v1316_v17, %v1317_v39 }
 0x236   :  { %v1330_v12 = vpop.permute.xlu1 %1329  ;;  %1107 = vst.msk [vmem:[%s2022_s3 + $0x4] sm:$0xf] %vm1105_vm2, %v1244_v33  ;;  %1106 = vst.msk [vmem:[%s2022_s3] sm:$0xf] %vm1105_vm2, %v1243_v42  ;;  %v1073_v41 = vmax.f32 %v967_v13, %v1059_v63  ;;  %v1325_v48 = vpop.permute.xlu0 %1324 }
 0x237   :  { %v1332_v43 = vunpack.i.h.bf16 %v1330_v12  ;;  %v1331_v44 = vunpack.i.l.bf16 %v1330_v12  ;;  %v1327_v50 = vunpack.i.h.bf16 %v1325_v48  ;;  %v1326_v51 = vunpack.i.l.bf16 %v1325_v48 }
 0x238   :  { %v1247_v29 = vpack.c.bf16 %v1073_v41, %v1073_v41 }
 0x239   :  { %v1058_v49 = vsel %vm1054_vm1, %v1331_v44, %v1332_v43  ;;  %v1057_v58 = vsel %vm1054_vm1, %v1326_v51, %v1327_v50 }
 0x23a   :  { %v1072_v55 = vmax.f32 %v966_v45, %v1058_v49  ;;  %v1335_v56 = vpop.permute.xlu1 %1334  ;;  %1110 = vst.msk [vmem:[%s2022_s3 + $0x10] sm:$0xf] %vm1105_vm2, %v1247_v29  ;;  %v1071_v8 = vmax.f32 %v965_v54, %v1057_v58  ;;  %v1340_v52 = vpop.permute.xlu0 %1339 }
 0x23b   :  { %v1337_v61 = vunpack.i.h.bf16 %v1335_v56  ;;  %v1336_v2 = vunpack.i.l.bf16 %v1335_v56  ;;  %v1342_v36 = vunpack.i.h.bf16 %v1340_v52  ;;  %v1341_v62 = vunpack.i.l.bf16 %v1340_v52 }
 0x23c   :  { %v1246_v6 = vpack.c.bf16 %v1072_v55, %v1072_v55  ;;  %v1245_v21 = vpack.c.bf16 %v1071_v8, %v1071_v8 }
 0x23d   :  { %v1060_v59 = vsel %vm1054_vm1, %v1336_v2, %v1337_v61  ;;  %v1061_v47 = vsel %vm1054_vm1, %v1341_v62, %v1342_v36 }
 0x23e   :  { %1109 = vst.msk [vmem:[%s2022_s3 + $0xc] sm:$0xf] %vm1105_vm2, %v1246_v6  ;;  %v1074_v4 = vmax.f32 %v968_v3, %v1060_v59  ;;  %1108 = vst.msk [vmem:[%s2022_s3 + $0x8] sm:$0xf] %vm1105_vm2, %v1245_v21  ;;  %v1075_v15 = vmax.f32 %v969_v14, %v1061_v47 }
 0x240   :  { %v1248_v0 = vpack.c.bf16 %v1074_v4, %v1074_v4  ;;  %v1249_v40 = vpack.c.bf16 %v1075_v15, %v1075_v15 }
 0x242   :  { %1111 = vst.msk [vmem:[%s2022_s3 + $0x14] sm:$0xf] %vm1105_vm2, %v1248_v0 }
 0x243   :  { %1113 = vst.msk [vmem:[%s2022_s3 + $0x18] sm:$0x1] %vm1112_vm3, %v1249_v40 }

// kernel: lenet5_tt2_stg_forward.5
= control target key start
LH: loop header
LB: loop body
LE: loop exit
PB: predicated region body
PF: predicated region fallthrough
CT: control target
= control target key end

     0   :  { %v340_v36 = vlaneseq  ;;  %v3138_v37 = vmov 1966171168   ;;  %vm1693_vm0 = vcmask 801792   ;;  %vm1697_vm1 = vcmask 1040384   ;;  %s4055_s0 = inlined_call_operand.vmem [shape: bf16[2,1250], index: 0, kind: input, shape index: {}]   ;;  %s4056_s1 = inlined_call_operand.vmem [shape: bf16[1250,320], index: 1, kind: input, shape index: {}]   ;;  %s4057_s2 = inlined_call_operand.vmem [shape: f32[1,320], index: 2, kind: input, shape index: {}]   ;;  %s4058_s3 = inlined_call_operand.vmem [shape: bf16[320,10], index: 3, kind: input, shape index: {}]   ;;  %s4059_s4 = inlined_call_operand.vmem [shape: f32[1,10], index: 4, kind: input, shape index: {}]   ;;  %s4060_s5 = inlined_call_operand.hbm [shape: f32[2,10], index: 5, kind: output, shape index: {}]  }
   0x1   :  { %v2780_v0 = vld [vmem:[%s4056_s1 + $0xac] ss:$12 sps:$4 sm:$0xff]   ;;  %v2784_v2 = vld [vmem:[%s4056_s1 + $0xa8] ss:$12 sps:$4 sm:$0xff]   ;;  %v2790_v6 = vld [vmem:[%s4056_s1 + $0x90] ss:$12 sps:$4 sm:$0xff]   ;;  %v359_v38 = vunpack.c.l.s4 %v3138_v37 }
   0x2   :  { %v2782_v1 = vld [vmem:[%s4056_s1 + $0x22c] ss:$12 sps:$4 sm:$0xff]   ;;  %1707 = vmatprep.subr.bf16.mxu0 %v2780_v0  ;;  %v2785_v3 = vld [vmem:[%s4056_s1 + $0x228] ss:$12 sps:$4 sm:$0xff]   ;;  %v2791_v7 = vld [vmem:[%s4056_s1 + $0x210] ss:$12 sps:$4 sm:$0xff]  }
   0x3   :  { %1748 = vmatprep.subr.bf16.mxu1 %v2782_v1  ;;  %v2786_v4 = vld [vmem:[%s4056_s1 + $0x94] ss:$12 sps:$4 sm:$0xff]   ;;  %1708 = vmatpush1.bf16.msra.mxu0 %v2784_v2  ;;  %v2792_v8 = vld [vmem:[%s4056_s1 + $0x7c] ss:$12 sps:$4 sm:$0xff]   ;;  %v2796_v10 = vld [vmem:[%s4056_s1 + $0x78] ss:$12 sps:$4 sm:$0xff]   ;;  %v360_v43 = vunpack.c.0.s8 %v359_v38 }
   0x4   :  { %1749 = vmatpush1.bf16.msra.mxu1 %v2785_v3  ;;  %v2788_v5 = vld [vmem:[%s4056_s1 + $0x214] ss:$12 sps:$4 sm:$0xff]   ;;  %1709 = vmatprep.subr.bf16.mxu0 %v2786_v4  ;;  %v2794_v9 = vld [vmem:[%s4056_s1 + $0x1fc] ss:$12 sps:$4 sm:$0xff]   ;;  %v2797_v11 = vld [vmem:[%s4056_s1 + $0x1f8] ss:$12 sps:$4 sm:$0xff]  }
   0x5   :  { %1750 = vmatprep.subr.bf16.mxu1 %v2788_v5  ;;  %v2798_v12 = vld [vmem:[%s4056_s1 + $0x64] ss:$12 sps:$4 sm:$0xff]   ;;  %v2802_v14 = vld [vmem:[%s4056_s1 + $0x60] ss:$12 sps:$4 sm:$0xff]   ;;  %v2808_v18 = vld [vmem:[%s4056_s1 + $0x48] ss:$12 sps:$4 sm:$0xff]  }
   0x6   :  { %v2800_v13 = vld [vmem:[%s4056_s1 + $0x1e4] ss:$12 sps:$4 sm:$0xff]   ;;  %v2803_v15 = vld [vmem:[%s4056_s1 + $0x1e0] ss:$12 sps:$4 sm:$0xff]   ;;  %v2809_v19 = vld [vmem:[%s4056_s1 + $0x1c8] ss:$12 sps:$4 sm:$0xff]  }
   0x7   :  { %1710 = vmatpush1.bf16.msra.mxu0 %v2790_v6  ;;  %v2804_v16 = vld [vmem:[%s4056_s1 + $0x4c] ss:$12 sps:$4 sm:$0xff]   ;;  %v2810_v20 = vld [vmem:[%s4056_s1 + $0x34] ss:$12 sps:$4 sm:$0xff]   ;;  %v2814_v22 = vld [vmem:[%s4056_s1 + $0x30] ss:$12 sps:$4 sm:$0xff]  }
   0x8   :  { %1751 = vmatpush1.bf16.msra.mxu1 %v2791_v7  ;;  %1711 = vmatprep.subr.bf16.mxu0 %v2792_v8  ;;  %v2806_v17 = vld [vmem:[%s4056_s1 + $0x1cc] ss:$12 sps:$4 sm:$0xff]   ;;  %v2812_v21 = vld [vmem:[%s4056_s1 + $0x1b4] ss:$12 sps:$4 sm:$0xff]   ;;  %v2815_v23 = vld [vmem:[%s4056_s1 + $0x1b0] ss:$12 sps:$4 sm:$0xff]  }
   0x9   :  { %1752 = vmatprep.subr.bf16.mxu1 %v2794_v9  ;;  %v2816_v24 = vld [vmem:[%s4056_s1 + $0x1c] ss:$12 sps:$4 sm:$0xff]   ;;  %v2820_v26 = vld [vmem:[%s4056_s1 + $0x18] ss:$12 sps:$4 sm:$0xff]   ;;  %v2826_v30 = vld [vmem:[%s4056_s1] ss:$12 sps:$4 sm:$0xff]  }
   0xa   :  { %v2818_v25 = vld [vmem:[%s4056_s1 + $0x19c] ss:$12 sps:$4 sm:$0xff]   ;;  %v2821_v27 = vld [vmem:[%s4056_s1 + $0x198] ss:$12 sps:$4 sm:$0xff]   ;;  %v2827_v31 = vld [vmem:[%s4056_s1 + $0x180] ss:$12 sps:$4 sm:$0xff]  }
   0xb   :  { %1712 = vmatpush1.bf16.msra.mxu0 %v2796_v10  ;;  %v2822_v28 = vld [vmem:[%s4056_s1 + $0x4] ss:$12 sps:$4 sm:$0xff]   ;;  %v2828_v32 = vld [vmem:[%s4056_s1 + $0x16c] ss:$12 sps:$4 sm:$0xff]   ;;  %v2832_v34 = vld [vmem:[%s4056_s1 + $0x168] ss:$12 sps:$4 sm:$0xff]  }
   0xc   :  { %1753 = vmatpush1.bf16.msra.mxu1 %v2797_v11  ;;  %1713 = vmatprep.subr.bf16.mxu0 %v2798_v12  ;;  %v2824_v29 = vld [vmem:[%s4056_s1 + $0x184] ss:$12 sps:$4 sm:$0xff]   ;;  %v2830_v33 = vld [vmem:[%s4056_s1 + $0x2ec] ss:$12 sps:$4 sm:$0xff]   ;;  %v2833_v35 = vld [vmem:[%s4056_s1 + $0x2e8] ss:$12 sps:$4 sm:$0xff]  }
   0xd   :  { %1754 = vmatprep.subr.bf16.mxu1 %v2800_v13  ;;  %v2834_v39 = vld [vmem:[%s4056_s1 + $0x154] ss:$12 sps:$4 sm:$0xff]   ;;  %v2838_v41 = vld [vmem:[%s4056_s1 + $0x150] ss:$12 sps:$4 sm:$0xff]   ;;  %v3290_v42 = vshrl.u32 %v340_v36, 7 }
   0xe   :  { %v2836_v40 = vld [vmem:[%s4056_s1 + $0x2d4] ss:$12 sps:$4 sm:$0xff]   ;;  %v2839_v44 = vld [vmem:[%s4056_s1 + $0x2d0] ss:$12 sps:$4 sm:$0xff]   ;;  %v2844_v47 = vld [vmem:[%s4056_s1 + $0x138] ss:$12 sps:$4 sm:$0xff]  }
   0xf   :  { %1714 = vmatpush1.bf16.msra.mxu0 %v2802_v14  ;;  %v2840_v45 = vld [vmem:[%s4056_s1 + $0x13c] ss:$12 sps:$4 sm:$0xff]   ;;  %v2845_v48 = vld [vmem:[%s4056_s1 + $0x2b8] ss:$12 sps:$4 sm:$0xff]   ;;  %v3308_v49 = vsub.s32 %v360_v43, %v3290_v42  ;;  %v2850_v53 = vld [vmem:[%s4056_s1 + $0x120] ss:$12 sps:$4 sm:$0xff]  }
  0x10   :  { %1755 = vmatpush1.bf16.msra.mxu1 %v2803_v15  ;;  %1715 = vmatprep.subr.bf16.mxu0 %v2804_v16  ;;  %v2842_v46 = vld [vmem:[%s4056_s1 + $0x2bc] ss:$12 sps:$4 sm:$0xff]   ;;  %v2846_v50 = vld [vmem:[%s4056_s1 + $0x124] ss:$12 sps:$4 sm:$0xff]   ;;  %v2851_v55 = vld [vmem:[%s4056_s1 + $0x2a0] ss:$12 sps:$4 sm:$0xff]  }
  0x11   :  { %1756 = vmatprep.subr.bf16.mxu1 %v2806_v17  ;;  %v2848_v51 = vld [vmem:[%s4056_s1 + $0x2a4] ss:$12 sps:$4 sm:$0xff]   ;;  %v2852_v56 = vld [vmem:[%s4056_s1 + $0x10c] ss:$12 sps:$4 sm:$0xff]   ;;  %v2856_v59 = vld [vmem:[%s4056_s1 + $0x108] ss:$12 sps:$4 sm:$0xff]  }
  0x12   :  { %v22_v52 = vld [vmem:[%s4055_s0] sm:$0xff]  ;;  %v2854_v57 = vld [vmem:[%s4056_s1 + $0x28c] ss:$12 sps:$4 sm:$0xff]   ;;  %v2857_v61 = vld [vmem:[%s4056_s1 + $0x288] ss:$12 sps:$4 sm:$0xff]  }
  0x13   :  { %1716 = vmatpush1.bf16.msra.mxu0 %v2808_v18  ;;  %v364_v54 = vrot.slane %v22_v52, %v3308_v49  ;;  %v2858_v62 = vld [vmem:[%s4056_s1 + $0xf4] ss:$12 sps:$4 sm:$0xff]   ;;  %v357_v1 = vcombine.high %v22_v52, %v22_v52  ;;  %v2862_v2 = vld [vmem:[%s4056_s1 + $0xf0] ss:$12 sps:$4 sm:$0xff]   ;;  %v2868_v7 = vld [vmem:[%s4056_s1 + $0xd8] ss:$12 sps:$4 sm:$0xff]  }
  0x14   :  { %1757 = vmatpush1.bf16.msra.mxu1 %v2809_v19  ;;  %1717 = vmatprep.subr.bf16.mxu0 %v2810_v20  ;;  %v2860_v63 = vld [vmem:[%s4056_s1 + $0x274] ss:$12 sps:$4 sm:$0xff]   ;;  %v2863_v3 = vld [vmem:[%s4056_s1 + $0x270] ss:$12 sps:$4 sm:$0xff]   ;;  %v2869_v8 = vld [vmem:[%s4056_s1 + $0x258] ss:$12 sps:$4 sm:$0xff]  }
  0x15   :  { %1758 = vmatprep.subr.bf16.mxu1 %v2812_v21  ;;  %v372_v58 = vcombine.high %v364_v54, %v364_v54  ;;  %v2864_v4 = vld [vmem:[%s4056_s1 + $0xdc] ss:$12 sps:$4 sm:$0xff]   ;;  %v3366_v6 = vrot.slane %v357_v1, %v3308_v49  ;;  %v2870_v9 = vld [vmem:[%s4056_s1 + $0xc4] ss:$12 sps:$4 sm:$0xff]   ;;  %v2874_v12 = vld [vmem:[%s4056_s1 + $0xc0] ss:$12 sps:$4 sm:$0xff]   ;;  %v3386_v13 = vrot.slane %v364_v54, %v3308_v49 }
  0x16   :  { %v2866_v5 = vld [vmem:[%s4056_s1 + $0x25c] ss:$12 sps:$4 sm:$0xff]   ;;  %v2872_v10 = vld [vmem:[%s4056_s1 + $0x244] ss:$12 sps:$4 sm:$0xff]   ;;  %v2875_v14 = vld [vmem:[%s4056_s1 + $0x240] ss:$12 sps:$4 sm:$0xff]  }
  0x17   :  { %1718 = vmatpush1.bf16.msra.mxu0 %v2814_v22  ;;  %v3336_v60 = vrot.slane %v372_v58, %v3308_v49  ;;  %v373_v11 = vcombine.high %v3366_v6, %v3366_v6  ;;  %v2878_v15 = vld [vmem:[%s4056_s1 + $0x3ac] ss:$12 sps:$4 sm:$0xff]   ;;  %v2876_v18 = vld [vmem:[%s4056_s1 + $0x3a8] ss:$12 sps:$4 sm:$0xff]   ;;  %v3405_v19 = vcombine.high %v3386_v13, %v3386_v13  ;;  %v2930_v58 = vld [vmem:[%s4056_s1 + $0x450] ss:$12 sps:$4 sm:$0xff]  }
  0x18   :  { %1759 = vmatpush1.bf16.msra.mxu1 %v2815_v23  ;;  %1719 = vmatprep.subr.bf16.mxu0 %v2816_v24  ;;  %v2881_v16 = vld [vmem:[%s4056_s1 + $0x52c] ss:$12 sps:$4 sm:$0xff]   ;;  %v2879_v20 = vld [vmem:[%s4056_s1 + $0x528] ss:$12 sps:$4 sm:$0xff]   ;;  %v2882_v24 = vld [vmem:[%s4056_s1 + $0x390] ss:$12 sps:$4 sm:$0xff]  }
  0x19   :  { %1760 = vmatprep.subr.bf16.mxu1 %v2818_v25  ;;  %v3349_v0 = vcombine.high %v3336_v60, %v3336_v60  ;;  %1739 = vmatprep.mubr.bf16.mxu0 %v3336_v60  ;;  %v3398_v17 = vrot.slane %v373_v11, %v3308_v49  ;;  %v2884_v21 = vld [vmem:[%s4056_s1 + $0x394] ss:$12 sps:$4 sm:$0xff]   ;;  %v2885_v25 = vld [vmem:[%s4056_s1 + $0x510] ss:$12 sps:$4 sm:$0xff]   ;;  %v2926_v52 = vld [vmem:[%s4056_s1 + $0x46c] ss:$12 sps:$4 sm:$0xff]  }
  0x1a   :  { %v2887_v22 = vld [vmem:[%s4056_s1 + $0x514] ss:$12 sps:$4 sm:$0xff]   ;;  %v2914_v43 = vld [vmem:[%s4056_s1 + $0x31c] ss:$12 sps:$4 sm:$0xff]   ;;  %v2939_v1 = vld [vmem:[%s4056_s1 + $0x5b8] ss:$12 sps:$4 sm:$0xff]  }
  0x1b   :  { %1720 = vmatpush1.bf16.msra.mxu0 %v2820_v26  ;;  %1780 = vmatprep.mubr.bf16.mxu1 %v3349_v0  ;;  %v3418_v23 = vcombine.high %v3398_v17, %v3398_v17  ;;  %v2890_v26 = vld [vmem:[%s4056_s1 + $0x37c] ss:$12 sps:$4 sm:$0xff]   ;;  %v2908_v38 = vld [vmem:[%s4056_s1 + $0x334] ss:$12 sps:$4 sm:$0xff]  }
  0x1c   :  { %1761 = vmatpush1.bf16.msra.mxu1 %v2821_v27  ;;  %1721 = vmatprep.subr.bf16.mxu0 %v2822_v28  ;;  %v2893_v27 = vld [vmem:[%s4056_s1 + $0x4fc] ss:$12 sps:$4 sm:$0xff]   ;;  %v2888_v28 = vld [vmem:[%s4056_s1 + $0x378] ss:$12 sps:$4 sm:$0xff]   ;;  %v2956_v11 = vld [vmem:[%s4056_s1 + $0x3f4] ss:$12 sps:$4 sm:$0xff]  }
  0x1d   :  { %1762 = vmatprep.subr.bf16.mxu1 %v2824_v29  ;;  %v2891_v29 = vld [vmem:[%s4056_s1 + $0x4f8] ss:$12 sps:$4 sm:$0xff]   ;;  %v2900_v36 = vld [vmem:[%s4056_s1 + $0x348] ss:$12 sps:$4 sm:$0xff]  }
  0x1e   :  { %v2903_v37 = vld [vmem:[%s4056_s1 + $0x4c8] ss:$12 sps:$4 sm:$0xff]  }
  0x1f   :  { %1722 = vmatpush1.bf16.msra.mxu0 %v2826_v30  ;;  %v2896_v30 = vld [vmem:[%s4056_s1 + $0x364] ss:$12 sps:$4 sm:$0xff]   ;;  %v2924_v54 = vld [vmem:[%s4056_s1 + $0x468] ss:$12 sps:$4 sm:$0xff]  }
  0x20   :  { %1763 = vmatpush1.bf16.msra.mxu1 %v2827_v31  ;;  %1723 = vmatprep.subr.bf16.mxu0 %v2828_v32  ;;  %v2899_v31 = vld [vmem:[%s4056_s1 + $0x4e4] ss:$12 sps:$4 sm:$0xff]   ;;  %v2894_v32 = vld [vmem:[%s4056_s1 + $0x360] ss:$12 sps:$4 sm:$0xff]  }
  0x21   :  { %1764 = vmatprep.subr.bf16.mxu1 %v2830_v33  ;;  %v2897_v33 = vld [vmem:[%s4056_s1 + $0x4e0] ss:$12 sps:$4 sm:$0xff]  }
  0x23   :  { %1724 = vmatpush2.bf16.msra.mxu0 %v2832_v34  ;;  %v2902_v34 = vld [vmem:[%s4056_s1 + $0x34c] ss:$12 sps:$4 sm:$0xff]  }
  0x24   :  { %1765 = vmatpush2.bf16.msra.mxu1 %v2833_v35  ;;  %1725 = vmatprep.subr.bf16.mxu0 %v2834_v39  ;;  %v2905_v35 = vld [vmem:[%s4056_s1 + $0x4cc] ss:$12 sps:$4 sm:$0xff]   ;;  %v2911_v39 = vld [vmem:[%s4056_s1 + $0x4b4] ss:$12 sps:$4 sm:$0xff]  }
  0x25   :  { %1766 = vmatprep.subr.bf16.mxu1 %v2836_v40  ;;  %v2906_v40 = vld [vmem:[%s4056_s1 + $0x330] ss:$12 sps:$4 sm:$0xff]  }
  0x27   :  { %1726 = vmatpush2.bf16.msra.mxu0 %v2838_v41  ;;  %v2909_v41 = vld [vmem:[%s4056_s1 + $0x4b0] ss:$12 sps:$4 sm:$0xff]  }
  0x28   :  { %1767 = vmatpush2.bf16.msra.mxu1 %v2839_v44  ;;  %1727 = vmatprep.subr.bf16.mxu0 %v2840_v45  ;;  %v2917_v44 = vld [vmem:[%s4056_s1 + $0x49c] ss:$12 sps:$4 sm:$0xff]   ;;  %v2912_v45 = vld [vmem:[%s4056_s1 + $0x318] ss:$12 sps:$4 sm:$0xff]  }
  0x29   :  { %1768 = vmatprep.subr.bf16.mxu1 %v2842_v46  ;;  %v2915_v46 = vld [vmem:[%s4056_s1 + $0x498] ss:$12 sps:$4 sm:$0xff]  }
  0x2b   :  { %1728 = vmatpush2.bf16.msra.mxu0 %v2844_v47  ;;  %v2920_v47 = vld [vmem:[%s4056_s1 + $0x304] ss:$12 sps:$4 sm:$0xff]  }
  0x2c   :  { %1769 = vmatpush2.bf16.msra.mxu1 %v2845_v48  ;;  %1729 = vmatprep.subr.bf16.mxu0 %v2846_v50  ;;  %v2923_v48 = vld [vmem:[%s4056_s1 + $0x484] ss:$12 sps:$4 sm:$0xff]   ;;  %v2918_v50 = vld [vmem:[%s4056_s1 + $0x300] ss:$12 sps:$4 sm:$0xff]  }
  0x2d   :  { %1770 = vmatprep.subr.bf16.mxu1 %v2848_v51  ;;  %v2921_v51 = vld [vmem:[%s4056_s1 + $0x480] ss:$12 sps:$4 sm:$0xff]  }
  0x2f   :  { %1730 = vmatpush2.bf16.msra.mxu0 %v2850_v53  ;;  %v2929_v53 = vld [vmem:[%s4056_s1 + $0x5ec] ss:$12 sps:$4 sm:$0xff]  }
  0x30   :  { %1771 = vmatpush2.bf16.msra.mxu1 %v2851_v55  ;;  %1731 = vmatprep.subr.bf16.mxu0 %v2852_v56  ;;  %v2927_v55 = vld [vmem:[%s4056_s1 + $0x5e8] ss:$12 sps:$4 sm:$0xff]  }
  0x31   :  { %1772 = vmatprep.subr.bf16.mxu1 %v2854_v57  ;;  %v2932_v56 = vld [vmem:[%s4056_s1 + $0x454] ss:$12 sps:$4 sm:$0xff]  }
  0x32   :  { %v2935_v57 = vld [vmem:[%s4056_s1 + $0x5d4] ss:$12 sps:$4 sm:$0xff]  }
  0x33   :  { %1732 = vmatpush2.bf16.msra.mxu0 %v2856_v59  ;;  %v2933_v59 = vld [vmem:[%s4056_s1 + $0x5d0] ss:$12 sps:$4 sm:$0xff]  }
  0x34   :  { %1773 = vmatpush2.bf16.msra.mxu1 %v2857_v61  ;;  %1733 = vmatprep.subr.bf16.mxu0 %v2858_v62  ;;  %v2938_v61 = vld [vmem:[%s4056_s1 + $0x43c] ss:$12 sps:$4 sm:$0xff]  }
  0x35   :  { %1774 = vmatprep.subr.bf16.mxu1 %v2860_v63  ;;  %v2941_v62 = vld [vmem:[%s4056_s1 + $0x5bc] ss:$12 sps:$4 sm:$0xff]   ;;  %v2936_v63 = vld [vmem:[%s4056_s1 + $0x438] ss:$12 sps:$4 sm:$0xff]  }
  0x37   :  { %1734 = vmatpush2.bf16.msra.mxu0 %v2862_v2  ;;  %v2944_v2 = vld [vmem:[%s4056_s1 + $0x424] ss:$12 sps:$4 sm:$0xff]  }
  0x38   :  { %1775 = vmatpush2.bf16.msra.mxu1 %v2863_v3  ;;  %1735 = vmatprep.subr.bf16.mxu0 %v2864_v4  ;;  %v2947_v3 = vld [vmem:[%s4056_s1 + $0x5a4] ss:$12 sps:$4 sm:$0xff]   ;;  %v2942_v4 = vld [vmem:[%s4056_s1 + $0x420] ss:$12 sps:$4 sm:$0xff]  }
  0x39   :  { %1776 = vmatprep.subr.bf16.mxu1 %v2866_v5  ;;  %v2945_v5 = vld [vmem:[%s4056_s1 + $0x5a0] ss:$12 sps:$4 sm:$0xff]  }
  0x3b   :  { %1736 = vmatpush2.bf16.msra.mxu0 %v2868_v7  ;;  %v2950_v7 = vld [vmem:[%s4056_s1 + $0x40c] ss:$12 sps:$4 sm:$0xff]  }
  0x3c   :  { %1777 = vmatpush2.bf16.msra.mxu1 %v2869_v8  ;;  %1737 = vmatprep.subr.bf16.mxu0 %v2870_v9  ;;  %v2953_v8 = vld [vmem:[%s4056_s1 + $0x58c] ss:$12 sps:$4 sm:$0xff]   ;;  %v2948_v9 = vld [vmem:[%s4056_s1 + $0x408] ss:$12 sps:$4 sm:$0xff]  }
  0x3d   :  { %1778 = vmatprep.subr.bf16.mxu1 %v2872_v10  ;;  %v2951_v10 = vld [vmem:[%s4056_s1 + $0x588] ss:$12 sps:$4 sm:$0xff]  }
  0x3f   :  { %1738 = vmatpush2.bf16.msra.mxu0 %v2874_v12  ;;  %v2959_v12 = vld [vmem:[%s4056_s1 + $0x574] ss:$12 sps:$4 sm:$0xff]  }
  0x40   :  { %1779 = vmatpush2.bf16.msra.mxu1 %v2875_v14  ;;  %1789 = vmatprep.subr.bf16.mxu0 %v2878_v15  ;;  %v2954_v14 = vld [vmem:[%s4056_s1 + $0x3f0] ss:$12 sps:$4 sm:$0xff]  }
  0x41   :  { %1830 = vmatprep.subr.bf16.mxu1 %v2881_v16  ;;  %v2957_v15 = vld [vmem:[%s4056_s1 + $0x570] ss:$12 sps:$4 sm:$0xff]  }
  0x42   :  { %1740 = vmatmul.mubr.bf16.vlgmr.msra.gmra.mxu0 %v3386_v13  ;;  %v2962_v16 = vld [vmem:[%s4056_s1 + $0x3dc] ss:$12 sps:$4 sm:$0xff]  }
  0x43   :  { %1781 = vmatmul.mubr.bf16.vlgmr.msra.gmra.mxu1 %v3405_v19  ;;  %1790 = vmatpush1.bf16.msra.mxu0 %v2876_v18  ;;  %v2965_v18 = vld [vmem:[%s4056_s1 + $0x55c] ss:$12 sps:$4 sm:$0xff]  }
  0x44   :  { %1831 = vmatpush1.bf16.msra.mxu1 %v2879_v20  ;;  %1791 = vmatprep.subr.bf16.mxu0 %v2884_v21  ;;  %v2960_v20 = vld [vmem:[%s4056_s1 + $0x3d8] ss:$12 sps:$4 sm:$0xff]  }
  0x45   :  { %1832 = vmatprep.subr.bf16.mxu1 %v2887_v22  ;;  %1821 = vmatprep.mubr.bf16.mxu0 %v3398_v17  ;;  %v2963_v21 = vld [vmem:[%s4056_s1 + $0x558] ss:$12 sps:$4 sm:$0xff]  }
  0x46   :  { %1862 = vmatprep.mubr.bf16.mxu1 %v3418_v23  ;;  %v2968_v22 = vld [vmem:[%s4056_s1 + $0x3c4] ss:$12 sps:$4 sm:$0xff]  }
  0x47   :  { %1792 = vmatpush1.bf16.msra.mxu0 %v2882_v24  ;;  %v2971_v24 = vld [vmem:[%s4056_s1 + $0x544] ss:$12 sps:$4 sm:$0xff]  }
  0x48   :  { %1833 = vmatpush1.bf16.msra.mxu1 %v2885_v25  ;;  %1793 = vmatprep.subr.bf16.mxu0 %v2890_v26  ;;  %v2966_v25 = vld [vmem:[%s4056_s1 + $0x3c0] ss:$12 sps:$4 sm:$0xff]   ;;  %v3597_v26 = vrot.slane %v3366_v6, %v3308_v49  ;;  %v2973_v6 = vld [vmem:[%s4056_s1 + $0x6a8] ss:$12 sps:$4 sm:$0xff]  }
  0x49   :  { %1834 = vmatprep.subr.bf16.mxu1 %v2893_v27  ;;  %v2969_v27 = vld [vmem:[%s4056_s1 + $0x540] ss:$12 sps:$4 sm:$0xff]  }
  0x4b   :  { %1794 = vmatpush1.bf16.msra.mxu0 %v2888_v28  ;;  %v2975_v28 = vld [vmem:[%s4056_s1 + $0x6ac] ss:$12 sps:$4 sm:$0xff]  }
  0x4c   :  { %1835 = vmatpush1.bf16.msra.mxu1 %v2891_v29  ;;  %1795 = vmatprep.subr.bf16.mxu0 %v2896_v30  ;;  %v2976_v29 = vld [vmem:[%s4056_s1 + $0x170] ss:$12 sps:$4 sm:$0xff]   ;;  %v3613_v30 = vcombine.high %v3597_v26, %v3597_v26 }
  0x4d   :  { %1836 = vmatprep.subr.bf16.mxu1 %v2899_v31  ;;  %v2977_v31 = vld [vmem:[%s4056_s1 + $0xb0] ss:$12 sps:$4 sm:$0xff]  }
  0x4f   :  { %1796 = vmatpush1.bf16.msra.mxu0 %v2894_v32  ;;  %v2980_v32 = vld [vmem:[%s4056_s1 + $0x694] ss:$12 sps:$4 sm:$0xff]  }
  0x50   :  { %1837 = vmatpush1.bf16.msra.mxu1 %v2897_v33  ;;  %1797 = vmatprep.subr.bf16.mxu0 %v2902_v34  ;;  %v2981_v33 = vld [vmem:[%s4056_s1 + $0x158] ss:$12 sps:$4 sm:$0xff]   ;;  %v2978_v34 = vld [vmem:[%s4056_s1 + $0x690] ss:$12 sps:$4 sm:$0xff]  }
  0x51   :  { %1838 = vmatprep.subr.bf16.mxu1 %v2905_v35  ;;  %v2982_v35 = vld [vmem:[%s4056_s1 + $0x98] ss:$12 sps:$4 sm:$0xff]  }
  0x53   :  { %1798 = vmatpush1.bf16.msra.mxu0 %v2900_v36  ;;  %v2985_v36 = vld [vmem:[%s4056_s1 + $0x67c] ss:$12 sps:$4 sm:$0xff]  }
  0x54   :  { %1839 = vmatpush1.bf16.msra.mxu1 %v2903_v37  ;;  %1799 = vmatprep.subr.bf16.mxu0 %v2908_v38  ;;  %v2986_v37 = vld [vmem:[%s4056_s1 + $0x140] ss:$12 sps:$4 sm:$0xff]   ;;  %v2983_v38 = vld [vmem:[%s4056_s1 + $0x678] ss:$12 sps:$4 sm:$0xff]  }
  0x55   :  { %1840 = vmatprep.subr.bf16.mxu1 %v2911_v39  ;;  %v2987_v39 = vld [vmem:[%s4056_s1 + $0x80] ss:$12 sps:$4 sm:$0xff]  }
  0x57   :  { %1800 = vmatpush1.bf16.msra.mxu0 %v2906_v40  ;;  %v3648_v40 = vld.sshfl [vmem:[%s4055_s0 + $0x8] sm:$0x11 pattern:$0x75316420] }
  0x58   :  { %1841 = vmatpush1.bf16.msra.mxu1 %v2909_v41  ;;  %1801 = vmatprep.subr.bf16.mxu0 %v2914_v43  ;;  %v2990_v41 = vld [vmem:[%s4056_s1 + $0x664] ss:$12 sps:$4 sm:$0xff]   ;;  %v413_v43 = vcombine.high %v3648_v40, %v3648_v40 }
  0x59   :  { %1842 = vmatprep.subr.bf16.mxu1 %v2917_v44  ;;  %v2988_v44 = vld [vmem:[%s4056_s1 + $0x660] ss:$12 sps:$4 sm:$0xff]  }
  0x5b   :  { %1802 = vmatpush1.bf16.msra.mxu0 %v2912_v45  ;;  %v3662_v45 = vrot.slane %v413_v43, %v3308_v49  ;;  %v3051_v43 = vld [vmem:[%s4056_s1 + $0x458] ss:$12 sps:$4 sm:$0xff]  }
  0x5c   :  { %1843 = vmatpush1.bf16.msra.mxu1 %v2915_v46  ;;  %1803 = vmatprep.subr.bf16.mxu0 %v2920_v47  ;;  %v2992_v46 = vld [vmem:[%s4056_s1 + $0x68] ss:$12 sps:$4 sm:$0xff]   ;;  %v2995_v47 = vld [vmem:[%s4056_s1 + $0x64c] ss:$12 sps:$4 sm:$0xff]  }
  0x5d   :  { %1844 = vmatprep.subr.bf16.mxu1 %v2923_v48  ;;  %v2996_v48 = vld [vmem:[%s4056_s1 + $0x110] ss:$12 sps:$4 sm:$0xff]  }
  0x5f   :  { %1804 = vmatpush1.bf16.msra.mxu0 %v2918_v50  ;;  %v2993_v50 = vld [vmem:[%s4056_s1 + $0x648] ss:$12 sps:$4 sm:$0xff]  }
  0x60   :  { %1845 = vmatpush1.bf16.msra.mxu1 %v2921_v51  ;;  %1805 = vmatprep.subr.bf16.mxu0 %v2926_v52  ;;  %v2997_v51 = vld [vmem:[%s4056_s1 + $0x50] ss:$12 sps:$4 sm:$0xff]   ;;  %v3000_v52 = vld [vmem:[%s4056_s1 + $0x634] ss:$12 sps:$4 sm:$0xff]  }
  0x61   :  { %1846 = vmatprep.subr.bf16.mxu1 %v2929_v53  ;;  %v3001_v53 = vld [vmem:[%s4056_s1 + $0xf8] ss:$12 sps:$4 sm:$0xff]  }
  0x63   :  { %1806 = vmatpush2.bf16.msra.mxu0 %v2924_v54  ;;  %v2998_v54 = vld [vmem:[%s4056_s1 + $0x630] ss:$12 sps:$4 sm:$0xff]  }
  0x64   :  { %1847 = vmatpush2.bf16.msra.mxu1 %v2927_v55  ;;  %1807 = vmatprep.subr.bf16.mxu0 %v2932_v56  ;;  %v3002_v55 = vld [vmem:[%s4056_s1 + $0x38] ss:$12 sps:$4 sm:$0xff]   ;;  %v3005_v56 = vld [vmem:[%s4056_s1 + $0x61c] ss:$12 sps:$4 sm:$0xff]  }
  0x65   :  { %1848 = vmatprep.subr.bf16.mxu1 %v2935_v57  ;;  %v3006_v57 = vld [vmem:[%s4056_s1 + $0xe0] ss:$12 sps:$4 sm:$0xff]  }
  0x67   :  { %1808 = vmatpush2.bf16.msra.mxu0 %v2930_v58  ;;  %v3003_v58 = vld [vmem:[%s4056_s1 + $0x618] ss:$12 sps:$4 sm:$0xff]  }
  0x68   :  { %1849 = vmatpush2.bf16.msra.mxu1 %v2933_v59  ;;  %1809 = vmatprep.subr.bf16.mxu0 %v2938_v61  ;;  %v3007_v59 = vld [vmem:[%s4056_s1 + $0x20] ss:$12 sps:$4 sm:$0xff]   ;;  %v3010_v61 = vld [vmem:[%s4056_s1 + $0x604] ss:$12 sps:$4 sm:$0xff]  }
  0x69   :  { %1850 = vmatprep.subr.bf16.mxu1 %v2941_v62  ;;  %v336_v62 = vld [vmem:[%s4056_s1 + $0x750] sm:$0x11] }
  0x6b   :  { %1810 = vmatpush2.bf16.msra.mxu0 %v2936_v63  ;;  %v3011_v63 = vld [vmem:[%s4056_s1 + $0xc8] ss:$12 sps:$4 sm:$0xff]  }
  0x6c   :  { %1851 = vmatpush2.bf16.msra.mxu1 %v2939_v1  ;;  %1811 = vmatprep.subr.bf16.mxu0 %v2944_v2  ;;  %v3008_v1 = vld [vmem:[%s4056_s1 + $0x600] ss:$12 sps:$4 sm:$0xff]   ;;  %v2620_v2 = vcombine.low %v336_v62, %v336_v62 }
  0x6d   :  { %1852 = vmatprep.subr.bf16.mxu1 %v2947_v3  ;;  %v3012_v3 = vld [vmem:[%s4056_s1 + $0x8] ss:$12 sps:$4 sm:$0xff]  }
  0x6f   :  { %1812 = vmatpush2.bf16.msra.mxu0 %v2942_v4  ;;  %v2621_v4 = vcombine.high %v336_v62, %v336_v62 }
  0x70   :  { %1853 = vmatpush2.bf16.msra.mxu1 %v2945_v5  ;;  %1813 = vmatprep.subr.bf16.mxu0 %v2950_v7  ;;  %v3014_v5 = vld [vmem:[%s4056_s1 + $0x2f0] ss:$12 sps:$4 sm:$0xff]  }
  0x71   :  { %1854 = vmatprep.subr.bf16.mxu1 %v2953_v8  ;;  %v3016_v7 = vld [vmem:[%s4056_s1 + $0x230] ss:$12 sps:$4 sm:$0xff]   ;;  %v1699_v8 = vsel %vm1697_vm1, %v2620_v2, 0 }
  0x73   :  { %1814 = vmatpush2.bf16.msra.mxu0 %v2948_v9  ;;  %v3019_v9 = vld [vmem:[%s4056_s1 + $0x73c] ss:$12 sps:$4 sm:$0xff]  }
  0x74   :  { %1855 = vmatpush2.bf16.msra.mxu1 %v2951_v10  ;;  %1815 = vmatprep.subr.bf16.mxu0 %v2956_v11  ;;  %v3020_v10 = vld [vmem:[%s4056_s1 + $0x2d8] ss:$12 sps:$4 sm:$0xff]  }
  0x75   :  { %1856 = vmatprep.subr.bf16.mxu1 %v2959_v12  ;;  %v3017_v11 = vld [vmem:[%s4056_s1 + $0x738] ss:$12 sps:$4 sm:$0xff]  }
  0x76   :  { %v3021_v12 = vld [vmem:[%s4056_s1 + $0x218] ss:$12 sps:$4 sm:$0xff]  }
  0x77   :  { %1816 = vmatpush2.bf16.msra.mxu0 %v2954_v14  ;;  %v3024_v14 = vld [vmem:[%s4056_s1 + $0x724] ss:$12 sps:$4 sm:$0xff]  }
  0x78   :  { %1857 = vmatpush2.bf16.msra.mxu1 %v2957_v15  ;;  %1817 = vmatprep.subr.bf16.mxu0 %v2962_v16  ;;  %v3025_v15 = vld [vmem:[%s4056_s1 + $0x2c0] ss:$12 sps:$4 sm:$0xff]  }
  0x79   :  { %1858 = vmatprep.subr.bf16.mxu1 %v2965_v18  ;;  %v3026_v16 = vld [vmem:[%s4056_s1 + $0x200] ss:$12 sps:$4 sm:$0xff]  }
  0x7a   :  { %v3029_v18 = vld [vmem:[%s4056_s1 + $0x70c] ss:$12 sps:$4 sm:$0xff]  }
  0x7b   :  { %1818 = vmatpush2.bf16.msra.mxu0 %v2960_v20  ;;  %v3030_v20 = vld [vmem:[%s4056_s1 + $0x2a8] ss:$12 sps:$4 sm:$0xff]  }
  0x7c   :  { %1859 = vmatpush2.bf16.msra.mxu1 %v2963_v21  ;;  %1819 = vmatprep.subr.bf16.mxu0 %v2968_v22  ;;  %v3031_v21 = vld [vmem:[%s4056_s1 + $0x1e8] ss:$12 sps:$4 sm:$0xff]  }
  0x7d   :  { %1860 = vmatprep.subr.bf16.mxu1 %v2971_v24  ;;  %v3034_v22 = vld [vmem:[%s4056_s1 + $0x6f4] ss:$12 sps:$4 sm:$0xff]   ;;  %v3035_v24 = vld [vmem:[%s4056_s1 + $0x290] ss:$12 sps:$4 sm:$0xff]  }
  0x7f   :  { %1820 = vmatpush2.bf16.msra.mxu0 %v2966_v25  ;;  %v3032_v25 = vld [vmem:[%s4056_s1 + $0x6f0] ss:$12 sps:$4 sm:$0xff]  }
  0x80   :  { %1861 = vmatpush2.bf16.msra.mxu1 %v2969_v27  ;;  %1871 = vmatprep.subr.bf16.mxu0 %v2975_v28  ;;  %v3036_v27 = vld [vmem:[%s4056_s1 + $0x1d0] ss:$12 sps:$4 sm:$0xff]  }
  0x81   :  { %2648 = vmatprep.subr.bf16.mxu1 %v2976_v29  ;;  %v3039_v28 = vld [vmem:[%s4056_s1 + $0x6dc] ss:$12 sps:$4 sm:$0xff]   ;;  %v3040_v29 = vld [vmem:[%s4056_s1 + $0x278] ss:$12 sps:$4 sm:$0xff]  }
  0x82   :  { %1822 = vmatmul.mubr.bf16.vlgmr.msra.gmra.mxu0 %v3597_v26 }
  0x83   :  { %1863 = vmatmul.mubr.bf16.vlgmr.msra.gmra.mxu1 %v3613_v30  ;;  %1872 = vmatpush1.bf16.msra.mxu0 %v2973_v6  ;;  %v3037_v6 = vld [vmem:[%s4056_s1 + $0x6d8] ss:$12 sps:$4 sm:$0xff]  }
  0x84   :  { %2649 = vmatpush3.bf16.msra.mxu1 %v2977_v31  ;;  %1873 = vmatprep.subr.bf16.mxu0 %v2980_v32  ;;  %v3041_v31 = vld [vmem:[%s4056_s1 + $0x1b8] ss:$12 sps:$4 sm:$0xff]  }
  0x85   :  { %2650 = vmatprep.subr.bf16.mxu1 %v2981_v33  ;;  %1944 = vmatprep.mubr.bf16.mxu1 %v3336_v60  ;;  %v2991_v60 = vld [vmem:[%s4056_s1 + $0x128] ss:$12 sps:$4 sm:$0xff]   ;;  %v3044_v32 = vld [vmem:[%s4056_s1 + $0x6c4] ss:$12 sps:$4 sm:$0xff]   ;;  %v3045_v33 = vld [vmem:[%s4056_s1 + $0x260] ss:$12 sps:$4 sm:$0xff]  }
  0x86   :  { %2624 = vmatprep.mubr.msk.bf16.mxu0 %vm1693_vm0, %v3662_v45 }
  0x87   :  { %1874 = vmatpush1.bf16.msra.mxu0 %v2978_v34  ;;  %v3042_v34 = vld [vmem:[%s4056_s1 + $0x6c0] ss:$12 sps:$4 sm:$0xff]  }
  0x88   :  { %2651 = vmatpush3.bf16.msra.mxu1 %v2982_v35  ;;  %1875 = vmatprep.subr.bf16.mxu0 %v2985_v36  ;;  %v3046_v35 = vld [vmem:[%s4056_s1 + $0x1a0] ss:$12 sps:$4 sm:$0xff]   ;;  %v3047_v36 = vld [vmem:[%s4056_s1 + $0x248] ss:$12 sps:$4 sm:$0xff]  }
  0x89   :  { %2652 = vmatprep.subr.bf16.mxu1 %v2986_v37  ;;  %v3048_v37 = vld [vmem:[%s4056_s1 + $0x470] ss:$12 sps:$4 sm:$0xff]  }
  0x8b   :  { %1876 = vmatpush1.bf16.msra.mxu0 %v2983_v38  ;;  %v3049_v38 = vld [vmem:[%s4056_s1 + $0x188] ss:$12 sps:$4 sm:$0xff]  }
  0x8c   :  { %2653 = vmatpush3.bf16.msra.mxu1 %v2987_v39  ;;  %1877 = vmatprep.subr.bf16.mxu0 %v2990_v41  ;;  %v3050_v39 = vld [vmem:[%s4056_s1 + $0x3b0] ss:$12 sps:$4 sm:$0xff]   ;;  %v3816_v41 = vrot.slane %v3648_v40, %v3308_v49  ;;  %v3055_v40 = vld [vmem:[%s4056_s1 + $0x440] ss:$12 sps:$4 sm:$0xff]  }
  0x8d   :  { %2654 = vmatprep.subr.bf16.mxu1 %v2991_v60  ;;  %v3052_v60 = vld [vmem:[%s4056_s1 + $0x5f0] ss:$12 sps:$4 sm:$0xff]  }
  0x8e   :  { %v3054_v49 = vld [vmem:[%s4056_s1 + $0x530] ss:$12 sps:$4 sm:$0xff]  }
  0x8f   :  { %1878 = vmatpush1.bf16.msra.mxu0 %v2988_v44  ;;  %v3053_v44 = vld [vmem:[%s4056_s1 + $0x398] ss:$12 sps:$4 sm:$0xff]  }
  0x90   :  { %2655 = vmatpush3.bf16.msra.mxu1 %v2992_v46  ;;  %1879 = vmatprep.subr.bf16.mxu0 %v2995_v47  ;;  %v3056_v46 = vld [vmem:[%s4056_s1 + $0x5d8] ss:$12 sps:$4 sm:$0xff]   ;;  %v3057_v47 = vld [vmem:[%s4056_s1 + $0x380] ss:$12 sps:$4 sm:$0xff]  }
  0x91   :  { %2656 = vmatprep.subr.bf16.mxu1 %v2996_v48  ;;  %v3058_v48 = vld [vmem:[%s4056_s1 + $0x518] ss:$12 sps:$4 sm:$0xff]  }
  0x93   :  { %1880 = vmatpush1.bf16.msra.mxu0 %v2993_v50  ;;  %v3059_v50 = vld [vmem:[%s4056_s1 + $0x428] ss:$12 sps:$4 sm:$0xff]  }
  0x94   :  { %2657 = vmatpush3.bf16.msra.mxu1 %v2997_v51  ;;  %1881 = vmatprep.subr.bf16.mxu0 %v3000_v52  ;;  %v3060_v51 = vld [vmem:[%s4056_s1 + $0x5c0] ss:$12 sps:$4 sm:$0xff]  }
  0x95   :  { %2658 = vmatprep.subr.bf16.mxu1 %v3001_v53 }
  0x97   :  { %1882 = vmatpush1.bf16.msra.mxu0 %v2998_v54 }
  0x98   :  { %2659 = vmatpush3.bf16.msra.mxu1 %v3002_v55  ;;  %1883 = vmatprep.subr.bf16.mxu0 %v3005_v56 }
  0x99   :  { %2660 = vmatprep.subr.bf16.mxu1 %v3006_v57 }
  0x9b   :  { %1884 = vmatpush1.bf16.msra.mxu0 %v3003_v58 }
  0x9c   :  { %2661 = vmatpush3.bf16.msra.mxu1 %v3007_v59  ;;  %1885 = vmatprep.subr.bf16.mxu0 %v3010_v61 }
  0x9d   :  { %2662 = vmatprep.subr.bf16.mxu1 %v3011_v63 }
  0x9f   :  { %1886 = vmatpush1.bf16.msra.mxu0 %v3008_v1 }
  0xa0   :  { %2663 = vmatpush3.bf16.msra.mxu1 %v3012_v3  ;;  %2623 = vmatprep.subr.msk.bf16.mxu0 %vm1697_vm1, %v2621_v4 }
  0xa1   :  { %2670 = vmatprep.subr.bf16.mxu1 %v3014_v5 }
  0xa3   :  { %1945 = vmatmul.mubr.bf16.vlgmr.msra.gmra.mxu1 %v3386_v13  ;;  %1890 = vmatpush2.bf16.msra.mxu0 %v1699_v8  ;;  %v3022_v13 = vld [vmem:[%s4056_s1 + $0x720] ss:$12 sps:$4 sm:$0xff]  }
  0xa4   :  { %2671 = vmatpush3.bf16.msra.mxu1 %v3016_v7  ;;  %1891 = vmatprep.subr.bf16.mxu0 %v3019_v9 }
  0xa5   :  { %2672 = vmatprep.subr.bf16.mxu1 %v3020_v10  ;;  %1984 = vmatprep.mubr.bf16.mxu1 %v3349_v0  ;;  %v3027_v0 = vld [vmem:[%s4056_s1 + $0x708] ss:$12 sps:$4 sm:$0xff]  }
  0xa7   :  { %1892 = vmatpush2.bf16.msra.mxu0 %v3017_v11 }
  0xa8   :  { %2673 = vmatpush3.bf16.msra.mxu1 %v3021_v12  ;;  %1893 = vmatprep.subr.bf16.mxu0 %v3024_v14 }
  0xa9   :  { %2674 = vmatprep.subr.bf16.mxu1 %v3025_v15 }
  0xab   :  { %1894 = vmatpush2.bf16.msra.mxu0 %v3022_v13 }
  0xac   :  { %2675 = vmatpush3.bf16.msra.mxu1 %v3026_v16  ;;  %1895 = vmatprep.subr.bf16.mxu0 %v3029_v18 }
  0xad   :  { %2676 = vmatprep.subr.bf16.mxu1 %v3030_v20 }
  0xaf   :  { %1896 = vmatpush2.bf16.msra.mxu0 %v3027_v0 }
  0xb0   :  { %2677 = vmatpush3.bf16.msra.mxu1 %v3031_v21  ;;  %1897 = vmatprep.subr.bf16.mxu0 %v3034_v22 }
  0xb1   :  { %2678 = vmatprep.subr.bf16.mxu1 %v3035_v24 }
  0xb3   :  { %1898 = vmatpush2.bf16.msra.mxu0 %v3032_v25 }
  0xb4   :  { %2679 = vmatpush3.bf16.msra.mxu1 %v3036_v27  ;;  %1899 = vmatprep.subr.bf16.mxu0 %v3039_v28 }
  0xb5   :  { %2680 = vmatprep.subr.bf16.mxu1 %v3040_v29 }
  0xb7   :  { %1900 = vmatpush2.bf16.msra.mxu0 %v3037_v6 }
  0xb8   :  { %2681 = vmatpush3.bf16.msra.mxu1 %v3041_v31  ;;  %1901 = vmatprep.subr.bf16.mxu0 %v3044_v32 }
  0xb9   :  { %2682 = vmatprep.subr.bf16.mxu1 %v3045_v33 }
  0xbb   :  { %1902 = vmatpush2.bf16.msra.mxu0 %v3042_v34 }
  0xbc   :  { %2683 = vmatpush3.bf16.msra.mxu1 %v3046_v35  ;;  %2692 = vmatprep.subr.bf16.mxu0 %v3048_v37 }
  0xbd   :  { %2684 = vmatprep.subr.bf16.mxu1 %v3047_v36 }
  0xbe   :  { %1904 = vmatmul.mubr.bf16.vlgmr.msra.gmra.mxu0 %v3816_v41 }
  0xbf   :  { %2693 = vmatpush3.bf16.msra.mxu0 %v3050_v39  ;;  %2024 = vmatprep.mubr.bf16.mxu0 %v3398_v17 }
  0xc0   :  { %2685 = vmatpush3.bf16.msra.mxu1 %v3049_v38  ;;  %2694 = vmatprep.subr.bf16.mxu0 %v3051_v43 }
  0xc1   :  { %2714 = vmatprep.subr.bf16.mxu1 %v3052_v60 }
  0xc3   :  { %1985 = vmatmul.mubr.bf16.vlgmr.msra.gmra.mxu1 %v3405_v19  ;;  %2695 = vmatpush3.bf16.msra.mxu0 %v3053_v44 }
  0xc4   :  { %2715 = vmatpush3.bf16.msra.mxu1 %v3054_v49  ;;  %2696 = vmatprep.subr.bf16.mxu0 %v3055_v40 }
  0xc5   :  { %2716 = vmatprep.subr.bf16.mxu1 %v3056_v46  ;;  %2064 = vmatprep.mubr.bf16.mxu1 %v3418_v23 }
  0xc6   :  { %10 = vsyncpa [#allocation3], 0  ;;  %v3061_v17 = vld [vmem:[%s4056_s1 + $0x368] ss:$12 sps:$4 sm:$0xff]   ;;  %v3062_v19 = vld [vmem:[%s4056_s1 + $0x500] ss:$12 sps:$4 sm:$0xff]  }
  0xc7   :  { %2697 = vmatpush3.bf16.msra.mxu0 %v3057_v47  ;;  %v3063_v52 = vld [vmem:[%s4056_s1 + $0x410] ss:$12 sps:$4 sm:$0xff]   ;;  %v3064_v23 = vld [vmem:[%s4056_s1 + $0x5a8] ss:$12 sps:$4 sm:$0xff]   ;;  %v3067_v55 = vld [vmem:[%s4056_s1 + $0x3f8] ss:$12 sps:$4 sm:$0xff]  }
  0xc8   :  { %2717 = vmatpush3.bf16.msra.mxu1 %v3058_v48  ;;  %2698 = vmatprep.subr.bf16.mxu0 %v3059_v50  ;;  %v3065_v53 = vld [vmem:[%s4056_s1 + $0x350] ss:$12 sps:$4 sm:$0xff]   ;;  %v3066_v54 = vld [vmem:[%s4056_s1 + $0x4e8] ss:$12 sps:$4 sm:$0xff]   ;;  %v3069_v57 = vld [vmem:[%s4056_s1 + $0x338] ss:$12 sps:$4 sm:$0xff]  }
  0xc9   :  { %2718 = vmatprep.subr.bf16.mxu1 %v3060_v51  ;;  %v3068_v56 = vld [vmem:[%s4056_s1 + $0x590] ss:$12 sps:$4 sm:$0xff]   ;;  %v3071_v59 = vld [vmem:[%s4056_s1 + $0x3e0] ss:$12 sps:$4 sm:$0xff]   ;;  %v3072_v61 = vld [vmem:[%s4056_s1 + $0x578] ss:$12 sps:$4 sm:$0xff]  }
  0xca   :  { %v3070_v58 = vld [vmem:[%s4056_s1 + $0x4d0] ss:$12 sps:$4 sm:$0xff]   ;;  %v3073_v62 = vld [vmem:[%s4056_s1 + $0x320] ss:$12 sps:$4 sm:$0xff]   ;;  %v3074_v63 = vld [vmem:[%s4056_s1 + $0x4b8] ss:$12 sps:$4 sm:$0xff]  }
  0xcb   :  { %2699 = vmatpush3.bf16.msra.mxu0 %v3061_v17  ;;  %v3075_v1 = vld [vmem:[%s4056_s1 + $0x3c8] ss:$12 sps:$4 sm:$0xff]   ;;  %v3076_v2 = vld [vmem:[%s4056_s1 + $0x560] ss:$12 sps:$4 sm:$0xff]   ;;  %v3081_v8 = vld [vmem:[%s4056_s1 + $0x6b0] ss:$12 sps:$4 sm:$0xff]  }
  0xcc   :  { %2719 = vmatpush3.bf16.msra.mxu1 %v3062_v19  ;;  %2700 = vmatprep.subr.bf16.mxu0 %v3063_v52  ;;  %v3077_v3 = vld [vmem:[%s4056_s1 + $0x308] ss:$12 sps:$4 sm:$0xff]   ;;  %v3078_v4 = vld [vmem:[%s4056_s1 + $0x4a0] ss:$12 sps:$4 sm:$0xff]   ;;  %v3139_v9 = vmov 0   ;;  %v3096_v10 = vld [vmem:[%s4058_s3 + $0x78] sm:$0xff]  }
  0xcd   :  { %2720 = vmatprep.subr.bf16.mxu1 %v3064_v23  ;;  %v3079_v5 = vld [vmem:[%s4056_s1 + $0x548] ss:$12 sps:$4 sm:$0xff]   ;;  %v3082_v11 = vld [vmem:[%s4056_s1 + $0x698] ss:$12 sps:$4 sm:$0xff]   ;;  %v3085_v18 = vld [vmem:[%s4056_s1 + $0x650] ss:$12 sps:$4 sm:$0xff]  }
  0xce   :  { %v3080_v7 = vld [vmem:[%s4056_s1 + $0x488] ss:$12 sps:$4 sm:$0xff]   ;;  %v3097_v12 = vld [vmem:[%s4058_s3 + $0x38] sm:$0xff]   ;;  %v3102_v16 = vld [vmem:[%s4058_s3 + $0x60] sm:$0xff]   ;;  %v342_v6 = vsub.s32 0, %v3290_v42  ;;  %v346_v33 = vsub.s32 1, %v3290_v42 }
  0xcf   :  { %2701 = vmatpush3.bf16.msra.mxu0 %v3065_v53  ;;  %v3098_v14 = vld [vmem:[%s4058_s3 + $0x70] sm:$0xff]   ;;  %v3101_v13 = vld [vmem:[%s4058_s3 + $0x28] sm:$0xff]   ;;  %v3103_v20 = vld [vmem:[%s4058_s3 + $0x20] sm:$0xff]   ;;  %vm3141_vm2 = vmmov 0   ;;  %vm2285_vm3 = vcmask 523264   ;;  %s3142_s26 = smov [#allocation2]  }
  0xd0   :  { %2721 = vmatpush3.bf16.msra.mxu1 %v3066_v54  ;;  %2702 = vmatprep.subr.bf16.mxu0 %v3067_v55  ;;  %v3099_v15 = vld [vmem:[%s4058_s3 + $0x30] sm:$0xff]   ;;  %v3104_v0 = vld [vmem:[%s4058_s3 + $0x58] sm:$0xff]   ;;  %v3087_v25 = vld [vmem:[%s4056_s1 + $0x620] ss:$12 sps:$4 sm:$0xff]   ;;  %s2377_s27 = sshll.u32 %s3142_s26, 4  ;;  %vm2369_vm4 = vcmask 74752   ;;  %s2378_s27 = int_to_ptr.vmem [resolvable:$true] %s2377_s27 }
  0xd1   :  { %2722 = vmatprep.subr.bf16.mxu1 %v3068_v56  ;;  %v3086_v21 = vld [vmem:[%s4056_s1 + $0x638] ss:$12 sps:$4 sm:$0xff]   ;;  %v3106_v24 = vld [vmem:[%s4058_s3 + $0x50] sm:$0xff]   ;;  %v3993_v32 = vld [vmem:[%s4057_s2] sm:$0x7]  ;;  %s3116_s28 = scalar_lea.vmem %s2378_s27, 32  ;;  %p3121_p1 = scmp.lt.s32.totalorder %s2378_s27, %s2378_s27 }
  0xd2   :  { %v3105_v22 = vld [vmem:[%s4058_s3 + $0x18] sm:$0xff]   ;;  %v3107_v27 = vld [vmem:[%s4058_s3 + $0x10] sm:$0xff]   ;;  %v3108_v34 = vld [vmem:[%s4058_s3 + $0x48] sm:$0xff]   ;;  %v343_v35 = vrot.slane %v3993_v32, %v342_v6  ;;  %v347_v38 = vrot.slane %v3993_v32, %v346_v33  ;;  %p3117_p0 = scmp.ne.s32.totalorder %s2378_s27, %s3116_s28  ;;  %p3122_p2 = scmp.lt.s32.totalorder %s3116_s28, %s3116_s28 }
  0xd3   :  { %2703 = vmatpush3.bf16.msra.mxu0 %v3069_v57  ;;  %v3088_v28 = vld [vmem:[%s4056_s1 + $0x608] ss:$12 sps:$4 sm:$0xff]   ;;  %v3089_v29 = vld [vmem:[%s4056_s1 + $0x758] ss:$0 sps:$4 sm:$0x11]   ;;  %v3110_v60 = vld [vmem:[%s4058_s3 + $0x40] sm:$0xff]  }
  0xd4   :  { %2723 = vmatpush3.bf16.msra.mxu1 %v3070_v58  ;;  %2704 = vmatprep.subr.bf16.mxu0 %v3071_v59  ;;  %v1705_v31 = vsel %vm1697_vm1, %v3089_v29, 0  ;;  %v3090_v36 = vld [vmem:[%s4056_s1 + $0x740] ss:$12 sps:$4 sm:$0xff]   ;;  %v3091_v49 = vld [vmem:[%s4056_s1 + $0x728] ss:$12 sps:$4 sm:$0xff]   ;;  %v3140_v57 = vmov 0.0   ;;  %p3123_p3 = por %p3122_p2, %p3121_p1 }
  0xd5   :  { %2724 = vmatprep.subr.bf16.mxu1 %v3072_v61  ;;  %v3109_v37 = vld [vmem:[%s4058_s3 + $0x8] sm:$0xff]   ;;  %v3111_v40 = vld [vmem:[%s4058_s3] sm:$0xff]   ;;  %v3092_v52 = vld [vmem:[%s4056_s1 + $0x710] ss:$12 sps:$4 sm:$0xff]  }
  0xd6   :  { %v3093_v54 = vld [vmem:[%s4056_s1 + $0x6f8] ss:$12 sps:$4 sm:$0xff]   ;;  %v3094_v55 = vld [vmem:[%s4056_s1 + $0x6e0] ss:$12 sps:$4 sm:$0xff]   ;;  %v3095_v56 = vld [vmem:[%s4056_s1 + $0x6c8] ss:$12 sps:$4 sm:$0xff]   ;;  %p3124_p4 = pnand %p3123_p3, %p3117_p0 }
  0xd7   :  { %2705 = vmatpush3.bf16.msra.mxu0 %v3073_v62  ;;  %v3114_v33 = vld [vmem:[%s4058_s3 + $0x88] sm:$0xff]  }
  0xd8   :  { %2725 = vmatpush3.bf16.msra.mxu1 %v3074_v63  ;;  %2706 = vmatprep.subr.bf16.mxu0 %v3075_v1 }
  0xd9   :  { %2726 = vmatprep.subr.bf16.mxu1 %v3076_v2 }
  0xdb   :  { %2707 = vmatpush3.bf16.msra.mxu0 %v3077_v3 }
  0xdc   :  { %2727 = vmatpush3.bf16.msra.mxu1 %v3078_v4  ;;  %2072 = vmatprep.subr.bf16.mxu0 %v3139_v9 }
  0xdd   :  { %2728 = vmatprep.subr.bf16.mxu1 %v3079_v5 }
  0xde   :  { %2025 = vmatmul.mubr.bf16.vlgmr.msra.gmra.mxu0 %v3597_v26  ;;  %v3083_v26 = vld [vmem:[%s4056_s1 + $0x680] ss:$12 sps:$4 sm:$0xff]  }
  0xdf   :  { %2073 = vmatpush1.bf16.msra.mxu0 %v3081_v8  ;;  %2625 = vmatprep.mubr.msk.bf16.mxu0 %vm1693_vm0, %v3662_v45  ;;  %v3100_v45 = vld [vmem:[%s4058_s3 + $0x68] sm:$0xff]  }
  0xe0   :  { %2729 = vmatpush3.bf16.msra.mxu1 %v3080_v7  ;;  %2074 = vmatprep.subr.bf16.mxu0 %v3139_v9 }
  0xe1   :  { %2736 = vmatprep.subr.bf16.mxu1 %v3096_v10 }
  0xe3   :  { %2065 = vmatmul.mubr.bf16.vlgmr.msra.gmra.mxu1 %v3613_v30  ;;  %2075 = vmatpush1.bf16.msra.mxu0 %v3082_v11  ;;  %v3084_v30 = vld [vmem:[%s4056_s1 + $0x668] ss:$12 sps:$4 sm:$0xff]  }
  0xe4   :  { %2737 = vmatpush3.bf16.msra.mxu1 %v3097_v12  ;;  %2076 = vmatprep.subr.bf16.mxu0 %v3139_v9  ;;  %v350_v12 = vsub.s32 2, %v3290_v42  ;;  %v3112_v42 = vld [vmem:[%s4058_s3 + $0x98] sm:$0xff]  }
  0xe5   :  { %2738 = vmatprep.subr.bf16.mxu1 %v3098_v14 }
  0xe7   :  { %2077 = vmatpush1.bf16.msra.mxu0 %v3083_v26 }
  0xe8   :  { %2739 = vmatpush3.bf16.msra.mxu1 %v3099_v15  ;;  %2078 = vmatprep.subr.bf16.mxu0 %v3139_v9 }
  0xe9   :  { %2740 = vmatprep.subr.bf16.mxu1 %v3100_v45  ;;  %v351_v45 = vrot.slane %v3993_v32, %v350_v12  ;;  %v3113_v32 = vld [vmem:[%s4058_s3 + $0x90] sm:$0xff]  }
  0xeb   :  { %2079 = vmatpush1.bf16.msra.mxu0 %v3084_v30 }
  0xec   :  { %2741 = vmatpush3.bf16.msra.mxu1 %v3101_v13  ;;  %2080 = vmatprep.subr.bf16.mxu0 %v3139_v9 }
  0xed   :  { %2742 = vmatprep.subr.bf16.mxu1 %v3102_v16 }
  0xef   :  { %2081 = vmatpush1.bf16.msra.mxu0 %v3085_v18 }
  0xf0   :  { %2743 = vmatpush3.bf16.msra.mxu1 %v3103_v20  ;;  %2082 = vmatprep.subr.bf16.mxu0 %v3139_v9 }
  0xf1   :  { %2744 = vmatprep.subr.bf16.mxu1 %v3104_v0 }
  0xf3   :  { %2083 = vmatpush1.bf16.msra.mxu0 %v3086_v21 }
  0xf4   :  { %2745 = vmatpush3.bf16.msra.mxu1 %v3105_v22  ;;  %2084 = vmatprep.subr.bf16.mxu0 %v3139_v9 }
  0xf5   :  { %2746 = vmatprep.subr.bf16.mxu1 %v3106_v24 }
  0xf7   :  { %2085 = vmatpush1.bf16.msra.mxu0 %v3087_v25 }
  0xf8   :  { %2747 = vmatpush3.bf16.msra.mxu1 %v3107_v27  ;;  %2086 = vmatprep.subr.bf16.mxu0 %v3139_v9 }
  0xf9   :  { %2748 = vmatprep.subr.bf16.mxu1 %v3108_v34  ;;  %v3115_v34 = vld [vmem:[%s4058_s3 + $0x80] sm:$0xff]  }
  0xfb   :  { %2087 = vmatpush1.bf16.msra.mxu0 %v3088_v28 }
  0xfc   :  { %2090 = vmatprep.subr.bf16.mxu0 %v3139_v9  ;;  %2749 = vmatpush3.bf16.msra.mxu1 %v3109_v37 }
  0xfd   :  { %2750 = vmatprep.subr.bf16.mxu1 %v3110_v60 }
  0xff   :  { %2091 = vmatpush2.bf16.msra.mxu0 %v1705_v31 }
 0x100   :  { %2092 = vmatprep.subr.bf16.mxu0 %v3139_v9  ;;  %2751 = vmatpush3.bf16.msra.mxu1 %v3111_v40 }
 0x101   :  { %2763 = vmatprep.subr.bf16.mxu1 %v3140_v57 }
 0x102   :  { %v1741_v39 = vpop.f32.mrf.mxu0 }
 0x103   :  { %v1782_v43 = vpop.f32.mrf.mxu1  ;;  %v1742_v44 = vadd.f32 %v1741_v39, %v343_v35  ;;  %2093 = vmatpush2.bf16.msra.mxu0 %v3090_v36 }
 0x104   :  { %v1743_v46 = vpop.f32.mrf.mxu0  ;;  %2094 = vmatprep.subr.bf16.mxu0 %v3139_v9 }
 0x105   :  { %v1784_v47 = vpop.f32.mrf.mxu1  ;;  %v1744_v48 = vadd.f32 %v1743_v46, %v347_v38  ;;  %v1783_v50 = vadd.f32 %v1782_v43, %v1742_v44 }
 0x106   :  { %v1745_v51 = vpop.f32.mrf.mxu0 }
 0x107   :  { %v1786_v17 = vpop.f32.mrf.mxu1  ;;  %v1785_v19 = vadd.f32 %v1784_v47, %v1744_v48  ;;  %2095 = vmatpush2.bf16.msra.mxu0 %v3091_v49 }
 0x108   :  { %v1746_v23 = vpop.f32.mrf.mxu0  ;;  %2096 = vmatprep.subr.bf16.mxu0 %v3139_v9 }
 0x109   :  { %v1787_v53 = vpop.f32.mrf.mxu1 }
 0x10b   :  { %2097 = vmatpush2.bf16.msra.mxu0 %v3092_v52 }
 0x10c   :  { %2098 = vmatprep.subr.bf16.mxu0 %v3139_v9 }
 0x10f   :  { %2099 = vmatpush2.bf16.msra.mxu0 %v3093_v54 }
 0x110   :  { %2100 = vmatprep.subr.bf16.mxu0 %v3139_v9 }
 0x113   :  { %2101 = vmatpush2.bf16.msra.mxu0 %v3094_v55 }
 0x114   :  { %2102 = vmatprep.subr.bf16.mxu0 %v3139_v9 }
 0x117   :  { %2103 = vmatpush2.bf16.msra.mxu0 %v3095_v56 }
 0x11a   :  { %2105 = vmatmul.mubr.bf16.vlgmr.msra.gmra.mxu0 %v3816_v41 }
 0x142   :  { %v1823_v58 = vpop.f32.mrf.mxu0 }
 0x143   :  { %v1864_v59 = vpop.f32.mrf.mxu1  ;;  %v1824_v11 = vadd.f32 %v1823_v58, %v1783_v50  ;;  %v2626_v58 = vld [vmem:[%s4059_s4] ss:$0 sm:$0xff] }
 0x144   :  { %v1825_v61 = vpop.f32.mrf.mxu0 }
 0x145   :  { %v1866_v62 = vpop.f32.mrf.mxu1  ;;  %v1826_v9 = vadd.f32 %v1825_v61, %v1785_v19  ;;  %v1865_v41 = vadd.f32 %v1864_v59, %v1824_v11 }
 0x146   :  { %v1827_v63 = vpop.f32.mrf.mxu0 }
 0x147   :  { %v1868_v1 = vpop.f32.mrf.mxu1  ;;  %v1867_v26 = vadd.f32 %v1866_v62, %v1826_v9 }
 0x148   :  { %v1828_v2 = vpop.f32.mrf.mxu0 }
 0x149   :  { %v1869_v3 = vpop.f32.mrf.mxu1 }
 0x163   :  { %v2664_v4 = vpop.f32.mrf.mxu1 }
 0x165   :  { %v2665_v5 = vpop.f32.mrf.mxu1 }
 0x166   :  { %v2666_v7 = vadd.f32 %v2665_v5, %v2664_v4 }
 0x167   :  { %v2667_v8 = vpop.f32.mrf.mxu1 }
 0x168   :  { %v1947_v21 = vadd.f32 %v2666_v7, %v351_v45 }
 0x169   :  { %v2668_v10 = vpop.f32.mrf.mxu1 }
 0x17e   :  { %v1905_v14 = vpop.f32.mrf.mxu0 }
 0x17f   :  { %v1906_v15 = vadd.f32 %v1905_v14, %v1865_v41 }
 0x180   :  { %v1907_v30 = vpop.f32.mrf.mxu0 }
 0x181   :  { %v1908_v13 = vadd.f32 %v1907_v30, %v1867_v26  ;;  %v2112_v16 = vmax.f32 %v1906_v15, 0.0 }
 0x182   :  { %v1909_v18 = vpop.f32.mrf.mxu0 }
 0x183   :  { %v2686_v20 = vpop.f32.mrf.mxu1  ;;  %v2113_v0 = vmax.f32 %v1908_v13, 0.0  ;;  %v2115_v28 = vpack.c.bf16 %v2112_v16, %v2112_v16 }
 0x184   :  { %v1910_v22 = vpop.f32.mrf.mxu0 }
 0x185   :  { %v2687_v24 = vpop.f32.mrf.mxu1  ;;  %v2116_v25 = vpack.c.bf16 %v2113_v0, %v2113_v0 }
 0x186   :  { %v2688_v27 = vadd.f32 %v2687_v24, %v2686_v20 }
 0x187   :  { %v2689_v29 = vpop.f32.mrf.mxu1  ;;  %2321 = vmatprep.mubr.bf16.mxu1 %v2116_v25 }
 0x188   :  { %v1987_v6 = vadd.f32 %v2688_v27, %v1947_v21  ;;  %2322 = vmatmul.mubr.bf16.vlgmr.msra.gmra.mxu1 %v2115_v28 }
 0x189   :  { %v2690_v31 = vpop.f32.mrf.mxu1  ;;  %2764 = vmatpush3.bf16.msra.mxu1 %v3112_v42  ;;  %2771 = vmatprep.mubr.msk.bf16.mxu1 %vm3141_vm2, %v3140_v57 }
 0x18a   :  { %2765 = vmatprep.subr.bf16.mxu1 %v3140_v57 }
 0x18d   :  { %2766 = vmatpush3.bf16.msra.mxu1 %v3113_v32 }
 0x18e   :  { %2767 = vmatprep.subr.bf16.mxu1 %v3140_v57 }
 0x191   :  { %2768 = vmatpush3.bf16.msra.mxu1 %v3114_v33 }
 0x192   :  { %2769 = vmatprep.subr.bf16.mxu1 %v3140_v57 }
 0x195   :  { %2770 = vmatpush3.bf16.msra.mxu1 %v3115_v34 }
 0x19e   :  { %v2708_v35 = vpop.f32.mrf.mxu0 }
 0x1a0   :  { %v2709_v36 = vpop.f32.mrf.mxu0 }
 0x1a1   :  { %v2710_v49 = vadd.f32 %v2709_v36, %v2708_v35 }
 0x1a2   :  { %v2711_v37 = vpop.f32.mrf.mxu0 }
 0x1a3   :  { %v2730_v38 = vpop.f32.mrf.mxu1  ;;  %v2027_v46 = vadd.f32 %v2710_v49, %v1987_v6 }
 0x1a4   :  { %v2712_v39 = vpop.f32.mrf.mxu0 }
 0x1a5   :  { %v2731_v43 = vpop.f32.mrf.mxu1 }
 0x1a6   :  { %v2732_v40 = vadd.f32 %v2731_v43, %v2730_v38 }
 0x1a7   :  { %v2733_v60 = vpop.f32.mrf.mxu1 }
 0x1a8   :  { %v2067_v47 = vadd.f32 %v2732_v40, %v2027_v46 }
 0x1a9   :  { %v2734_v44 = vpop.f32.mrf.mxu1 }
 0x1da   :  { %v2106_v48 = vpop.f32.mrf.mxu0 }
 0x1db   :  { %v2107_v50 = vadd.f32 %v2106_v48, %v2067_v47 }
 0x1dc   :  { %v2108_v51 = vpop.f32.mrf.mxu0 }
 0x1dd   :  { %v2114_v17 = vmax.f32 %v2107_v50, 0.0 }
 0x1de   :  { %v2109_v19 = vpop.f32.mrf.mxu0 }
 0x1df   :  { %v2117_v52 = vpack.c.bf16 %v2114_v17, %v2114_v17 }
 0x1e0   :  { %v2110_v23 = vpop.f32.mrf.mxu0 }
 0x1e1   :  { %2772 = vmatmul.mubr.msk.bf16.vlgmr.msra.gmra.mxu1 %vm2285_vm3, %v2117_v52 }
 0x248   :  { %v2752_v53 = vpop.f32.mrf.mxu1 }
 0x24a   :  { %v2753_v54 = vpop.f32.mrf.mxu1 }
 0x24b   :  { %v2754_v55 = vadd.f32 %v2753_v54, %v2752_v53 }
 0x24c   :  { %v2755_v56 = vpop.f32.mrf.mxu1 }
 0x24d   :  { %v2324_v59 = vadd.f32 %v2754_v55, %v2626_v58 }
 0x24e   :  { %v2756_v57 = vpop.f32.mrf.mxu1 }
 0x2a1   :  { %v2363_v61 = vpop.f32.mrf.mxu1 }
 0x2a2   :  { %v2364_v62 = vadd.f32 %v2363_v61, %v2324_v59 }
 0x2a3   :  { %v2773_v63 = vpop.f32.mrf.mxu1 }
 0x2a4   :  { %2370 = vst.msk [vmem:[#allocation2] sm:$0x3] %vm2369_vm4, %v2364_v62 }
 0x2a5   :  { %v2366_v1 = vpop.f32.mrf.mxu1 }
 0x2a6   :  { %3127 = shalt.err (!%p3124_p4)
}
 0x2a7   :  { %2380 = dma.vmem_to_hbm [thread:$0]  %s2378_s27, 32, %s4060_s5, [#allocation3]   ;;  %v2774_v2 = vpop.f32.mrf.mxu1 }
 0x2a8   :  { %3136 = dma.done.wait [#allocation3], 32  }
 0x2a9   :  { %3137 = vsyncadd [#allocation3], 4294967264 }
 0x2aa   :  { %2384 = vsyncpa [#allocation3], 1 }

</bundles_post_ra>
